<compile_context>
chip_gen: v6e
topology: v6e:2x2x1
jax: 0.10.0
libtpu: 0.0.40
codegen_flags: <defaults>
</compile_context>

<pallas_src>
import functools

import jax
import jax.numpy as jnp
from jax import lax
from jax.experimental import pallas as pl
from jax.experimental.pallas import tpu as pltpu

# ---- hyper-parameters mirroring SE3TransformerIterative.__init__ -----------
NUM_ITER = 3       # num_iter  : SE3-Transformer blocks with coordinate outputs
NUM_LAYERS = 2     # num_layers: attention layers per block
NUM_DEGREES = 4    # kept for documentation (basis degrees 0..3)
NUM_CHANNELS = 4   # kept for documentation
HIDDEN = 8         # radial-MLP hidden width of the equivariant surrogate
L_TOTAL = NUM_ITER * NUM_LAYERS
P_COLS = 6 * HIDDEN + 2   # [wlog|blog|vlog|wrad|brad|vrad|clog|crad] per layer

B_TILE = 128       # graphs per grid step (fills the 128-lane vreg)

# TODO(synk): GSE3Res / GNormBias / Fiber internals, the spherical-harmonic basis
# (get_basis_and_r), k-neighbour pruning (copy_without_weak_connections) and
# update_potential_values are not defined in the provided snippet; they are
# approximated by the radial-attention surrogate above.


def _select_compute_dtype():
    """bf16 inner loop only on chips with a native bf16 VALU (v6e / v7x)."""
    try:
        kind = jax.devices()[0].device_kind.lower()
    except Exception:
        return jnp.float32
    if ("v6" in kind) or ("v7" in kind):
        return jnp.bfloat16
    return jnp.float32


def _se3_iter_kernel(params_ref, x_ref, xout_ref, norms_ref, onorm_ref,
                     mask_ref, d2_ref, *, compute_dtype):
    """One batch tile (B_TILE graphs on the lane axis): NUM_ITER blocks of NUM_LAYERS layers."""
    N = x_ref.shape[1]
    BT = x_ref.shape[2]

    # Self-edge mask (fully connected graph, no self loops) — VMEM scratch, built once
    # per tile and reloaded each layer so it never pins vregs across the loops.
    row = lax.broadcasted_iota(jnp.int32, (N, N, BT), 0)
    col = lax.broadcasted_iota(jnp.int32, (N, N, BT), 1)
    mask_ref[...] = jnp.where(row == col, jnp.float32(-1e30), jnp.float32(0.0))

    def iter_body(t, x_cur):
        xc0, xc1, xc2 = x_cur                                # each (N, BT) f32

        # update_relative_positions / get_basis_and_r surrogate: edge geometry from
        # the CURRENT coordinates.  Only the invariant d2 is kept (in VMEM scratch);
        # relative positions are never held live past this point.
        diff = xc0[None, :, :] - xc0[:, None, :]
        d2 = diff * diff
        diff = xc1[None, :, :] - xc1[:, None, :]
        d2 = d2 + diff * diff
        diff = xc2[None, :, :] - xc2[:, None, :]
        d2 = d2 + diff * diff                                # (N, N, BT)
        d2_ref[...] = d2.reshape(N * N, BT)                  # tile-preserving flatten

        def layer_body(l, upd):
            u0, u1, u2 = upd
            layer = t * NUM_LAYERS + l

            # Radial MLP (scalar -> HIDDEN -> scalar), unrolled over HIDDEN.
            # Flattened (N*N, BT) so bf16 packs full (16,128) vregs on v6e/v7x.
            d2c = d2_ref[...].astype(compute_dtype)
            logit = None
            scale = None
            for h in range(HIDDEN):
                wl = params_ref[layer, 0 * HIDDEN + h].astype(compute_dtype)
                bl = params_ref[layer, 1 * HIDDEN + h].astype(compute_dtype)
                vl = params_ref[layer, 2 * HIDDEN + h].astype(compute_dtype)
                wr = params_ref[layer, 3 * HIDDEN + h].astype(compute_dtype)
                br = params_ref[layer, 4 * HIDDEN + h].astype(compute_dtype)
                vr = params_ref[layer, 5 * HIDDEN + h].astype(compute_dtype)
                tl = vl * jnp.maximum(d2c * wl + bl, 0.0)
                tr = vr * jnp.maximum(d2c * wr + br, 0.0)
                logit = tl if logit is None else logit + tl
                scale = tr if scale is None else scale + tr

            # clog is dropped: softmax over j is shift-invariant, so a per-layer
            # constant added to every logit has no effect on the attention weights.
            crad = params_ref[layer, 6 * HIDDEN + 1]
            logit_f = logit.astype(jnp.float32).reshape(N, N, BT) + mask_ref[...]
            scale_f = scale.astype(jnp.float32).reshape(N, N, BT) + crad

            # Attention over incoming edges j (sublane axis) — f32 softmax.
            m = jnp.max(logit_f, axis=1, keepdims=True)      # (N, 1, BT)
            p = jnp.exp(logit_f - m)                         # diag -> 0
            inv = pl.reciprocal(jnp.sum(p, axis=1) + 1e-20, approx=True)   # (N, BT)

            cu = p * scale_f                                 # unnormalised coeff
            csum = jnp.sum(cu, axis=1) * inv                 # (N, BT)
            # Equivariant type-1 message, rewritten so no (N,N,BT,3) tensor is live:
            #   sum_j attn*scale*(x_j - x_i) = inv*sum_j cu*x_j - x_i*(inv*sum_j cu)
            s0 = jnp.sum(cu * xc0[None, :, :], axis=1) * inv - xc0 * csum
            s1 = jnp.sum(cu * xc1[None, :, :], axis=1) * inv - xc1 * csum
            s2 = jnp.sum(cu * xc2[None, :, :], axis=1) * inv - xc2 * csum
            return (u0 + s0, u1 + s1, u2 + s2)

        zero = jnp.zeros((N, BT), jnp.float32)
        u0, u1, u2 = lax.fori_loop(0, NUM_LAYERS, layer_body, (zero, zero, zero))

        # Position update == features['1'][:, 0:1, :]; store its per-node norm.
        norms_ref[t] = jnp.sqrt(u0 * u0 + u1 * u1 + u2 * u2)          # (N, BT)
        return (xc0 + u0, xc1 + u1, xc2 + u2)

    xf0, xf1, xf2 = lax.fori_loop(0, NUM_ITER, iter_body,
                                  (x_ref[0], x_ref[1], x_ref[2]))

    xout_ref[0] = xf0
    xout_ref[1] = xf1
    xout_ref[2] = xf2
    dx = xf0 - x_ref[0]
    dy = xf1 - x_ref[1]
    dz = xf2 - x_ref[2]
    onorm_ref[...] = jnp.sqrt(dx * dx + dy * dy + dz * dz)            # (N, BT)


def se3_transformer_iterative(x, params, b_tile=B_TILE, compute_dtype=None):
    """x: (B, N, 3) f32 node positions; params: (L_TOTAL, P_COLS) f32.

    Returns (x_out (B,N,3), step_norms (B,NUM_ITER,N,1), overall_norm (B,N,1)).
    """
    if compute_dtype is None:
        compute_dtype = _select_compute_dtype()

    B, N, _ = x.shape
    num_tiles = pl.cdiv(B, b_tile)
    Bp = num_tiles * b_tile

    # Lane-dense layout: batch on the last (lane) axis.  (These relayouts are noise
    # at B~256; for production batch sizes keep coordinates in (3, N, B) upstream.)
    xt = jnp.transpose(x.astype(jnp.float32), (2, 1, 0))              # (3, N, B)
    if Bp != B:
        xt = jnp.pad(xt, ((0, 0), (0, 0), (0, Bp - B)))               # zero pad is safe

    out_shape = (
        jax.ShapeDtypeStruct((3, N, Bp), jnp.float32),                # coords
        jax.ShapeDtypeStruct((NUM_ITER, N, Bp), jnp.float32),         # update_norm_j
        jax.ShapeDtypeStruct((N, Bp), jnp.float32),                   # update_norm
    )
    grid_spec = pltpu.PrefetchScalarGridSpec(
        num_scalar_prefetch=0,
        grid=(num_tiles,),
        in_specs=[
            pl.BlockSpec(memory_space=pltpu.MemorySpace.SMEM),        # params (scalar table)
            pl.BlockSpec((3, N, b_tile), lambda b: (0, 0, b)),        # positions
        ],
        out_specs=[
            pl.BlockSpec((3, N, b_tile), lambda b: (0, 0, b)),
            pl.BlockSpec((NUM_ITER, N, b_tile), lambda b: (0, 0, b)),
            pl.BlockSpec((N, b_tile), lambda b: (0, b)),
        ],
        scratch_shapes=[
            pltpu.VMEM((N, N, b_tile), jnp.float32),                  # self-edge mask
            pltpu.VMEM((N * N, b_tile), jnp.float32),                 # pairwise |x_j - x_i|^2
        ],
    )
    cost = pl.CostEstimate(
        flops=int(Bp) * N * N * NUM_ITER * NUM_LAYERS * (6 * HIDDEN + 20),
        transcendentals=int(Bp) * N * (N * NUM_ITER * NUM_LAYERS + NUM_ITER + 1),
        bytes_accessed=4 * (int(Bp) * N * (3 + 3 + NUM_ITER + 1) + L_TOTAL * P_COLS),
    )
    kernel = functools.partial(_se3_iter_kernel, compute_dtype=compute_dtype)
    xo, no, oo = pl.pallas_call(
        kernel,
        out_shape=out_shape,
        grid_spec=grid_spec,
        compiler_params=pltpu.CompilerParams(
            dimension_semantics=("parallel",)),
        cost_estimate=cost,
    )(params, xt)

    x_out = jnp.transpose(xo, (2, 1, 0))[:B]                          # (B, N, 3)
    step_norms = jnp.transpose(no, (2, 0, 1))[:B][..., None]          # (B, NUM_ITER, N, 1)
    overall_norm = jnp.transpose(oo, (1, 0))[:B][..., None]           # (B, N, 1)
    return x_out, step_norms, overall_norm


def init_params(key):
    """Deterministic radial-MLP parameters for every (block, layer)."""
    ks = jax.random.split(key, 6)
    wlog = 0.50 * jax.random.normal(ks[0], (L_TOTAL, HIDDEN), jnp.float32)
    blog = 0.10 * jax.random.normal(ks[1], (L_TOTAL, HIDDEN), jnp.float32)
    vlog = 0.20 * jax.random.normal(ks[2], (L_TOTAL, HIDDEN), jnp.float32)
    wrad = 0.50 * jax.random.normal(ks[3], (L_TOTAL, HIDDEN), jnp.float32)
    brad = 0.10 * jax.random.normal(ks[4], (L_TOTAL, HIDDEN), jnp.float32)
    vrad = 0.05 * jax.random.normal(ks[5], (L_TOTAL, HIDDEN), jnp.float32)
    clog = jnp.zeros((L_TOTAL, 1), jnp.float32)
    crad = jnp.zeros((L_TOTAL, 1), jnp.float32)
    return jnp.concatenate([wlog, blog, vlog, wrad, brad, vrad, clog, crad], axis=-1)


if __name__ == "__main__":
    key = jax.random.PRNGKey(0)
    kx, kp = jax.random.split(key)

    B, N = 256, 8                    # 256 fully-connected 8-node graphs
                                     # -> grid of 2 lane-filled tiles (feeds both v7x cores)
    x = jax.random.normal(kx, (B, N, 3), jnp.float32)
    params = init_params(jax.random.PRNGKey(42))

    x_out, step_norms, overall_norm = se3_transformer_iterative(x, params)
    jax.block_until_ready((x_out, step_norms, overall_norm))

    assert x_out.shape == (B, N, 3)
    assert step_norms.shape == (B, NUM_ITER, N, 1)
    assert overall_norm.shape == (B, N, 1)
    assert bool(jnp.all(jnp.isfinite(x_out)))
    assert bool(jnp.all(jnp.isfinite(step_norms)))
    assert bool(jnp.all(jnp.isfinite(overall_norm)))
    print("KERNEL_OK")
</pallas_src>

<mosaic_0001>
module attributes {stable_mosaic.version = 11 : i64} {
  func.func @_se3_iter_kernel(%arg0: i32, %arg1: memref<6x50xf32, #tpu.memory_space<smem>>, %arg2: memref<3x8x128xf32, #tpu.memory_space<vmem>>, %arg3: memref<3x8x128xf32, #tpu.memory_space<vmem>>, %arg4: memref<3x8x128xf32, #tpu.memory_space<vmem>>, %arg5: memref<8x128xf32, #tpu.memory_space<vmem>>, %arg6: memref<8x8x128xf32, #tpu.memory_space<vmem>>, %arg7: memref<64x128xf32, #tpu.memory_space<vmem>>) attributes {dimension_semantics = [#tpu.dimension_semantics<parallel>], iteration_bounds = array<i64: 2>, scalar_prefetch = 0 : i64, scratch_operands = 2 : i64, tpu.core_type = #tpu.core_type<tc>, window_params = [{transform_indices = @transform_0, window_bounds = array<i64: 6, 50>}, {transform_indices = @transform_1, window_bounds = array<i64: 3, 8, 128>}, {transform_indices = @transform_2, window_bounds = array<i64: 3, 8, 128>}, {transform_indices = @transform_3, window_bounds = array<i64: 3, 8, 128>}, {transform_indices = @transform_4, window_bounds = array<i64: 8, 128>}]} {
    %0 = tpu.iota {dimensions = array<i32: 0>} : vector<8x8x128xi32>
    %1 = tpu.iota {dimensions = array<i32: 1>} : vector<8x8x128xi32>
    %2 = arith.cmpi eq, %0, %1 : vector<8x8x128xi32>
    %cst = arith.constant -1.000000e+30 : f32
    %cst_0 = arith.constant 0.000000e+00 : f32
    %3 = vector.broadcast %cst : f32 to vector<8x8x128xf32>
    %4 = vector.broadcast %cst_0 : f32 to vector<8x8x128xf32>
    %5 = arith.select %2, %3, %4 : vector<8x8x128xi1>, vector<8x8x128xf32>
    %c0 = arith.constant 0 : index
    %c0_1 = arith.constant 0 : index
    %c0_2 = arith.constant 0 : index
    %6 = vector.load %arg6[%c0, %c0_1, %c0_2] : memref<8x8x128xf32, #tpu.memory_space<vmem>>, vector<8x8x128xf32>
    tpu.vector_store %arg6[%c0, %c0_1, %c0_2], %5 {strides = array<i32>} : memref<8x8x128xf32, #tpu.memory_space<vmem>>, vector<8x8x128xf32>,
    %c0_3 = arith.constant 0 : index
    %c0_4 = arith.constant 0 : index
    %c0_5 = arith.constant 0 : index
    %7 = vector.load %arg2[%c0_3, %c0_4, %c0_5] : memref<3x8x128xf32, #tpu.memory_space<vmem>>, vector<1x8x128xf32>
    %8 = vector.shape_cast %7 : vector<1x8x128xf32> to vector<8x128xf32>
    %c1 = arith.constant 1 : index
    %c0_6 = arith.constant 0 : index
    %c0_7 = arith.constant 0 : index
    %9 = vector.load %arg2[%c1, %c0_6, %c0_7] : memref<3x8x128xf32, #tpu.memory_space<vmem>>, vector<1x8x128xf32>
    %10 = vector.shape_cast %9 : vector<1x8x128xf32> to vector<8x128xf32>
    %c2 = arith.constant 2 : index
    %c0_8 = arith.constant 0 : index
    %c0_9 = arith.constant 0 : index
    %11 = vector.load %arg2[%c2, %c0_8, %c0_9] : memref<3x8x128xf32, #tpu.memory_space<vmem>>, vector<1x8x128xf32>
    %12 = vector.shape_cast %11 : vector<1x8x128xf32> to vector<8x128xf32>
    %c0_i32 = arith.constant 0 : i32
    %c3_i32 = arith.constant 3 : i32
    %13 = arith.addi %c0_i32, %c3_i32 : i32
    %c1_i32 = arith.constant 1 : i32
    %14:3 = scf.for %arg8 = %c0_i32 to %13 step %c1_i32 iter_args(%arg9 = %8, %arg10 = %10, %arg11 = %12) -> (vector<8x128xf32>, vector<8x128xf32>, vector<8x128xf32>)  : i32 {
      %40 = vector.shape_cast %arg9 : vector<8x128xf32> to vector<1x8x128xf32>
      %41 = vector.shape_cast %arg9 : vector<8x128xf32> to vector<8x1x128xf32>
      %42 = vector.broadcast %40 : vector<1x8x128xf32> to vector<8x8x128xf32>
      %43 = vector.broadcast %41 : vector<8x1x128xf32> to vector<8x8x128xf32>
      %44 = arith.subf %42, %43 : vector<8x8x128xf32>
      %45 = arith.mulf %44, %44 : vector<8x8x128xf32>
      %46 = vector.shape_cast %arg10 : vector<8x128xf32> to vector<1x8x128xf32>
      %47 = vector.shape_cast %arg10 : vector<8x128xf32> to vector<8x1x128xf32>
      %48 = vector.broadcast %46 : vector<1x8x128xf32> to vector<8x8x128xf32>
      %49 = vector.broadcast %47 : vector<8x1x128xf32> to vector<8x8x128xf32>
      %50 = arith.subf %48, %49 : vector<8x8x128xf32>
      %51 = arith.mulf %50, %50 : vector<8x8x128xf32>
      %52 = arith.addf %45, %51 : vector<8x8x128xf32>
      %53 = vector.shape_cast %arg11 : vector<8x128xf32> to vector<1x8x128xf32>
      %54 = vector.shape_cast %arg11 : vector<8x128xf32> to vector<8x1x128xf32>
      %55 = vector.broadcast %53 : vector<1x8x128xf32> to vector<8x8x128xf32>
      %56 = vector.broadcast %54 : vector<8x1x128xf32> to vector<8x8x128xf32>
      %57 = arith.subf %55, %56 : vector<8x8x128xf32>
      %58 = arith.mulf %57, %57 : vector<8x8x128xf32>
      %59 = arith.addf %52, %58 : vector<8x8x128xf32>
      %60 = vector.shape_cast %59 : vector<8x8x128xf32> to vector<64x128xf32>
      %c0_31 = arith.constant 0 : index
      %c0_32 = arith.constant 0 : index
      %61 = vector.load %arg7[%c0_31, %c0_32] : memref<64x128xf32, #tpu.memory_space<vmem>>, vector<64x128xf32>
      tpu.vector_store %arg7[%c0_31, %c0_32], %60 {strides = array<i32>} : memref<64x128xf32, #tpu.memory_space<vmem>>, vector<64x128xf32>,
      %cst_33 = arith.constant 0.000000e+00 : f32
      %62 = vector.broadcast %cst_33 : f32 to vector<8x128xf32>
      %c0_i32_34 = arith.constant 0 : i32
      %c2_i32 = arith.constant 2 : i32
      %63 = arith.addi %c0_i32_34, %c2_i32 : i32
      %c1_i32_35 = arith.constant 1 : i32
      %64:3 = scf.for %arg12 = %c0_i32_34 to %63 step %c1_i32_35 iter_args(%arg13 = %62, %arg14 = %62, %arg15 = %62) -> (vector<8x128xf32>, vector<8x128xf32>, vector<8x128xf32>)  : i32 {
        %c2_i32_39 = arith.constant 2 : i32
        %78 = arith.muli %arg8, %c2_i32_39 : i32
        %79 = arith.addi %78, %arg12 : i32
        %c0_40 = arith.constant 0 : index
        %c0_41 = arith.constant 0 : index
        %80 = vector.load %arg7[%c0_40, %c0_41] : memref<64x128xf32, #tpu.memory_space<vmem>>, vector<64x128xf32>
        %81 = arith.index_cast %79 : i32 to index
        %c0_42 = arith.constant 0 : index
        %82 = memref.load %arg1[%81, %c0_42] : memref<6x50xf32, #tpu.memory_space<smem>>
        %83 = arith.index_cast %79 : i32 to index
        %c8 = arith.constant 8 : index
        %84 = memref.load %arg1[%83, %c8] : memref<6x50xf32, #tpu.memory_space<smem>>
        %85 = arith.index_cast %79 : i32 to index
        %c16 = arith.constant 16 : index
        %86 = memref.load %arg1[%85, %c16] : memref<6x50xf32, #tpu.memory_space<smem>>
        %87 = arith.index_cast %79 : i32 to index
        %c24 = arith.constant 24 : index
        %88 = memref.load %arg1[%87, %c24] : memref<6x50xf32, #tpu.memory_space<smem>>
        %89 = arith.index_cast %79 : i32 to index
        %c32 = arith.constant 32 : index
        %90 = memref.load %arg1[%89, %c32] : memref<6x50xf32, #tpu.memory_space<smem>>
        %91 = arith.index_cast %79 : i32 to index
        %c40 = arith.constant 40 : index
        %92 = memref.load %arg1[%91, %c40] : memref<6x50xf32, #tpu.memory_space<smem>>
        %93 = vector.broadcast %82 : f32 to vector<64x128xf32>
        %94 = arith.mulf %80, %93 : vector<64x128xf32>
        %95 = vector.broadcast %84 : f32 to vector<64x128xf32>
        %96 = arith.addf %94, %95 : vector<64x128xf32>
        %cst_43 = arith.constant 0.000000e+00 : f32
        %97 = vector.broadcast %cst_43 : f32 to vector<64x128xf32>
        %98 = arith.maximumf %96, %97 : vector<64x128xf32>
        %99 = vector.broadcast %86 : f32 to vector<64x128xf32>
        %100 = arith.mulf %99, %98 : vector<64x128xf32>
        %101 = vector.broadcast %88 : f32 to vector<64x128xf32>
        %102 = arith.mulf %80, %101 : vector<64x128xf32>
        %103 = vector.broadcast %90 : f32 to vector<64x128xf32>
        %104 = arith.addf %102, %103 : vector<64x128xf32>
        %cst_44 = arith.constant 0.000000e+00 : f32
        %105 = vector.broadcast %cst_44 : f32 to vector<64x128xf32>
        %106 = arith.maximumf %104, %105 : vector<64x128xf32>
        %107 = vector.broadcast %92 : f32 to vector<64x128xf32>
        %108 = arith.mulf %107, %106 : vector<64x128xf32>
        %109 = arith.index_cast %79 : i32 to index
        %c1_45 = arith.constant 1 : index
        %110 = memref.load %arg1[%109, %c1_45] : memref<6x50xf32, #tpu.memory_space<smem>>
        %111 = arith.index_cast %79 : i32 to index
        %c9 = arith.constant 9 : index
        %112 = memref.load %arg1[%111, %c9] : memref<6x50xf32, #tpu.memory_space<smem>>
        %113 = arith.index_cast %79 : i32 to index
        %c17 = arith.constant 17 : index
        %114 = memref.load %arg1[%113, %c17] : memref<6x50xf32, #tpu.memory_space<smem>>
        %115 = arith.index_cast %79 : i32 to index
        %c25 = arith.constant 25 : index
        %116 = memref.load %arg1[%115, %c25] : memref<6x50xf32, #tpu.memory_space<smem>>
        %117 = arith.index_cast %79 : i32 to index
        %c33 = arith.constant 33 : index
        %118 = memref.load %arg1[%117, %c33] : memref<6x50xf32, #tpu.memory_space<smem>>
        %119 = arith.index_cast %79 : i32 to index
        %c41 = arith.constant 41 : index
        %120 = memref.load %arg1[%119, %c41] : memref<6x50xf32, #tpu.memory_space<smem>>
        %121 = vector.broadcast %110 : f32 to vector<64x128xf32>
        %122 = arith.mulf %80, %121 : vector<64x128xf32>
        %123 = vector.broadcast %112 : f32 to vector<64x128xf32>
        %124 = arith.addf %122, %123 : vector<64x128xf32>
        %cst_46 = arith.constant 0.000000e+00 : f32
        %125 = vector.broadcast %cst_46 : f32 to vector<64x128xf32>
        %126 = arith.maximumf %124, %125 : vector<64x128xf32>
        %127 = vector.broadcast %114 : f32 to vector<64x128xf32>
        %128 = arith.mulf %127, %126 : vector<64x128xf32>
        %129 = vector.broadcast %116 : f32 to vector<64x128xf32>
        %130 = arith.mulf %80, %129 : vector<64x128xf32>
        %131 = vector.broadcast %118 : f32 to vector<64x128xf32>
        %132 = arith.addf %130, %131 : vector<64x128xf32>
        %cst_47 = arith.constant 0.000000e+00 : f32
        %133 = vector.broadcast %cst_47 : f32 to vector<64x128xf32>
        %134 = arith.maximumf %132, %133 : vector<64x128xf32>
        %135 = vector.broadcast %120 : f32 to vector<64x128xf32>
        %136 = arith.mulf %135, %134 : vector<64x128xf32>
        %137 = arith.addf %100, %128 : vector<64x128xf32>
        %138 = arith.addf %108, %136 : vector<64x128xf32>
        %139 = arith.index_cast %79 : i32 to index
        %c2_48 = arith.constant 2 : index
        %140 = memref.load %arg1[%139, %c2_48] : memref<6x50xf32, #tpu.memory_space<smem>>
        %141 = arith.index_cast %79 : i32 to index
        %c10 = arith.constant 10 : index
        %142 = memref.load %arg1[%141, %c10] : memref<6x50xf32, #tpu.memory_space<smem>>
        %143 = arith.index_cast %79 : i32 to index
        %c18 = arith.constant 18 : index
        %144 = memref.load %arg1[%143, %c18] : memref<6x50xf32, #tpu.memory_space<smem>>
        %145 = arith.index_cast %79 : i32 to index
        %c26 = arith.constant 26 : index
        %146 = memref.load %arg1[%145, %c26] : memref<6x50xf32, #tpu.memory_space<smem>>
        %147 = arith.index_cast %79 : i32 to index
        %c34 = arith.constant 34 : index
        %148 = memref.load %arg1[%147, %c34] : memref<6x50xf32, #tpu.memory_space<smem>>
        %149 = arith.index_cast %79 : i32 to index
        %c42 = arith.constant 42 : index
        %150 = memref.load %arg1[%149, %c42] : memref<6x50xf32, #tpu.memory_space<smem>>
        %151 = vector.broadcast %140 : f32 to vector<64x128xf32>
        %152 = arith.mulf %80, %151 : vector<64x128xf32>
        %153 = vector.broadcast %142 : f32 to vector<64x128xf32>
        %154 = arith.addf %152, %153 : vector<64x128xf32>
        %cst_49 = arith.constant 0.000000e+00 : f32
        %155 = vector.broadcast %cst_49 : f32 to vector<64x128xf32>
        %156 = arith.maximumf %154, %155 : vector<64x128xf32>
        %157 = vector.broadcast %144 : f32 to vector<64x128xf32>
        %158 = arith.mulf %157, %156 : vector<64x128xf32>
        %159 = vector.broadcast %146 : f32 to vector<64x128xf32>
        %160 = arith.mulf %80, %159 : vector<64x128xf32>
        %161 = vector.broadcast %148 : f32 to vector<64x128xf32>
        %162 = arith.addf %160, %161 : vector<64x128xf32>
        %cst_50 = arith.constant 0.000000e+00 : f32
        %163 = vector.broadcast %cst_50 : f32 to vector<64x128xf32>
        %164 = arith.maximumf %162, %163 : vector<64x128xf32>
        %165 = vector.broadcast %150 : f32 to vector<64x128xf32>
        %166 = arith.mulf %165, %164 : vector<64x128xf32>
        %167 = arith.addf %137, %158 : vector<64x128xf32>
        %168 = arith.addf %138, %166 : vector<64x128xf32>
        %169 = arith.index_cast %79 : i32 to index
        %c3 = arith.constant 3 : index
        %170 = memref.load %arg1[%169, %c3] : memref<6x50xf32, #tpu.memory_space<smem>>
        %171 = arith.index_cast %79 : i32 to index
        %c11 = arith.constant 11 : index
        %172 = memref.load %arg1[%171, %c11] : memref<6x50xf32, #tpu.memory_space<smem>>
        %173 = arith.index_cast %79 : i32 to index
        %c19 = arith.constant 19 : index
        %174 = memref.load %arg1[%173, %c19] : memref<6x50xf32, #tpu.memory_space<smem>>
        %175 = arith.index_cast %79 : i32 to index
        %c27 = arith.constant 27 : index
        %176 = memref.load %arg1[%175, %c27] : memref<6x50xf32, #tpu.memory_space<smem>>
        %177 = arith.index_cast %79 : i32 to index
        %c35 = arith.constant 35 : index
        %178 = memref.load %arg1[%177, %c35] : memref<6x50xf32, #tpu.memory_space<smem>>
        %179 = arith.index_cast %79 : i32 to index
        %c43 = arith.constant 43 : index
        %180 = memref.load %arg1[%179, %c43] : memref<6x50xf32, #tpu.memory_space<smem>>
        %181 = vector.broadcast %170 : f32 to vector<64x128xf32>
        %182 = arith.mulf %80, %181 : vector<64x128xf32>
        %183 = vector.broadcast %172 : f32 to vector<64x128xf32>
        %184 = arith.addf %182, %183 : vector<64x128xf32>
        %cst_51 = arith.constant 0.000000e+00 : f32
        %185 = vector.broadcast %cst_51 : f32 to vector<64x128xf32>
        %186 = arith.maximumf %184, %185 : vector<64x128xf32>
        %187 = vector.broadcast %174 : f32 to vector<64x128xf32>
        %188 = arith.mulf %187, %186 : vector<64x128xf32>
        %189 = vector.broadcast %176 : f32 to vector<64x128xf32>
        %190 = arith.mulf %80, %189 : vector<64x128xf32>
        %191 = vector.broadcast %178 : f32 to vector<64x128xf32>
        %192 = arith.addf %190, %191 : vector<64x128xf32>
        %cst_52 = arith.constant 0.000000e+00 : f32
        %193 = vector.broadcast %cst_52 : f32 to vector<64x128xf32>
        %194 = arith.maximumf %192, %193 : vector<64x128xf32>
        %195 = vector.broadcast %180 : f32 to vector<64x128xf32>
        %196 = arith.mulf %195, %194 : vector<64x128xf32>
        %197 = arith.addf %167, %188 : vector<64x128xf32>
        %198 = arith.addf %168, %196 : vector<64x128xf32>
        %199 = arith.index_cast %79 : i32 to index
        %c4 = arith.constant 4 : index
        %200 = memref.load %arg1[%199, %c4] : memref<6x50xf32, #tpu.memory_space<smem>>
        %201 = arith.index_cast %79 : i32 to index
        %c12 = arith.constant 12 : index
        %202 = memref.load %arg1[%201, %c12] : memref<6x50xf32, #tpu.memory_space<smem>>
        %203 = arith.index_cast %79 : i32 to index
        %c20 = arith.constant 20 : index
        %204 = memref.load %arg1[%203, %c20] : memref<6x50xf32, #tpu.memory_space<smem>>
        %205 = arith.index_cast %79 : i32 to index
        %c28 = arith.constant 28 : index
        %206 = memref.load %arg1[%205, %c28] : memref<6x50xf32, #tpu.memory_space<smem>>
        %207 = arith.index_cast %79 : i32 to index
        %c36 = arith.constant 36 : index
        %208 = memref.load %arg1[%207, %c36] : memref<6x50xf32, #tpu.memory_space<smem>>
        %209 = arith.index_cast %79 : i32 to index
        %c44 = arith.constant 44 : index
        %210 = memref.load %arg1[%209, %c44] : memref<6x50xf32, #tpu.memory_space<smem>>
        %211 = vector.broadcast %200 : f32 to vector<64x128xf32>
        %212 = arith.mulf %80, %211 : vector<64x128xf32>
        %213 = vector.broadcast %202 : f32 to vector<64x128xf32>
        %214 = arith.addf %212, %213 : vector<64x128xf32>
        %cst_53 = arith.constant 0.000000e+00 : f32
        %215 = vector.broadcast %cst_53 : f32 to vector<64x128xf32>
        %216 = arith.maximumf %214, %215 : vector<64x128xf32>
        %217 = vector.broadcast %204 : f32 to vector<64x128xf32>
        %218 = arith.mulf %217, %216 : vector<64x128xf32>
        %219 = vector.broadcast %206 : f32 to vector<64x128xf32>
        %220 = arith.mulf %80, %219 : vector<64x128xf32>
        %221 = vector.broadcast %208 : f32 to vector<64x128xf32>
        %222 = arith.addf %220, %221 : vector<64x128xf32>
        %cst_54 = arith.constant 0.000000e+00 : f32
        %223 = vector.broadcast %cst_54 : f32 to vector<64x128xf32>
        %224 = arith.maximumf %222, %223 : vector<64x128xf32>
        %225 = vector.broadcast %210 : f32 to vector<64x128xf32>
        %226 = arith.mulf %225, %224 : vector<64x128xf32>
        %227 = arith.addf %197, %218 : vector<64x128xf32>
        %228 = arith.addf %198, %226 : vector<64x128xf32>
        %229 = arith.index_cast %79 : i32 to index
        %c5 = arith.constant 5 : index
        %230 = memref.load %arg1[%229, %c5] : memref<6x50xf32, #tpu.memory_space<smem>>
        %231 = arith.index_cast %79 : i32 to index
        %c13 = arith.constant 13 : index
        %232 = memref.load %arg1[%231, %c13] : memref<6x50xf32, #tpu.memory_space<smem>>
        %233 = arith.index_cast %79 : i32 to index
        %c21 = arith.constant 21 : index
        %234 = memref.load %arg1[%233, %c21] : memref<6x50xf32, #tpu.memory_space<smem>>
        %235 = arith.index_cast %79 : i32 to index
        %c29 = arith.constant 29 : index
        %236 = memref.load %arg1[%235, %c29] : memref<6x50xf32, #tpu.memory_space<smem>>
        %237 = arith.index_cast %79 : i32 to index
        %c37 = arith.constant 37 : index
        %238 = memref.load %arg1[%237, %c37] : memref<6x50xf32, #tpu.memory_space<smem>>
        %239 = arith.index_cast %79 : i32 to index
        %c45 = arith.constant 45 : index
        %240 = memref.load %arg1[%239, %c45] : memref<6x50xf32, #tpu.memory_space<smem>>
        %241 = vector.broadcast %230 : f32 to vector<64x128xf32>
        %242 = arith.mulf %80, %241 : vector<64x128xf32>
        %243 = vector.broadcast %232 : f32 to vector<64x128xf32>
        %244 = arith.addf %242, %243 : vector<64x128xf32>
        %cst_55 = arith.constant 0.000000e+00 : f32
        %245 = vector.broadcast %cst_55 : f32 to vector<64x128xf32>
        %246 = arith.maximumf %244, %245 : vector<64x128xf32>
        %247 = vector.broadcast %234 : f32 to vector<64x128xf32>
        %248 = arith.mulf %247, %246 : vector<64x128xf32>
        %249 = vector.broadcast %236 : f32 to vector<64x128xf32>
        %250 = arith.mulf %80, %249 : vector<64x128xf32>
        %251 = vector.broadcast %238 : f32 to vector<64x128xf32>
        %252 = arith.addf %250, %251 : vector<64x128xf32>
        %cst_56 = arith.constant 0.000000e+00 : f32
        %253 = vector.broadcast %cst_56 : f32 to vector<64x128xf32>
        %254 = arith.maximumf %252, %253 : vector<64x128xf32>
        %255 = vector.broadcast %240 : f32 to vector<64x128xf32>
        %256 = arith.mulf %255, %254 : vector<64x128xf32>
        %257 = arith.addf %227, %248 : vector<64x128xf32>
        %258 = arith.addf %228, %256 : vector<64x128xf32>
        %259 = arith.index_cast %79 : i32 to index
        %c6 = arith.constant 6 : index
        %260 = memref.load %arg1[%259, %c6] : memref<6x50xf32, #tpu.memory_space<smem>>
        %261 = arith.index_cast %79 : i32 to index
        %c14 = arith.constant 14 : index
        %262 = memref.load %arg1[%261, %c14] : memref<6x50xf32, #tpu.memory_space<smem>>
        %263 = arith.index_cast %79 : i32 to index
        %c22 = arith.constant 22 : index
        %264 = memref.load %arg1[%263, %c22] : memref<6x50xf32, #tpu.memory_space<smem>>
        %265 = arith.index_cast %79 : i32 to index
        %c30 = arith.constant 30 : index
        %266 = memref.load %arg1[%265, %c30] : memref<6x50xf32, #tpu.memory_space<smem>>
        %267 = arith.index_cast %79 : i32 to index
        %c38 = arith.constant 38 : index
        %268 = memref.load %arg1[%267, %c38] : memref<6x50xf32, #tpu.memory_space<smem>>
        %269 = arith.index_cast %79 : i32 to index
        %c46 = arith.constant 46 : index
        %270 = memref.load %arg1[%269, %c46] : memref<6x50xf32, #tpu.memory_space<smem>>
        %271 = vector.broadcast %260 : f32 to vector<64x128xf32>
        %272 = arith.mulf %80, %271 : vector<64x128xf32>
        %273 = vector.broadcast %262 : f32 to vector<64x128xf32>
        %274 = arith.addf %272, %273 : vector<64x128xf32>
        %cst_57 = arith.constant 0.000000e+00 : f32
        %275 = vector.broadcast %cst_57 : f32 to vector<64x128xf32>
        %276 = arith.maximumf %274, %275 : vector<64x128xf32>
        %277 = vector.broadcast %264 : f32 to vector<64x128xf32>
        %278 = arith.mulf %277, %276 : vector<64x128xf32>
        %279 = vector.broadcast %266 : f32 to vector<64x128xf32>
        %280 = arith.mulf %80, %279 : vector<64x128xf32>
        %281 = vector.broadcast %268 : f32 to vector<64x128xf32>
        %282 = arith.addf %280, %281 : vector<64x128xf32>
        %cst_58 = arith.constant 0.000000e+00 : f32
        %283 = vector.broadcast %cst_58 : f32 to vector<64x128xf32>
        %284 = arith.maximumf %282, %283 : vector<64x128xf32>
        %285 = vector.broadcast %270 : f32 to vector<64x128xf32>
        %286 = arith.mulf %285, %284 : vector<64x128xf32>
        %287 = arith.addf %257, %278 : vector<64x128xf32>
        %288 = arith.addf %258, %286 : vector<64x128xf32>
        %289 = arith.index_cast %79 : i32 to index
        %c7 = arith.constant 7 : index
        %290 = memref.load %arg1[%289, %c7] : memref<6x50xf32, #tpu.memory_space<smem>>
        %291 = arith.index_cast %79 : i32 to index
        %c15 = arith.constant 15 : index
        %292 = memref.load %arg1[%291, %c15] : memref<6x50xf32, #tpu.memory_space<smem>>
        %293 = arith.index_cast %79 : i32 to index
        %c23 = arith.constant 23 : index
        %294 = memref.load %arg1[%293, %c23] : memref<6x50xf32, #tpu.memory_space<smem>>
        %295 = arith.index_cast %79 : i32 to index
        %c31 = arith.constant 31 : index
        %296 = memref.load %arg1[%295, %c31] : memref<6x50xf32, #tpu.memory_space<smem>>
        %297 = arith.index_cast %79 : i32 to index
        %c39 = arith.constant 39 : index
        %298 = memref.load %arg1[%297, %c39] : memref<6x50xf32, #tpu.memory_space<smem>>
        %299 = arith.index_cast %79 : i32 to index
        %c47 = arith.constant 47 : index
        %300 = memref.load %arg1[%299, %c47] : memref<6x50xf32, #tpu.memory_space<smem>>
        %301 = vector.broadcast %290 : f32 to vector<64x128xf32>
        %302 = arith.mulf %80, %301 : vector<64x128xf32>
        %303 = vector.broadcast %292 : f32 to vector<64x128xf32>
        %304 = arith.addf %302, %303 : vector<64x128xf32>
        %cst_59 = arith.constant 0.000000e+00 : f32
        %305 = vector.broadcast %cst_59 : f32 to vector<64x128xf32>
        %306 = arith.maximumf %304, %305 : vector<64x128xf32>
        %307 = vector.broadcast %294 : f32 to vector<64x128xf32>
        %308 = arith.mulf %307, %306 : vector<64x128xf32>
        %309 = vector.broadcast %296 : f32 to vector<64x128xf32>
        %310 = arith.mulf %80, %309 : vector<64x128xf32>
        %311 = vector.broadcast %298 : f32 to vector<64x128xf32>
        %312 = arith.addf %310, %311 : vector<64x128xf32>
        %cst_60 = arith.constant 0.000000e+00 : f32
        %313 = vector.broadcast %cst_60 : f32 to vector<64x128xf32>
        %314 = arith.maximumf %312, %313 : vector<64x128xf32>
        %315 = vector.broadcast %300 : f32 to vector<64x128xf32>
        %316 = arith.mulf %315, %314 : vector<64x128xf32>
        %317 = arith.addf %287, %308 : vector<64x128xf32>
        %318 = arith.addf %288, %316 : vector<64x128xf32>
        %319 = arith.index_cast %79 : i32 to index
        %c49 = arith.constant 49 : index
        %320 = memref.load %arg1[%319, %c49] : memref<6x50xf32, #tpu.memory_space<smem>>
        %321 = vector.shape_cast %317 : vector<64x128xf32> to vector<8x8x128xf32>
        %c0_61 = arith.constant 0 : index
        %c0_62 = arith.constant 0 : index
        %c0_63 = arith.constant 0 : index
        %322 = vector.load %arg6[%c0_61, %c0_62, %c0_63] : memref<8x8x128xf32, #tpu.memory_space<vmem>>, vector<8x8x128xf32>
        %323 = arith.addf %321, %322 : vector<8x8x128xf32>
        %324 = vector.shape_cast %318 : vector<64x128xf32> to vector<8x8x128xf32>
        %325 = vector.broadcast %320 : f32 to vector<8x8x128xf32>
        %326 = arith.addf %324, %325 : vector<8x8x128xf32>
        %cst_64 = arith.constant dense<0xFF800000> : vector<8x128xf32>
        %327 = vector.multi_reduction <maximumf>, %323, %cst_64 [1] : vector<8x8x128xf32> to vector<8x128xf32>
        %328 = vector.shape_cast %327 : vector<8x128xf32> to vector<8x1x128xf32>
        %329 = vector.broadcast %328 : vector<8x1x128xf32> to vector<8x8x128xf32>
        %330 = arith.subf %323, %329 : vector<8x8x128xf32>
        %331 = math.exp %330 : vector<8x8x128xf32>
        %cst_65 = arith.constant dense<0.000000e+00> : vector<8x128xf32>
        %332 = vector.multi_reduction <add>, %331, %cst_65 [1] : vector<8x8x128xf32> to vector<8x128xf32>
        %cst_66 = arith.constant 9.99999968E-21 : f32
        %333 = vector.broadcast %cst_66 : f32 to vector<8x128xf32>
        %334 = arith.addf %332, %333 : vector<8x128xf32>
        %335 = tpu.reciprocal %334 {approx = true} : vector<8x128xf32> -> vector<8x128xf32>
        %336 = arith.mulf %331, %326 : vector<8x8x128xf32>
        %cst_67 = arith.constant dense<0.000000e+00> : vector<8x128xf32>
        %337 = vector.multi_reduction <add>, %336, %cst_67 [1] : vector<8x8x128xf32> to vector<8x128xf32>
        %338 = arith.mulf %337, %335 : vector<8x128xf32>
        %339 = vector.shape_cast %arg9 : vector<8x128xf32> to vector<1x8x128xf32>
        %340 = vector.broadcast %339 : vector<1x8x128xf32> to vector<8x8x128xf32>
        %341 = arith.mulf %336, %340 : vector<8x8x128xf32>
        %cst_68 = arith.constant dense<0.000000e+00> : vector<8x128xf32>
        %342 = vector.multi_reduction <add>, %341, %cst_68 [1] : vector<8x8x128xf32> to vector<8x128xf32>
        %343 = arith.mulf %342, %335 : vector<8x128xf32>
        %344 = arith.mulf %arg9, %338 : vector<8x128xf32>
        %345 = arith.subf %343, %344 : vector<8x128xf32>
        %346 = vector.shape_cast %arg10 : vector<8x128xf32> to vector<1x8x128xf32>
        %347 = vector.broadcast %346 : vector<1x8x128xf32> to vector<8x8x128xf32>
        %348 = arith.mulf %336, %347 : vector<8x8x128xf32>
        %cst_69 = arith.constant dense<0.000000e+00> : vector<8x128xf32>
        %349 = vector.multi_reduction <add>, %348, %cst_69 [1] : vector<8x8x128xf32> to vector<8x128xf32>
        %350 = arith.mulf %349, %335 : vector<8x128xf32>
        %351 = arith.mulf %arg10, %338 : vector<8x128xf32>
        %352 = arith.subf %350, %351 : vector<8x128xf32>
        %353 = vector.shape_cast %arg11 : vector<8x128xf32> to vector<1x8x128xf32>
        %354 = vector.broadcast %353 : vector<1x8x128xf32> to vector<8x8x128xf32>
        %355 = arith.mulf %336, %354 : vector<8x8x128xf32>
        %cst_70 = arith.constant dense<0.000000e+00> : vector<8x128xf32>
        %356 = vector.multi_reduction <add>, %355, %cst_70 [1] : vector<8x8x128xf32> to vector<8x128xf32>
        %357 = arith.mulf %356, %335 : vector<8x128xf32>
        %358 = arith.mulf %arg11, %338 : vector<8x128xf32>
        %359 = arith.subf %357, %358 : vector<8x128xf32>
        %360 = arith.addf %arg13, %345 : vector<8x128xf32>
        %361 = arith.addf %arg14, %352 : vector<8x128xf32>
        %362 = arith.addf %arg15, %359 : vector<8x128xf32>
        scf.yield %360, %361, %362 : vector<8x128xf32>, vector<8x128xf32>, vector<8x128xf32>
      }
      %c2_i32_36 = arith.constant 2 : i32
      %65 = arith.mulf %64#0, %64#0 : vector<8x128xf32>
      %66 = arith.mulf %64#1, %64#1 : vector<8x128xf32>
      %67 = arith.addf %65, %66 : vector<8x128xf32>
      %68 = arith.mulf %64#2, %64#2 : vector<8x128xf32>
      %69 = arith.addf %67, %68 : vector<8x128xf32>
      %70 = math.sqrt %69 : vector<8x128xf32>
      %71 = arith.index_cast %arg8 : i32 to index
      %c0_37 = arith.constant 0 : index
      %c0_38 = arith.constant 0 : index
      %72 = vector.load %arg4[%71, %c0_37, %c0_38] : memref<3x8x128xf32, #tpu.memory_space<vmem>>, vector<1x8x128xf32>
      %73 = vector.shape_cast %72 : vector<1x8x128xf32> to vector<8x128xf32>
      %74 = vector.shape_cast %70 : vector<8x128xf32> to vector<1x8x128xf32>
      tpu.vector_store %arg4[%71, %c0_37, %c0_38], %74 {strides = array<i32>} : memref<3x8x128xf32, #tpu.memory_space<vmem>>, vector<1x8x128xf32>,
      %75 = arith.addf %arg9, %64#0 : vector<8x128xf32>
      %76 = arith.addf %arg10, %64#1 : vector<8x128xf32>
      %77 = arith.addf %arg11, %64#2 : vector<8x128xf32>
      scf.yield %75, %76, %77 : vector<8x128xf32>, vector<8x128xf32>, vector<8x128xf32>
    }
    %c3_i32_10 = arith.constant 3 : i32
    %c0_11 = arith.constant 0 : index
    %c0_12 = arith.constant 0 : index
    %c0_13 = arith.constant 0 : index
    %15 = vector.load %arg3[%c0_11, %c0_12, %c0_13] : memref<3x8x128xf32, #tpu.memory_space<vmem>>, vector<1x8x128xf32>
    %16 = vector.shape_cast %15 : vector<1x8x128xf32> to vector<8x128xf32>
    %17 = vector.shape_cast %14#0 : vector<8x128xf32> to vector<1x8x128xf32>
    tpu.vector_store %arg3[%c0_11, %c0_12, %c0_13], %17 {strides = array<i32>} : memref<3x8x128xf32, #tpu.memory_space<vmem>>, vector<1x8x128xf32>,
    %c1_14 = arith.constant 1 : index
    %c0_15 = arith.constant 0 : index
    %c0_16 = arith.constant 0 : index
    %18 = vector.load %arg3[%c1_14, %c0_15, %c0_16] : memref<3x8x128xf32, #tpu.memory_space<vmem>>, vector<1x8x128xf32>
    %19 = vector.shape_cast %18 : vector<1x8x128xf32> to vector<8x128xf32>
    %20 = vector.shape_cast %14#1 : vector<8x128xf32> to vector<1x8x128xf32>
    tpu.vector_store %arg3[%c1_14, %c0_15, %c0_16], %20 {strides = array<i32>} : memref<3x8x128xf32, #tpu.memory_space<vmem>>, vector<1x8x128xf32>,
    %c2_17 = arith.constant 2 : index
    %c0_18 = arith.constant 0 : index
    %c0_19 = arith.constant 0 : index
    %21 = vector.load %arg3[%c2_17, %c0_18, %c0_19] : memref<3x8x128xf32, #tpu.memory_space<vmem>>, vector<1x8x128xf32>
    %22 = vector.shape_cast %21 : vector<1x8x128xf32> to vector<8x128xf32>
    %23 = vector.shape_cast %14#2 : vector<8x128xf32> to vector<1x8x128xf32>
    tpu.vector_store %arg3[%c2_17, %c0_18, %c0_19], %23 {strides = array<i32>} : memref<3x8x128xf32, #tpu.memory_space<vmem>>, vector<1x8x128xf32>,
    %c0_20 = arith.constant 0 : index
    %c0_21 = arith.constant 0 : index
    %c0_22 = arith.constant 0 : index
    %24 = vector.load %arg2[%c0_20, %c0_21, %c0_22] : memref<3x8x128xf32, #tpu.memory_space<vmem>>, vector<1x8x128xf32>
    %25 = vector.shape_cast %24 : vector<1x8x128xf32> to vector<8x128xf32>
    %26 = arith.subf %14#0, %25 : vector<8x128xf32>
    %c1_23 = arith.constant 1 : index
    %c0_24 = arith.constant 0 : index
    %c0_25 = arith.constant 0 : index
    %27 = vector.load %arg2[%c1_23, %c0_24, %c0_25] : memref<3x8x128xf32, #tpu.memory_space<vmem>>, vector<1x8x128xf32>
    %28 = vector.shape_cast %27 : vector<1x8x128xf32> to vector<8x128xf32>
    %29 = arith.subf %14#1, %28 : vector<8x128xf32>
    %c2_26 = arith.constant 2 : index
    %c0_27 = arith.constant 0 : index
    %c0_28 = arith.constant 0 : index
    %30 = vector.load %arg2[%c2_26, %c0_27, %c0_28] : memref<3x8x128xf32, #tpu.memory_space<vmem>>, vector<1x8x128xf32>
    %31 = vector.shape_cast %30 : vector<1x8x128xf32> to vector<8x128xf32>
    %32 = arith.subf %14#2, %31 : vector<8x128xf32>
    %33 = arith.mulf %26, %26 : vector<8x128xf32>
    %34 = arith.mulf %29, %29 : vector<8x128xf32>
    %35 = arith.addf %33, %34 : vector<8x128xf32>
    %36 = arith.mulf %32, %32 : vector<8x128xf32>
    %37 = arith.addf %35, %36 : vector<8x128xf32>
    %38 = math.sqrt %37 : vector<8x128xf32>
    %c0_29 = arith.constant 0 : index
    %c0_30 = arith.constant 0 : index
    %39 = vector.load %arg5[%c0_29, %c0_30] : memref<8x128xf32, #tpu.memory_space<vmem>>, vector<8x128xf32>
    tpu.vector_store %arg5[%c0_29, %c0_30], %38 {strides = array<i32>} : memref<8x128xf32, #tpu.memory_space<vmem>>, vector<8x128xf32>,
    return
  }
  func.func @transform_0(%arg0: i32) -> (i32, i32) {
    %c0_i32 = arith.constant 0 : i32
    %c0_i32_0 = arith.constant 0 : i32
    %c0_i32_1 = arith.constant 0 : i32
    return %c0_i32, %c0_i32_0 : i32, i32
  }
  func.func @transform_1(%arg0: i32) -> (i32, i32, i32) {
    %c0_i32 = arith.constant 0 : i32
    %c0_i32_0 = arith.constant 0 : i32
    %c0_i32_1 = arith.constant 0 : i32
    return %c0_i32, %c0_i32_0, %arg0 : i32, i32, i32
  }
  func.func @transform_2(%arg0: i32) -> (i32, i32, i32) {
    %c0_i32 = arith.constant 0 : i32
    %c0_i32_0 = arith.constant 0 : i32
    %c0_i32_1 = arith.constant 0 : i32
    return %c0_i32, %c0_i32_0, %arg0 : i32, i32, i32
  }
  func.func @transform_3(%arg0: i32) -> (i32, i32, i32) {
    %c0_i32 = arith.constant 0 : i32
    %c0_i32_0 = arith.constant 0 : i32
    %c0_i32_1 = arith.constant 0 : i32
    return %c0_i32, %c0_i32_0, %arg0 : i32, i32, i32
  }
  func.func @transform_4(%arg0: i32) -> (i32, i32) {
    %c0_i32 = arith.constant 0 : i32
    %c0_i32_0 = arith.constant 0 : i32
    return %c0_i32, %arg0 : i32, i32
  }
}

</mosaic_0001>

<bundles_post_ra>
// kernel: tpu_custom_call.1
= control target key start
LH: loop header
LB: loop body
LE: loop exit
PB: predicated region body
PF: predicated region fallthrough
CT: control target
= control target key end

     0   :  { %s5236_s0 = inlined_call_operand.hbm [shape: f32[6,50], index: 0, kind: input, shape index: {}]   ;;  %s5237_s1 = inlined_call_operand.hbm [shape: f32[3,8,256], index: 1, kind: input, shape index: {}]   ;;  %s5238_s2 = inlined_call_operand.hbm [shape: f32[3,8,256], index: 2, kind: output, shape index: {0}]   ;;  %s5239_s3 = inlined_call_operand.hbm [shape: f32[3,8,256], index: 3, kind: output, shape index: {1}]   ;;  %s5240_s4 = inlined_call_operand.hbm [shape: f32[8,256], index: 4, kind: output, shape index: {2}]  }
   0x1   :  { %5254 = sst [smem:[#allocation45_spill]] %s5236_s0 }
   0x2   :  { %10 = vsyncpa [#allocation7], 0 }
   0x3   :  { %11 = vsyncpa [#allocation5], 0 }
   0x4   :  { %13 = vsyncpa [#allocation5 + $0x1], 0 }
   0x5   :  { %14 = vsyncpa [#allocation6], 0 }
   0x6   :  { %16 = vsyncpa [#allocation6 + $0x1], 0 }
   0x7   :  { %17 = vsyncpa [#allocation11], 0 }
   0x8   :  { %19 = vsyncpa [#allocation11 + $0x1], 0  ;;  %s3316_s15 = smov 0   ;;  %s3318_s16 = smov 0  }
   0x9   :  { %s3320_s17 = smov 0   ;;  %s3322_s18 = smov 0  }
   0xa LB: > { %s3337_s19 = sadd.s32 4294967295, %s3160_s18   ;;  %s5245_s20 = sadd.s32 4294967294, %s3160_s18   ;;  %s3160_s18 = sphi %s3322_s18, %s5396_s18   ;;  %s3156_s17 = sphi %s3320_s17, %s5395_s17   ;;  %s3152_s16 = sphi %s3318_s16, %s5394_s16   ;;  %s3148_s15 = sphi %s3316_s15, %s5393_s15  }
   0xb   : > { %s3341_s21 = sadd.s32 1, %s3160_s18   ;;  %s53_s22 = sadd.s32 1, %s3156_s17 }
   0xc   : > { %s50_s23 = ssub.s32 %s3160_s18, %s3341_s21  ;;  %p60_p0 = scmp.ne.s32.totalorder %s3156_s17, %s3152_s16 }
   0xd   : > { %p51_p1 = scmp.eq.s32.totalorder %s50_s23, 0  ;;  %p61_p2 = scmp.eq.s32.totalorder %s3160_s18, 0 }
   0xe   : > { %p66_p3 = scmp.ne.s32.totalorder %s3152_s16, %s3148_s15  ;;  %p5241_p4 = scmp.eq.s32.totalorder %s3337_s19, 0 }
   0xf   : > { %s3353_s24 = scalar_select %p51_p1, %s3156_s17, %s53_s22  }
  0x10   : > { %p3355_p5 = por %p61_p2, %p60_p0  ;;  %p3361_p6 = por %p5241_p4, %p66_p3 }
  0x11   : > { %p90_p7 = scmp.eq.s32.totalorder %s3337_s19, 1  ;;  %p96_p8 = scmp.eq.s32.totalorder %s5245_s20, 1 }
  0x12   : > { %s5256_s26 = scalar_select %p3361_p6, 1, 0 }
  0x13   : > { %p2492_p9 = scmp.ge.s32.totalorder %s3160_s18, 1  ;;  %p155_p10 = scmp.lt.s32.totalorder %s3160_s18, 3 }
  0x14   : > { %p3370_p11 = por %p90_p7, %p60_p0  ;;  %p3374_p12 = por %p96_p8, %p66_p3 }
  0x15   : > { %p3378_p13 = pnand %p2492_p9, %p155_p10  ;;  %p2547_p4 = scmp.lt.s32.totalorder %s3160_s18, 2 }
  0x16   : > { %s5257_s27 = scalar_select %p3370_p11, 1, 0 }
  0x17   : > { %s5258_s28 = scalar_select %p3374_p12, 1, 0 }
  0x18   : > { %s5259_s29 = scalar_select %p3378_p13, 1, 0 }
  0x19   : > { %p2528_p2 = pneg %p3378_p13  ;;  %s177_s30 = sand.u32 1, %s3156_s17  }
  0x1a   : > { %s2495_s5 = sshll.u32 %s3160_s18, 7  ;;  %p5260_p6 = scmp.eq.s32.totalorder %s3337_s19, 0 }
  0x1b   : > { %p3392_p7 = pnand %p2547_p4, %p3355_p5  ;;  %s2514_s7 = smul.u32 24, %s177_s30 }
  0x1c   : > { %p2529_p0 = pnand %p2528_p2, %p5260_p6  ;;  %s3278_s8 = smov [#allocation4]  }
  0x1d   : > { %s5262_s0 = sld [smem:[#allocation45_spill]]  ;;  %s3402_s13 = scalar_lea.hbm %s5237_s1, %s2495_s5 }
  0x1e   : > { %s181_s14 = scalar_lea.vmem [#allocation8], %s2514_s7  ;;  %s3406_s23 = scalar_lea.sflag [#allocation5], %s177_s30 }
  0x1f   : > { %s187_s22 = sshll.u32 %s181_s14, 4  ;;  %s2892_s25 = scalar_lea.hbm %s3402_s13, 384  ;;  %s3404_s22 = int_to_ptr.vmem [resolvable:$true] %s187_s22 }
  0x20   : > { %p2893_p3 = scmp.ne.s32.totalorder %s3402_s13, %s2892_s25  ;;  %p2894_p4 = pneg %p3392_p7 }
  0x21   : > { %s2897_s5 = scalar_lea.hbm %s5237_s1, 768  ;;  %p2898_p8 = scmp.lt.s32.totalorder %s3402_s13, %s5237_s1 }
  0x22   : > { %p2895_p5 = pnand %p2894_p4, %p2893_p3  ;;  %p2899_p9 = scmp.lt.s32.totalorder %s2897_s5, %s2892_s25 }
  0x23   : > { %2531 = dma.hbm_to_smem (!%p2529_p0), %s5262_s0, 128, %s3278_s8, [#allocation7]  }
  0x24   : > { %p2896_p6 = pneg %p2895_p5  ;;  %p2900_p10 = por %p2899_p9, %p2898_p8 }
  0x26   : > { %p2901_p2 = pnand %p2900_p10, %p2896_p6 }
  0x28   : > { %2904 = shalt.err (!%p2901_p2)
}
  0x29   : > { %s2905_s30 = scalar_lea.vmem %s3404_s22, 384  ;;  %s3279_s7 = smov [#allocation8]  }
  0x2a   : > { %p2906_p0 = scmp.ne.s32.totalorder %s3404_s22, %s2905_s30  ;;  %s2910_s12 = sshll.u32 %s3279_s7, 4  ;;  %s2911_s12 = int_to_ptr.vmem [resolvable:$false] %s2910_s12 }
  0x2b   : > { %s2912_s14 = scalar_lea.vmem %s2911_s12, 768  ;;  %p2913_p5 = scmp.lt.s32.totalorder %s3404_s22, %s2911_s12 }
  0x2c   : > { %p2908_p1 = pnand %p2906_p0, %p2894_p4  ;;  %p2914_p12 = scmp.lt.s32.totalorder %s2912_s14, %s2905_s30 }
  0x2e   : > { %p2909_p3 = pneg %p2908_p1  ;;  %p2915_p11 = por %p2914_p12, %p2913_p5 }
  0x30   : > { %p2916_p13 = pnand %p2915_p11, %p2909_p3 }
  0x32   : > { %2919 = shalt.err (!%p2916_p13)
}
  0x33   : > { %s3280_s25 = smov 256   ;;  %s3281_s8 = smov 128  }
  0x34   : > { %s3282_s9 = smov 8   ;;  %p5263_p1 = scmp.ne.s32.totalorder %s5259_s29, 0 }
  0x35   : > { %2535 = dma.hbm_to_vmem [thread:$0]  (!%p3392_p7), %s3402_s13, 384, %s3404_s22, %s3406_s23, %s3280_s25, %s3281_s8, %s3282_s9  }
  0x36   : > { %199 = sbr.rel (%p5263_p1) target bundleno = 552 (0x228), region = 28 }
  0x3b   : > { %p5264_p4 = scmp.eq.s32.totalorder %s3337_s19, 0 }
  0x3d   : > { %3131 = dma.done.wait (%p5264_p4), [#allocation7], 128   ;;  %p5265_p6 = pmov %p5264_p4 }
  0x3e   : > { %s3434_s5 = sand.u32 1, %s3152_s16   ;;  %p5266_p11 = scmp.ne.s32.totalorder %s5256_s26, 0 }
  0x3f   : > { %3133 = vsyncadd (%p5265_p6), [#allocation7], 4294967168  ;;  %s3437_s10 = smul.u32 24, %s3434_s5  ;;  %s206_s6 = scalar_lea.sflag [#allocation5], %s3434_s5 }
  0x41   : > { %s3441_s13 = scalar_lea.vmem [#allocation8], %s3437_s10 }
  0x42   : > { %3135 = dma.done.wait (%p5266_p11), %s206_s6, 384  }
  0x43   : > { %3137 = vsyncadd (%p5266_p11), %s206_s6, 4294966912 }
  0x44   : > { %214 = sfence }
  0x45   : > { %v245_v0 = vlaneseq  ;;  %v271_v1 = vld [vmem:[%s3441_s13] sm:$0xff]   ;;  %v2499_v2 = vld [vmem:[%s3441_s13 + $0x8] sm:$0xff]   ;;  %v2500_v3 = vld [vmem:[%s3441_s13 + $0x10] sm:$0xff]   ;;  %s2498_s29 = sshll.u32 %s3434_s5, 3  ;;  %v3283_v5 = vmov 0.0   ;;  %s3462_s26 = scalar_lea.vmem [#allocation9], %s3437_s10 }
  0x46   : > { %s3465_s23 = scalar_lea.vmem [#allocation12], %s2498_s29  ;;  %s3473_s11 = smov 0  }
  0x47   : > { %v3451_v4 = vshrl.u32 %v245_v0, 7 }
  0x49   : > { %5267 = vst [vmem:[#allocation17_spill] sm:$0xff] %v3451_v4  ;;  %vm247_vm0 = vcmp.eq.s32.totalorder %v3451_v4, 0  ;;  %vm248_vm1 = vcmp.eq.s32.totalorder %v3451_v4, 1  ;;  %vm249_vm2 = vcmp.eq.s32.totalorder %v3451_v4, 2  ;;  %vm250_vm3 = vcmp.eq.s32.totalorder %v3451_v4, 3 }
  0x4a   : > { %v255_v6 = vsel %vm247_vm0, -1e+30, %v3283_v5  ;;  %v256_v7 = vsel %vm248_vm1, -1e+30, %v3283_v5  ;;  %v257_v8 = vsel %vm249_vm2, -1e+30, %v3283_v5 }
  0x4b   : > { %263 = vst [vmem:[#allocation2 + $0x30] sm:$0xff] %v255_v6  ;;  %264 = vst [vmem:[#allocation2] sm:$0xff] %v256_v7  ;;  %v258_v9 = vsel %vm250_vm3, -1e+30, %v3283_v5  ;;  %vm251_vm4 = vcmp.eq.s32.totalorder %v3451_v4, 4  ;;  %vm252_vm5 = vcmp.eq.s32.totalorder %v3451_v4, 5 }
  0x4c   : > { %265 = vst [vmem:[#allocation2 + $0x18] sm:$0xff] %v257_v8  ;;  %vm253_vm6 = vcmp.eq.s32.totalorder %v3451_v4, 6  ;;  %266 = vst [vmem:[#allocation2 + $0x10] sm:$0xff] %v258_v9  ;;  %v259_v10 = vsel %vm251_vm4, -1e+30, %v3283_v5  ;;  %vm254_vm7 = vcmp.eq.s32.totalorder %v3451_v4, 7 }
  0x4d   : > { %v260_v11 = vsel %vm252_vm5, -1e+30, %v3283_v5  ;;  %v261_v12 = vsel %vm253_vm6, -1e+30, %v3283_v5  ;;  %267 = vst [vmem:[#allocation2 + $0x8] sm:$0xff] %v259_v10 }
  0x4e   : > { %268 = vst [vmem:[#allocation2 + $0x20] sm:$0xff] %v260_v11  ;;  %269 = vst [vmem:[#allocation2 + $0x28] sm:$0xff] %v261_v12  ;;  %v262_v13 = vsel %vm254_vm7, -1e+30, %v3283_v5 }
  0x4f   : > { %270 = vst [vmem:[#allocation2 + $0x38] sm:$0xff] %v262_v13 }
  0x50 LB: >> { %v5268_v4 = vld [vmem:[#allocation17_spill] sm:$0xff]  ;;  %5269 = vst [vmem:[#allocation18_spill] sm:$0xff] %v3164_v3  ;;  %5270 = vst [vmem:[#allocation19_spill] sm:$0xff] %v3168_v2  ;;  %v3284_v14 = vmov 1966171168   ;;  %v286_v17 = vcombine.high %v3172_v1, %v3172_v1  ;;  %v392_v18 = vcombine.high %v3168_v2, %v3168_v2  ;;  %v506_v19 = vcombine.high %v3164_v3, %v3164_v3  ;;  %s3641_s30 = smov 0   ;;  %v3164_v3 = vphi %v2500_v3, %v5385_v3   ;;  %s3176_s11 = sphi %s3473_s11, %s281_s11   ;;  %v3172_v1 = vphi %v271_v1, %v5387_v1   ;;  %v3168_v2 = vphi %v2499_v2, %v5386_v2  }
  0x51   : >> { %5271 = vst [vmem:[#allocation20_spill] sm:$0xff] %v3172_v1  ;;  %v288_v15 = vunpack.c.l.s4 %v3284_v14  ;;  %v3499_v22 = vsub.s32 0, %v5268_v4 }
  0x53   : >> { %v289_v16 = vunpack.c.0.s8 %v288_v15 }
  0x55   : >> { %v3494_v20 = vsub.s32 %v289_v16, %v5268_v4 }
  0x57   : >> { %v293_v21 = vrot.slane %v3172_v1, %v3494_v20  ;;  %v399_v23 = vrot.slane %v3168_v2, %v3494_v20  ;;  %v513_v24 = vrot.slane %v3164_v3, %v3494_v20  ;;  %v3506_v25 = vrot.slane %v286_v17, %v3494_v20 }
  0x58   : >> { %v3509_v26 = vrot.slane %v392_v18, %v3494_v20  ;;  %v3512_v27 = vrot.slane %v506_v19, %v3494_v20 }
  0x59   : >> { %v309_v28 = vrot.slane %v293_v21, %v3494_v20  ;;  %v415_v29 = vrot.slane %v399_v23, %v3494_v20  ;;  %v529_v30 = vrot.slane %v513_v24, %v3494_v20  ;;  %v301_v31 = vcombine.high %v293_v21, %v293_v21 }
  0x5a   : >> { %v407_v32 = vcombine.high %v399_v23, %v399_v23  ;;  %v521_v33 = vcombine.high %v513_v24, %v513_v24  ;;  %v3519_v34 = vrot.slane %v3506_v25, %v3494_v20  ;;  %v3523_v35 = vrot.slane %v3509_v26, %v3494_v20 }
  0x5b   : >> { %v338_v36 = vrot.slane %v309_v28, %v3499_v22  ;;  %v444_v37 = vrot.slane %v415_v29, %v3499_v22  ;;  %v558_v38 = vrot.slane %v529_v30, %v3499_v22  ;;  %v323_v39 = vrot.slane %v301_v31, %v3494_v20 }
  0x5c   : >> { %v429_v40 = vrot.slane %v407_v32, %v3494_v20  ;;  %v543_v41 = vrot.slane %v521_v33, %v3494_v20  ;;  %v331_v42 = vcombine.high %v309_v28, %v309_v28  ;;  %v437_v43 = vcombine.high %v415_v29, %v415_v29 }
  0x5d   : >> { %v375_v44 = vsub.f32 %v3172_v1, %v338_v36  ;;  %v481_v45 = vsub.f32 %v3168_v2, %v444_v37  ;;  %v595_v46 = vsub.f32 %v3164_v3, %v558_v38  ;;  %v342_v47 = vrot.slane %v323_v39, %v3499_v22 }
  0x5e   : >> { %v448_v48 = vrot.slane %v429_v40, %v3499_v22  ;;  %v562_v49 = vrot.slane %v543_v41, %v3499_v22  ;;  %v346_v50 = vrot.slane %v331_v42, %v3499_v22  ;;  %v452_v51 = vrot.slane %v437_v43, %v3499_v22 }
  0x5f   : >> { %v383_v52 = vmul.f32 %v375_v44, %v375_v44  ;;  %v489_v53 = vmul.f32 %v481_v45, %v481_v45  ;;  %v603_v54 = vmul.f32 %v595_v46, %v595_v46  ;;  %v376_v55 = vsub.f32 %v3172_v1, %v342_v47 }
  0x60   : >> { %v482_v56 = vsub.f32 %v3168_v2, %v448_v48  ;;  %v596_v57 = vsub.f32 %v3164_v3, %v562_v49  ;;  %v377_v58 = vsub.f32 %v3172_v1, %v346_v50  ;;  %v483_v59 = vsub.f32 %v3168_v2, %v452_v51 }
  0x61   : >> { %v497_v60 = vadd.f32 %v489_v53, %v383_v52  ;;  %v384_v61 = vmul.f32 %v376_v55, %v376_v55  ;;  %v551_v62 = vcombine.high %v529_v30, %v529_v30  ;;  %v333_v63 = vcombine.high %v323_v39, %v323_v39 }
  0x62   : >> { %v490_v0 = vmul.f32 %v482_v56, %v482_v56  ;;  %v604_v5 = vmul.f32 %v596_v57, %v596_v57  ;;  %v385_v6 = vmul.f32 %v377_v58, %v377_v58  ;;  %v491_v7 = vmul.f32 %v483_v59, %v483_v59 }
  0x63   : >> { %v611_v8 = vadd.f32 %v603_v54, %v497_v60  ;;  %v566_v9 = vrot.slane %v551_v62, %v3499_v22  ;;  %v350_v10 = vrot.slane %v333_v63, %v3499_v22  ;;  %v439_v11 = vcombine.high %v429_v40, %v429_v40 }
  0x64   : >> { %v498_v12 = vadd.f32 %v490_v0, %v384_v61  ;;  %v499_v13 = vadd.f32 %v491_v7, %v385_v6  ;;  %v553_v14 = vcombine.high %v543_v41, %v543_v41  ;;  %v354_v15 = vrot.slane %v3519_v34, %v3499_v22 }
  0x65   : >> { %619 = vst [vmem:[#allocation3] sm:$0xff] %v611_v8  ;;  %v597_v16 = vsub.f32 %v3164_v3, %v566_v9  ;;  %v378_v17 = vsub.f32 %v3172_v1, %v350_v10  ;;  %v456_v18 = vrot.slane %v439_v11, %v3499_v22  ;;  %v460_v19 = vrot.slane %v3523_v35, %v3499_v22 }
  0x66   : >> { %v612_v21 = vadd.f32 %v604_v5, %v498_v12  ;;  %v570_v23 = vrot.slane %v553_v14, %v3499_v22  ;;  %v379_v24 = vsub.f32 %v3172_v1, %v354_v15  ;;  %v536_v28 = vrot.slane %v3512_v27, %v3494_v20 }
  0x67   : >> { %v605_v29 = vmul.f32 %v597_v16, %v597_v16  ;;  %v386_v30 = vmul.f32 %v378_v17, %v378_v17  ;;  %v484_v31 = vsub.f32 %v3168_v2, %v456_v18  ;;  %v485_v32 = vsub.f32 %v3168_v2, %v460_v19 }
  0x68   : >> { %620 = vst [vmem:[#allocation3 + $0x18] sm:$0xff] %v612_v21  ;;  %v598_v33 = vsub.f32 %v3164_v3, %v570_v23  ;;  %v387_v36 = vmul.f32 %v379_v24, %v379_v24  ;;  %v574_v37 = vrot.slane %v536_v28, %v3499_v22  ;;  %v302_v38 = vcombine.high %v3506_v25, %v3506_v25 }
  0x69   : >> { %v613_v39 = vadd.f32 %v605_v29, %v499_v13  ;;  %v492_v40 = vmul.f32 %v484_v31, %v484_v31  ;;  %v493_v41 = vmul.f32 %v485_v32, %v485_v32  ;;  %v408_v42 = vcombine.high %v3509_v26, %v3509_v26 }
  0x6a   : >> { %v606_v43 = vmul.f32 %v598_v33, %v598_v33  ;;  %v599_v44 = vsub.f32 %v3164_v3, %v574_v37  ;;  %v330_v45 = vrot.slane %v302_v38, %v3494_v20  ;;  %v522_v46 = vcombine.high %v3512_v27, %v3512_v27 }
  0x6b   : >> { %621 = vst [vmem:[#allocation3 + $0x10] sm:$0xff] %v613_v39  ;;  %v500_v47 = vadd.f32 %v492_v40, %v386_v30  ;;  %v501_v48 = vadd.f32 %v493_v41, %v387_v36  ;;  %v436_v49 = vrot.slane %v408_v42, %v3494_v20  ;;  %v332_v25 = vcombine.high %v3519_v34, %v3519_v34 }
  0x6c   : >> { %v607_v50 = vmul.f32 %v599_v44, %v599_v44  ;;  %v358_v51 = vrot.slane %v330_v45, %v3499_v22  ;;  %v550_v26 = vrot.slane %v522_v46, %v3494_v20  ;;  %v438_v52 = vcombine.high %v3523_v35, %v3523_v35 }
  0x6d   : >> { %v614_v53 = vadd.f32 %v606_v43, %v500_v47  ;;  %v464_v54 = vrot.slane %v436_v49, %v3499_v22  ;;  %v362_v27 = vrot.slane %v332_v25, %v3499_v22  ;;  %v552_v55 = vcombine.high %v536_v28, %v536_v28 }
  0x6e   : >> { %v615_v56 = vadd.f32 %v607_v50, %v501_v48  ;;  %v380_v57 = vsub.f32 %v3172_v1, %v358_v51  ;;  %v578_v58 = vrot.slane %v550_v26, %v3499_v22  ;;  %v468_v34 = vrot.slane %v438_v52, %v3499_v22 }
  0x6f   : >> { %622 = vst [vmem:[#allocation3 + $0x20] sm:$0xff] %v614_v53  ;;  %v486_v59 = vsub.f32 %v3168_v2, %v464_v54  ;;  %v381_v20 = vsub.f32 %v3172_v1, %v362_v27  ;;  %v582_v35 = vrot.slane %v552_v55, %v3499_v22  ;;  %v334_v60 = vcombine.high %v330_v45, %v330_v45 }
  0x70   : >> { %623 = vst [vmem:[#allocation3 + $0x28] sm:$0xff] %v615_v56  ;;  %v388_v61 = vmul.f32 %v380_v57, %v380_v57  ;;  %v600_v62 = vsub.f32 %v3164_v3, %v578_v58  ;;  %v487_v63 = vsub.f32 %v3168_v2, %v468_v34  ;;  %v440_v0 = vcombine.high %v436_v49, %v436_v49 }
  0x71   : >> { %v494_v5 = vmul.f32 %v486_v59, %v486_v59  ;;  %v389_v6 = vmul.f32 %v381_v20, %v381_v20  ;;  %v601_v7 = vsub.f32 %v3164_v3, %v582_v35  ;;  %v366_v8 = vrot.slane %v334_v60, %v3499_v22 }
  0x72   : >> { %v608_v9 = vmul.f32 %v600_v62, %v600_v62  ;;  %v495_v10 = vmul.f32 %v487_v63, %v487_v63  ;;  %v472_v11 = vrot.slane %v440_v0, %v3499_v22  ;;  %v554_v12 = vcombine.high %v550_v26, %v550_v26 }
  0x73   : >> { %v502_v13 = vadd.f32 %v494_v5, %v388_v61  ;;  %v609_v14 = vmul.f32 %v601_v7, %v601_v7  ;;  %v382_v15 = vsub.f32 %v3172_v1, %v366_v8  ;;  %v3593_v32 = vmov 0.0  }
  0x74   : >> { %v503_v16 = vadd.f32 %v495_v10, %v389_v6  ;;  %v488_v17 = vsub.f32 %v3168_v2, %v472_v11  ;;  %v586_v18 = vrot.slane %v554_v12, %v3499_v22  ;;  %v3595_v33 = vmov 0.0  }
  0x75   : >> { %v616_v19 = vadd.f32 %v608_v9, %v502_v13  ;;  %v390_v21 = vmul.f32 %v382_v15, %v382_v15  ;;  %v3597_v36 = vmov 0.0   ;;  %v3599_v37 = vmov 0.0  }
  0x76   : >> { %v617_v23 = vadd.f32 %v609_v14, %v503_v16  ;;  %v496_v24 = vmul.f32 %v488_v17, %v488_v17  ;;  %v602_v28 = vsub.f32 %v3164_v3, %v586_v18  ;;  %v3601_v22 = vmov 0.0  }
  0x77   : >> { %624 = vst [vmem:[#allocation3 + $0x8] sm:$0xff] %v616_v19  ;;  %v3603_v38 = vmov 0.0   ;;  %v3605_v39 = vmov 0.0   ;;  %v3607_v40 = vmov 0.0   ;;  %v3609_v41 = vmov 0.0  }
  0x78   : >> { %625 = vst [vmem:[#allocation3 + $0x30] sm:$0xff] %v617_v23  ;;  %v504_v29 = vadd.f32 %v496_v24, %v390_v21  ;;  %v610_v30 = vmul.f32 %v602_v28, %v602_v28  ;;  %v3611_v42 = vmov 0.0   ;;  %v3613_v43 = vmov 0.0  }
  0x79   : >> { %v3615_v44 = vmov 0.0   ;;  %v3617_v45 = vmov 0.0   ;;  %v3619_v46 = vmov 0.0   ;;  %v3621_v47 = vmov 0.0  }
  0x7a   : >> { %v618_v31 = vadd.f32 %v610_v30, %v504_v29  ;;  %v3623_v48 = vmov 0.0   ;;  %v3625_v49 = vmov 0.0   ;;  %v3627_v25 = vmov 0.0  }
  0x7b   : >> { %v3629_v50 = vmov 0.0   ;;  %v3631_v51 = vmov 0.0   ;;  %v3633_v26 = vmov 0.0   ;;  %v3635_v52 = vmov 0.0  }
  0x7c   : >> { %626 = vst [vmem:[#allocation3 + $0x38] sm:$0xff] %v618_v31  ;;  %v3637_v53 = vmov 0.0   ;;  %v3639_v54 = vmov 0.0  }
  0x7d LB: >>> { %5272 = vst [vmem:[#allocation21_spill] sm:$0xff] %v3180_v32  ;;  %5273 = vst [vmem:[#allocation22_spill] sm:$0xff] %v3184_v33  ;;  %s2501_s7 = sshll.u32 %s3176_s11, 1  ;;  %v3727_v27 = vld [vmem:[#allocation3] sm:$0xff]  ;;  %v3729_v55 = vld [vmem:[#allocation3 + $0x18] sm:$0xff]  ;;  %vm1734_vm8 = vcmask 1041409   ;;  %s3276_s30 = sphi %s3641_s30, %s632_s30   ;;  %v3272_v54 = vphi %v3639_v54, %v5372_v54   ;;  %v3268_v53 = vphi %v3637_v53, %v5371_v53   ;;  %v3264_v52 = vphi %v3635_v52, %v5370_v52   ;;  %v3260_v26 = vphi %v3633_v26, %v5369_v26   ;;  %v3256_v51 = vphi %v3631_v51, %v5368_v51   ;;  %v3252_v50 = vphi %v3629_v50, %v5367_v50   ;;  %v3248_v25 = vphi %v3627_v25, %v5366_v25   ;;  %v3244_v49 = vphi %v3625_v49, %v5365_v49   ;;  %v3240_v48 = vphi %v3623_v48, %v5364_v48   ;;  %v3236_v47 = vphi %v3621_v47, %v5363_v47   ;;  %v3232_v46 = vphi %v3619_v46, %v5362_v46   ;;  %v3228_v45 = vphi %v3617_v45, %v5361_v45   ;;  %v3224_v44 = vphi %v3615_v44, %v5360_v44   ;;  %v3220_v43 = vphi %v3613_v43, %v5359_v43   ;;  %v3216_v42 = vphi %v3611_v42, %v5358_v42   ;;  %v3212_v41 = vphi %v3609_v41, %v5357_v41   ;;  %v3208_v40 = vphi %v3607_v40, %v5356_v40   ;;  %v3204_v39 = vphi %v3605_v39, %v5355_v39   ;;  %v3200_v38 = vphi %v3603_v38, %v5354_v38   ;;  %v3196_v22 = vphi %v3601_v22, %v5353_v22   ;;  %v3192_v37 = vphi %v3599_v37, %v5352_v37   ;;  %v3188_v36 = vphi %v3597_v36, %v5351_v36   ;;  %v3184_v33 = vphi %v3595_v33, %v5350_v33   ;;  %v3180_v32 = vphi %v3593_v32, %v5349_v32  }
  0x7e   : >>> { %5274 = vst [vmem:[#allocation23_spill] sm:$0xff] %v3188_v36  ;;  %5275 = vst [vmem:[#allocation24_spill] sm:$0xff] %v3192_v37  ;;  %s658_s12 = sadd.s32 %s3276_s30, %s2501_s7  ;;  %v3731_v56 = vld [vmem:[#allocation3 + $0x10] sm:$0xff]  ;;  %v3733_v58 = vld [vmem:[#allocation3 + $0x20] sm:$0xff]  ;;  %vm1736_vm9 = vcmask 1042434   ;;  %vm1738_vm10 = vcmask 1043459  }
  0x7f   : >>> { %5276 = vst [vmem:[#allocation25_spill] sm:$0xff] %v3196_v22  ;;  %5277 = vst [vmem:[#allocation26_spill] sm:$0xff] %v3200_v38  ;;  %s3720_s14 = sshll.u32 %s658_s12, 7  ;;  %v3735_v34 = vld [vmem:[#allocation3 + $0x28] sm:$0xff]  ;;  %v3739_v20 = vld [vmem:[#allocation3 + $0x30] sm:$0xff]  ;;  %vm1740_vm11 = vcmask 1044484  }
  0x80   : >>> { %5278 = vst [vmem:[#allocation27_spill] sm:$0xff] %v3204_v39  ;;  %5279 = vst [vmem:[#allocation28_spill] sm:$0xff] %v3208_v40  ;;  %s668_s25 = sld [smem:[#allocation4 + %s3720_s14]]  ;;  %s669_s8 = sadd.s32 8, %s3720_s14  ;;  %v3737_v59 = vld [vmem:[#allocation3 + $0x8] sm:$0xff]  ;;  %vm1742_vm12 = vcmask 1045509  }
  0x81   : >>> { %5280 = vst [vmem:[#allocation29_spill] sm:$0xff] %v3212_v41  ;;  %5281 = vst [vmem:[#allocation30_spill] sm:$0xff] %v3216_v42  ;;  %s673_s9 = sadd.s32 24, %s3720_s14  ;;  %s670_s6 = sld [smem:[#allocation4 + %s669_s8]]  ;;  %vm1744_vm13 = vcmask 1046534   ;;  %vm1746_vm14 = vcmask 1047559  }
  0x82   : >>> { %5282 = vst [vmem:[#allocation31_spill] sm:$0xff] %v3220_v43  ;;  %5283 = vst [vmem:[#allocation32_spill] sm:$0xff] %v3224_v44  ;;  %s671_s29 = sadd.s32 16, %s3720_s14  ;;  %s674_s20 = sld [smem:[#allocation4 + %s673_s9]] }
  0x83   : >>> { %5284 = vst [vmem:[#allocation33_spill] sm:$0xff] %v3228_v45  ;;  %5285 = vst [vmem:[#allocation34_spill] sm:$0xff] %v3232_v46  ;;  %s675_s22 = sadd.s32 32, %s3720_s14  ;;  %s672_s0 = sld [smem:[#allocation4 + %s671_s29]]  ;;  %v3741_v35 = vld [vmem:[#allocation3 + $0x38] sm:$0xff] }
  0x84   : >>> { %5286 = vst [vmem:[#allocation35_spill] sm:$0xff] %v3236_v47  ;;  %5287 = vst [vmem:[#allocation36_spill] sm:$0xff] %v3240_v48  ;;  %s676_s7 = sld [smem:[#allocation4 + %s675_s22]]  ;;  %s677_s22 = sadd.s32 40, %s3720_s14 }
  0x85   : >>> { %5288 = vst [vmem:[#allocation37_spill] sm:$0xff] %v3244_v49  ;;  %5289 = vst [vmem:[#allocation38_spill] sm:$0xff] %v3248_v25  ;;  %s749_s12 = sadd.s32 1, %s3720_s14  ;;  %s755_s8 = sadd.s32 25, %s3720_s14 }
  0x86   : >>> { %5290 = vst [vmem:[#allocation39_spill] sm:$0xff] %v3252_v50  ;;  %5291 = vst [vmem:[#allocation40_spill] sm:$0xff] %v3256_v51  ;;  %v679_v57 = vstv %s668_s25  ;;  %s751_s25 = sadd.s32 9, %s3720_s14  ;;  %s753_s9 = sadd.s32 17, %s3720_s14 }
  0x87   : >>> { %5292 = vst [vmem:[#allocation41_spill] sm:$0xff] %v3260_v26  ;;  %5293 = vst [vmem:[#allocation42_spill] sm:$0xff] %v3264_v52  ;;  %v680_v60 = vmul.f32 %v679_v57, %v3727_v27  ;;  %v681_v61 = vmul.f32 %v679_v57, %v3729_v55  ;;  %v682_v62 = vmul.f32 %v679_v57, %v3731_v56  ;;  %v688_v63 = vstv %s670_s6  ;;  %s3768_s6 = sld [smem:[#allocation4 + %s751_s25]]  ;;  %s757_s29 = sadd.s32 33, %s3720_s14 }
  0x88   : >>> { %5294 = vst [vmem:[#allocation43_spill] sm:$0xff] %v3268_v53  ;;  %5295 = vst [vmem:[#allocation44_spill] sm:$0xff] %v3272_v54  ;;  %v683_v0 = vmul.f32 %v679_v57, %v3733_v58  ;;  %v714_v5 = vstv %s674_s20  ;;  %v684_v6 = vmul.f32 %v679_v57, %v3735_v34  ;;  %v685_v7 = vmul.f32 %v679_v57, %v3737_v59  ;;  %s3757_s20 = sld [smem:[#allocation4 + %s677_s22]]  ;;  %s847_s25 = sadd.s32 2, %s3720_s14 }
  0x89   : >>> { %v686_v8 = vmul.f32 %v679_v57, %v3739_v20  ;;  %v687_v9 = vmul.f32 %v679_v57, %v3741_v35  ;;  %v689_v10 = vadd.f32 %v688_v63, %v680_v60  ;;  %v690_v11 = vadd.f32 %v688_v63, %v681_v61  ;;  %s3777_s22 = sld [smem:[#allocation4 + %s753_s9]]  ;;  %s849_s9 = sadd.s32 10, %s3720_s14 }
  0x8a   : >>> { %v691_v12 = vadd.f32 %v688_v63, %v682_v62  ;;  %v705_v13 = vstv %s672_s0  ;;  %v715_v14 = vmul.f32 %v714_v5, %v3727_v27  ;;  %v716_v15 = vmul.f32 %v714_v5, %v3729_v55  ;;  %s3761_s0 = sld [smem:[#allocation4 + %s749_s12]]  ;;  %s632_s30 = sadd.s32 1, %s3276_s30  }
  0x8b   : >>> { %v717_v16 = vmul.f32 %v714_v5, %v3731_v56  ;;  %v718_v17 = vmul.f32 %v714_v5, %v3733_v58  ;;  %v692_v18 = vadd.f32 %v688_v63, %v683_v0  ;;  %v719_v19 = vmul.f32 %v714_v5, %v3735_v34  ;;  %s3779_s12 = sld [smem:[#allocation4 + %s757_s29]]  ;;  %s853_s29 = sadd.s32 26, %s3720_s14 }
  0x8c   : >>> { %v720_v21 = vmul.f32 %v714_v5, %v3737_v59  ;;  %v723_v23 = vstv %s676_s7  ;;  %v693_v24 = vadd.f32 %v688_v63, %v684_v6  ;;  %v694_v28 = vadd.f32 %v688_v63, %v685_v7  ;;  %s3771_s7 = sld [smem:[#allocation4 + %s755_s8]]  ;;  %p4804_p12 = scmp.ge.s32.totalorder %s632_s30, 2  }
  0x8d   : >>> { %v695_v29 = vadd.f32 %v688_v63, %v686_v8  ;;  %v696_v30 = vadd.f32 %v688_v63, %v687_v9  ;;  %v697_v31 = vmax.f32 %v689_v10, 0.0  ;;  %v698_v57 = vmax.f32 %v690_v11, 0.0  ;;  %s3835_s8 = sld [smem:[#allocation4 + %s847_s25]]  ;;  %s857_s25 = sadd.s32 42, %s3720_s14 }
  0x8e   : >>> { %v721_v60 = vmul.f32 %v714_v5, %v3739_v20  ;;  %v722_v61 = vmul.f32 %v714_v5, %v3741_v35  ;;  %v724_v62 = vadd.f32 %v723_v23, %v715_v14  ;;  %v725_v0 = vadd.f32 %v723_v23, %v716_v15  ;;  %s2503_s30 = sshll.u32 (%p4804_p12), %s3176_s11, 3  ;;  %s281_s11 = sadd.s32 (%p4804_p12), 1, %s3176_s11  }
  0x8f   : >>> { %v726_v4 = vadd.f32 %v723_v23, %v717_v16  ;;  %v727_v32 = vadd.f32 %v723_v23, %v718_v17  ;;  %v699_v6 = vmax.f32 %v691_v12, 0.0  ;;  %v700_v7 = vmax.f32 %v692_v18, 0.0  ;;  %p278_p13 = scmp.ge.s32.totalorder (%p4804_p12), %s281_s11, 3  }
  0x90   : >>> { %v728_v8 = vadd.f32 %v723_v23, %v719_v19  ;;  %v729_v63 = vadd.f32 %v723_v23, %v720_v21  ;;  %v701_v9 = vmax.f32 %v693_v24, 0.0  ;;  %v702_v10 = vmax.f32 %v694_v28, 0.0 }
  0x91   : >>> { %v703_v11 = vmax.f32 %v695_v29, 0.0  ;;  %v704_v33 = vmax.f32 %v696_v30, 0.0  ;;  %v3773_v5 = vmul.f32 %v705_v13, %v697_v31  ;;  %v3775_v14 = vmul.f32 %v705_v13, %v698_v57 }
  0x92   : >>> { %v730_v15 = vadd.f32 %v723_v23, %v721_v60  ;;  %v731_v12 = vadd.f32 %v723_v23, %v722_v61  ;;  %v732_v16 = vmax.f32 %v724_v62, 0.0  ;;  %v733_v17 = vmax.f32 %v725_v0, 0.0 }
  0x93   : >>> { %v734_v18 = vmax.f32 %v726_v4, 0.0  ;;  %v735_v19 = vmax.f32 %v727_v32, 0.0  ;;  %v3781_v21 = vmul.f32 %v705_v13, %v699_v6  ;;  %v736_v24 = vmax.f32 %v728_v8, 0.0 }
  0x94   : >>> { %v737_v28 = vmax.f32 %v729_v63, 0.0  ;;  %v740_v29 = vstv %s3757_s20  ;;  %v3784_v30 = vmul.f32 %v705_v13, %v700_v7  ;;  %v3786_v31 = vmul.f32 %v705_v13, %v701_v9  ;;  %s759_s20 = sadd.s32 41, %s3720_s14 }
  0x95   : >>> { %v3788_v57 = vmul.f32 %v705_v13, %v702_v10  ;;  %v761_v23 = vstv %s3761_s0  ;;  %v3791_v60 = vmul.f32 %v705_v13, %v703_v11  ;;  %v3793_v4 = vmul.f32 %v705_v13, %v704_v33  ;;  %s3826_s0 = sld [smem:[#allocation4 + %s759_s20]] }
  0x96   : >>> { %v738_v32 = vmax.f32 %v730_v15, 0.0  ;;  %v739_v61 = vmax.f32 %v731_v12, 0.0  ;;  %v3795_v62 = vmul.f32 %v740_v29, %v732_v16  ;;  %v3797_v0 = vmul.f32 %v740_v29, %v733_v17  ;;  %s3846_s20 = sld [smem:[#allocation4 + %s853_s29]]  ;;  %s947_s29 = sadd.s32 11, %s3720_s14 }
  0x97   : >>> { %v3799_v6 = vmul.f32 %v740_v29, %v734_v18  ;;  %v3801_v7 = vmul.f32 %v740_v29, %v735_v19  ;;  %v3803_v8 = vmul.f32 %v740_v29, %v736_v24  ;;  %v3805_v63 = vmul.f32 %v740_v29, %v737_v28 }
  0x98   : >>> { %v762_v33 = vmul.f32 %v761_v23, %v3727_v27  ;;  %v763_v13 = vmul.f32 %v761_v23, %v3729_v55  ;;  %v764_v9 = vmul.f32 %v761_v23, %v3731_v56  ;;  %v765_v10 = vmul.f32 %v761_v23, %v3733_v58 }
  0x99   : >>> { %v770_v11 = vstv %s3768_s6  ;;  %v796_v15 = vstv %s3771_s7  ;;  %v3813_v12 = vmul.f32 %v740_v29, %v738_v32  ;;  %v3815_v16 = vmul.f32 %v740_v29, %v739_v61  ;;  %s851_s6 = sadd.s32 18, %s3720_s14  ;;  %s3841_s7 = sld [smem:[#allocation4 + %s849_s9]] }
  0x9a   : >>> { %v766_v17 = vmul.f32 %v761_v23, %v3735_v34  ;;  %v767_v18 = vmul.f32 %v761_v23, %v3737_v59  ;;  %v768_v19 = vmul.f32 %v761_v23, %v3739_v20  ;;  %v769_v24 = vmul.f32 %v761_v23, %v3741_v35  ;;  %s945_s9 = sadd.s32 3, %s3720_s14 }
  0x9b   : >>> { %v787_v28 = vstv %s3777_s22  ;;  %v805_v36 = vstv %s3779_s12  ;;  %v771_v37 = vadd.f32 %v770_v11, %v762_v33  ;;  %v772_v22 = vadd.f32 %v770_v11, %v763_v13  ;;  %s3843_s22 = sld [smem:[#allocation4 + %s851_s6]]  ;;  %s855_s12 = sadd.s32 34, %s3720_s14 }
  0x9c   : >>> { %v797_v38 = vmul.f32 %v796_v15, %v3727_v27  ;;  %v798_v32 = vmul.f32 %v796_v15, %v3729_v55  ;;  %v773_v29 = vadd.f32 %v770_v11, %v764_v9  ;;  %v774_v61 = vadd.f32 %v770_v11, %v765_v10  ;;  %s3925_s6 = sld [smem:[#allocation4 + %s945_s9]]  ;;  %s955_s9 = sadd.s32 43, %s3720_s14 }
  0x9d   : >>> { %v799_v39 = vmul.f32 %v796_v15, %v3731_v56  ;;  %v800_v40 = vmul.f32 %v796_v15, %v3733_v58  ;;  %v775_v41 = vadd.f32 %v770_v11, %v766_v17  ;;  %v801_v23 = vmul.f32 %v796_v15, %v3735_v34 }
  0x9e   : >>> { %v802_v42 = vmul.f32 %v796_v15, %v3737_v59  ;;  %v803_v33 = vmul.f32 %v796_v15, %v3739_v20  ;;  %v776_v13 = vadd.f32 %v770_v11, %v767_v18  ;;  %v777_v43 = vadd.f32 %v770_v11, %v768_v19 }
  0x9f   : >>> { %v778_v44 = vadd.f32 %v770_v11, %v769_v24  ;;  %v804_v45 = vmul.f32 %v796_v15, %v3741_v35  ;;  %v779_v9 = vmax.f32 %v771_v37, 0.0  ;;  %v780_v10 = vmax.f32 %v772_v22, 0.0 }
  0xa0   : >>> { %v806_v46 = vadd.f32 %v805_v36, %v797_v38  ;;  %v807_v47 = vadd.f32 %v805_v36, %v798_v32  ;;  %v781_v48 = vmax.f32 %v773_v29, 0.0  ;;  %v782_v17 = vmax.f32 %v774_v61, 0.0 }
  0xa1   : >>> { %v808_v49 = vadd.f32 %v805_v36, %v799_v39  ;;  %v809_v25 = vadd.f32 %v805_v36, %v800_v40  ;;  %v783_v50 = vmax.f32 %v775_v41, 0.0  ;;  %v810_v51 = vadd.f32 %v805_v36, %v801_v23 }
  0xa2   : >>> { %v811_v26 = vadd.f32 %v805_v36, %v802_v42  ;;  %v812_v18 = vadd.f32 %v805_v36, %v803_v33  ;;  %v784_v11 = vmax.f32 %v776_v13, 0.0  ;;  %v785_v15 = vmax.f32 %v777_v43, 0.0 }
  0xa3   : >>> { %v786_v37 = vmax.f32 %v778_v44, 0.0  ;;  %v813_v22 = vadd.f32 %v805_v36, %v804_v45  ;;  %v788_v38 = vmul.f32 %v787_v28, %v779_v9  ;;  %v789_v19 = vmul.f32 %v787_v28, %v780_v10 }
  0xa4   : >>> { %v814_v24 = vmax.f32 %v806_v46, 0.0  ;;  %v815_v39 = vmax.f32 %v807_v47, 0.0  ;;  %v790_v40 = vmul.f32 %v787_v28, %v781_v48  ;;  %v816_v41 = vmax.f32 %v808_v49, 0.0 }
  0xa5   : >>> { %v817_v32 = vmax.f32 %v809_v25, 0.0  ;;  %v822_v42 = vstv %s3826_s0  ;;  %v791_v29 = vmul.f32 %v787_v28, %v782_v17  ;;  %v818_v61 = vmax.f32 %v810_v51, 0.0  ;;  %s3857_s0 = sld [smem:[#allocation4 + %s855_s12]] }
  0xa6   : >>> { %v819_v23 = vmax.f32 %v811_v26, 0.0  ;;  %v820_v33 = vmax.f32 %v812_v18, 0.0  ;;  %v792_v36 = vmul.f32 %v787_v28, %v783_v50  ;;  %v793_v43 = vmul.f32 %v787_v28, %v784_v11  ;;  %s3932_s12 = sld [smem:[#allocation4 + %s947_s29]]  ;;  %s1043_s29 = sadd.s32 4, %s3720_s14 }
  0xa7   : >>> { %v794_v44 = vmul.f32 %v787_v28, %v785_v15  ;;  %v821_v45 = vmax.f32 %v813_v22, 0.0  ;;  %v795_v46 = vmul.f32 %v787_v28, %v786_v37  ;;  %v823_v47 = vmul.f32 %v822_v42, %v814_v24 }
  0xa8   : >>> { %v824_v48 = vmul.f32 %v822_v42, %v815_v39  ;;  %v3849_v49 = vadd.f32 %v788_v38, %v3773_v5  ;;  %v825_v25 = vmul.f32 %v822_v42, %v816_v41  ;;  %v826_v51 = vmul.f32 %v822_v42, %v817_v32 }
  0xa9   : >>> { %v3852_v26 = vadd.f32 %v789_v19, %v3775_v14  ;;  %v3855_v13 = vadd.f32 %v790_v40, %v3781_v21  ;;  %v827_v50 = vmul.f32 %v822_v42, %v818_v61  ;;  %v828_v9 = vmul.f32 %v822_v42, %v819_v23 }
  0xaa   : >>> { %v829_v10 = vmul.f32 %v822_v42, %v820_v33  ;;  %v859_v17 = vstv %s3835_s8  ;;  %v830_v28 = vmul.f32 %v822_v42, %v821_v45  ;;  %v3861_v5 = vadd.f32 %v791_v29, %v3784_v30  ;;  %s3912_s8 = sld [smem:[#allocation4 + %s857_s25]] }
  0xab   : >>> { %v3864_v18 = vadd.f32 %v792_v36, %v3786_v31  ;;  %v3867_v14 = vadd.f32 %v793_v43, %v3788_v57  ;;  %v3870_v21 = vadd.f32 %v794_v44, %v3791_v60  ;;  %v3873_v11 = vadd.f32 %v795_v46, %v3793_v4 }
  0xac   : >>> { %v3876_v15 = vadd.f32 %v823_v47, %v3795_v62  ;;  %v3879_v30 = vadd.f32 %v824_v48, %v3797_v0  ;;  %v3882_v31 = vadd.f32 %v825_v25, %v3799_v6  ;;  %v3885_v57 = vadd.f32 %v826_v51, %v3801_v7 }
  0xad   : >>> { %v860_v37 = vmul.f32 %v859_v17, %v3727_v27  ;;  %v861_v60 = vmul.f32 %v859_v17, %v3729_v55  ;;  %v3890_v22 = vadd.f32 %v827_v50, %v3803_v8  ;;  %v3893_v4 = vadd.f32 %v828_v9, %v3805_v63 }
  0xae   : >>> { %v3896_v62 = vadd.f32 %v829_v10, %v3813_v12  ;;  %v868_v0 = vstv %s3841_s7  ;;  %v3901_v6 = vadd.f32 %v830_v28, %v3815_v16  ;;  %v862_v7 = vmul.f32 %v859_v17, %v3731_v56  ;;  %s951_s7 = sadd.s32 27, %s3720_s14 }
  0xaf   : >>> { %v3905_v38 = vstv %s3843_s22  ;;  %v894_v19 = vstv %s3846_s20  ;;  %v863_v8 = vmul.f32 %v859_v17, %v3733_v58  ;;  %v864_v24 = vmul.f32 %v859_v17, %v3735_v34  ;;  %s949_s22 = sadd.s32 19, %s3720_s14  ;;  %s953_s20 = sadd.s32 35, %s3720_s14 }
  0xb0   : >>> { %v865_v63 = vmul.f32 %v859_v17, %v3737_v59  ;;  %v866_v39 = vmul.f32 %v859_v17, %v3739_v20  ;;  %v867_v12 = vmul.f32 %v859_v17, %v3741_v35  ;;  %v869_v40 = vadd.f32 %v868_v0, %v860_v37  ;;  %s3947_s25 = sld [smem:[#allocation4 + %s949_s22]]  ;;  %s1045_s22 = sadd.s32 12, %s3720_s14 }
  0xb1   : >>> { %v870_v16 = vadd.f32 %v868_v0, %v861_v60  ;;  %v903_v41 = vstv %s3857_s0  ;;  %v895_v32 = vmul.f32 %v894_v19, %v3727_v27  ;;  %v896_v42 = vmul.f32 %v894_v19, %v3729_v55  ;;  %s3939_s0 = sld [smem:[#allocation4 + %s951_s7]] }
  0xb2   : >>> { %v897_v29 = vmul.f32 %v894_v19, %v3731_v56  ;;  %v898_v61 = vmul.f32 %v894_v19, %v3733_v58  ;;  %v899_v23 = vmul.f32 %v894_v19, %v3735_v34  ;;  %v900_v33 = vmul.f32 %v894_v19, %v3737_v59  ;;  %s4021_s7 = sld [smem:[#allocation4 + %s1043_s29]]  ;;  %s1053_s29 = sadd.s32 44, %s3720_s14 }
  0xb3   : >>> { %v901_v36 = vmul.f32 %v894_v19, %v3739_v20  ;;  %v902_v43 = vmul.f32 %v894_v19, %v3741_v35  ;;  %v871_v44 = vadd.f32 %v868_v0, %v862_v7  ;;  %v872_v45 = vadd.f32 %v868_v0, %v863_v8 }
  0xb4   : >>> { %v873_v46 = vadd.f32 %v868_v0, %v864_v24  ;;  %v874_v47 = vadd.f32 %v868_v0, %v865_v63  ;;  %v875_v48 = vadd.f32 %v868_v0, %v866_v39  ;;  %v876_v25 = vadd.f32 %v868_v0, %v867_v12 }
  0xb5   : >>> { %v877_v51 = vmax.f32 %v869_v40, 0.0  ;;  %v878_v50 = vmax.f32 %v870_v16, 0.0  ;;  %v904_v9 = vadd.f32 %v903_v41, %v895_v32  ;;  %v905_v10 = vadd.f32 %v903_v41, %v896_v42 }
  0xb6   : >>> { %v906_v17 = vadd.f32 %v903_v41, %v897_v29  ;;  %v907_v28 = vadd.f32 %v903_v41, %v898_v61  ;;  %v908_v37 = vadd.f32 %v903_v41, %v899_v23  ;;  %v909_v60 = vadd.f32 %v903_v41, %v900_v33 }
  0xb7   : >>> { %v910_v52 = vadd.f32 %v903_v41, %v901_v36  ;;  %v911_v19 = vadd.f32 %v903_v41, %v902_v43  ;;  %v879_v7 = vmax.f32 %v871_v44, 0.0  ;;  %v880_v8 = vmax.f32 %v872_v45, 0.0 }
  0xb8   : >>> { %v881_v24 = vmax.f32 %v873_v46, 0.0  ;;  %v882_v63 = vmax.f32 %v874_v47, 0.0  ;;  %v883_v0 = vmax.f32 %v875_v48, 0.0  ;;  %v884_v39 = vmax.f32 %v876_v25, 0.0 }
  0xb9   : >>> { %v886_v12 = vmul.f32 %v3905_v38, %v877_v51  ;;  %v920_v40 = vstv %s3912_s8  ;;  %v912_v16 = vmax.f32 %v904_v9, 0.0  ;;  %v913_v32 = vmax.f32 %v905_v10, 0.0  ;;  %s3949_s8 = sld [smem:[#allocation4 + %s953_s20]]  ;;  %s1049_s20 = sadd.s32 28, %s3720_s14 }
  0xba   : >>> { %v914_v42 = vmax.f32 %v906_v17, 0.0  ;;  %v915_v29 = vmax.f32 %v907_v28, 0.0  ;;  %v916_v41 = vmax.f32 %v908_v37, 0.0  ;;  %v917_v61 = vmax.f32 %v909_v60, 0.0 }
  0xbb   : >>> { %v918_v23 = vmax.f32 %v910_v52, 0.0  ;;  %v919_v33 = vmax.f32 %v911_v19, 0.0  ;;  %v887_v36 = vmul.f32 %v3905_v38, %v878_v50  ;;  %v888_v43 = vmul.f32 %v3905_v38, %v879_v7 }
  0xbc   : >>> { %v889_v44 = vmul.f32 %v3905_v38, %v880_v8  ;;  %v890_v45 = vmul.f32 %v3905_v38, %v881_v24  ;;  %v891_v46 = vmul.f32 %v3905_v38, %v882_v63  ;;  %v892_v47 = vmul.f32 %v3905_v38, %v883_v0 }
  0xbd   : >>> { %v893_v52 = vmul.f32 %v3905_v38, %v884_v39  ;;  %v3945_v48 = vadd.f32 %v886_v12, %v3849_v49  ;;  %v921_v25 = vmul.f32 %v920_v40, %v912_v16  ;;  %v922_v51 = vmul.f32 %v920_v40, %v913_v32 }
  0xbe   : >>> { %v923_v50 = vmul.f32 %v920_v40, %v914_v42  ;;  %v924_v9 = vmul.f32 %v920_v40, %v915_v29  ;;  %v925_v10 = vmul.f32 %v920_v40, %v916_v41  ;;  %v926_v17 = vmul.f32 %v920_v40, %v917_v61 }
  0xbf   : >>> { %v927_v28 = vmul.f32 %v920_v40, %v918_v23  ;;  %v928_v37 = vmul.f32 %v920_v40, %v919_v33  ;;  %v3952_v60 = vadd.f32 %v887_v36, %v3852_v26  ;;  %v3955_v38 = vadd.f32 %v888_v43, %v3855_v13 }
  0xc0   : >>> { %v3958_v49 = vadd.f32 %v889_v44, %v3861_v5  ;;  %v957_v19 = vstv %s3925_s6  ;;  %v3962_v7 = vadd.f32 %v890_v45, %v3864_v18  ;;  %v3965_v8 = vadd.f32 %v891_v46, %v3867_v14  ;;  %s4012_s6 = sld [smem:[#allocation4 + %s955_s9]]  ;;  %s1051_s9 = sadd.s32 36, %s3720_s14 }
  0xc1   : >>> { %v3968_v24 = vadd.f32 %v892_v47, %v3870_v21  ;;  %v3971_v26 = vadd.f32 %v893_v52, %v3873_v11  ;;  %v3974_v13 = vadd.f32 %v921_v25, %v3876_v15  ;;  %v3977_v5 = vadd.f32 %v922_v51, %v3879_v30 }
  0xc2   : >>> { %v3980_v63 = vadd.f32 %v923_v50, %v3882_v31  ;;  %v3983_v18 = vadd.f32 %v924_v9, %v3885_v57  ;;  %v3986_v14 = vadd.f32 %v925_v10, %v3890_v22  ;;  %v3989_v21 = vadd.f32 %v926_v17, %v3893_v4 }
  0xc3   : >>> { %v958_v11 = vmul.f32 %v957_v19, %v3727_v27  ;;  %v959_v15 = vmul.f32 %v957_v19, %v3729_v55  ;;  %v960_v30 = vmul.f32 %v957_v19, %v3731_v56  ;;  %v961_v31 = vmul.f32 %v957_v19, %v3733_v58 }
  0xc4   : >>> { %v966_v0 = vstv %s3932_s12  ;;  %v992_v39 = vstv %s3939_s0  ;;  %v3998_v57 = vadd.f32 %v927_v28, %v3896_v62  ;;  %v4001_v22 = vadd.f32 %v928_v37, %v3901_v6  ;;  %s1047_s12 = sadd.s32 20, %s3720_s14  ;;  %s4027_s0 = sld [smem:[#allocation4 + %s1045_s22]] }
  0xc5   : >>> { %v962_v4 = vmul.f32 %v957_v19, %v3735_v34  ;;  %v963_v12 = vmul.f32 %v957_v19, %v3737_v59  ;;  %v964_v40 = vmul.f32 %v957_v19, %v3739_v20  ;;  %v965_v16 = vmul.f32 %v957_v19, %v3741_v35  ;;  %s1141_s22 = sadd.s32 5, %s3720_s14 }
  0xc6   : >>> { %v983_v32 = vstv %s3947_s25  ;;  %v1001_v42 = vstv %s3949_s8  ;;  %v967_v29 = vadd.f32 %v966_v0, %v958_v11  ;;  %v968_v41 = vadd.f32 %v966_v0, %v959_v15  ;;  %s4029_s25 = sld [smem:[#allocation4 + %s1047_s12]] }
  0xc7   : >>> { %v993_v62 = vmul.f32 %v992_v39, %v3727_v27  ;;  %v994_v61 = vmul.f32 %v992_v39, %v3729_v55  ;;  %v969_v6 = vadd.f32 %v966_v0, %v960_v30  ;;  %v970_v23 = vadd.f32 %v966_v0, %v961_v31  ;;  %s4031_s8 = sld [smem:[#allocation4 + %s1049_s20]]  ;;  %s1143_s20 = sadd.s32 13, %s3720_s14 }
  0xc8   : >>> { %v995_v33 = vmul.f32 %v992_v39, %v3731_v56  ;;  %v996_v36 = vmul.f32 %v992_v39, %v3733_v58  ;;  %v971_v43 = vadd.f32 %v966_v0, %v962_v4  ;;  %v997_v44 = vmul.f32 %v992_v39, %v3735_v34  ;;  %s4111_s12 = sld [smem:[#allocation4 + %s1141_s22]]  ;;  %s1151_s22 = sadd.s32 45, %s3720_s14 }
  0xc9   : >>> { %v998_v45 = vmul.f32 %v992_v39, %v3737_v59  ;;  %v999_v46 = vmul.f32 %v992_v39, %v3739_v20  ;;  %v972_v47 = vadd.f32 %v966_v0, %v963_v12  ;;  %v973_v52 = vadd.f32 %v966_v0, %v964_v40 }
  0xca   : >>> { %v974_v25 = vadd.f32 %v966_v0, %v965_v16  ;;  %v1000_v51 = vmul.f32 %v992_v39, %v3741_v35  ;;  %v975_v50 = vmax.f32 %v967_v29, 0.0  ;;  %v976_v9 = vmax.f32 %v968_v41, 0.0 }
  0xcb   : >>> { %v1002_v10 = vadd.f32 %v1001_v42, %v993_v62  ;;  %v1003_v17 = vadd.f32 %v1001_v42, %v994_v61  ;;  %v977_v28 = vmax.f32 %v969_v6, 0.0  ;;  %v978_v37 = vmax.f32 %v970_v23, 0.0 }
  0xcc   : >>> { %v1004_v19 = vadd.f32 %v1001_v42, %v995_v33  ;;  %v1005_v11 = vadd.f32 %v1001_v42, %v996_v36  ;;  %v979_v15 = vmax.f32 %v971_v43, 0.0  ;;  %v1006_v30 = vadd.f32 %v1001_v42, %v997_v44 }
  0xcd   : >>> { %v1007_v31 = vadd.f32 %v1001_v42, %v998_v45  ;;  %v1008_v4 = vadd.f32 %v1001_v42, %v999_v46  ;;  %v980_v0 = vmax.f32 %v972_v47, 0.0  ;;  %v981_v39 = vmax.f32 %v973_v52, 0.0 }
  0xce   : >>> { %v982_v12 = vmax.f32 %v974_v25, 0.0  ;;  %v1009_v40 = vadd.f32 %v1001_v42, %v1000_v51  ;;  %v984_v16 = vmul.f32 %v983_v32, %v975_v50  ;;  %v985_v29 = vmul.f32 %v983_v32, %v976_v9 }
  0xcf   : >>> { %v1010_v41 = vmax.f32 %v1002_v10, 0.0  ;;  %v1011_v62 = vmax.f32 %v1003_v17, 0.0  ;;  %v986_v61 = vmul.f32 %v983_v32, %v977_v28  ;;  %v1012_v6 = vmax.f32 %v1004_v19, 0.0 }
  0xd0   : >>> { %v1013_v23 = vmax.f32 %v1005_v11, 0.0  ;;  %v1018_v33 = vstv %s4012_s6  ;;  %v987_v36 = vmul.f32 %v983_v32, %v978_v37  ;;  %v1014_v43 = vmax.f32 %v1006_v30, 0.0  ;;  %s4053_s6 = sld [smem:[#allocation4 + %s1051_s9]]  ;;  %s1149_s9 = sadd.s32 37, %s3720_s14 }
  0xd1   : >>> { %v1015_v44 = vmax.f32 %v1007_v31, 0.0  ;;  %v1016_v45 = vmax.f32 %v1008_v4, 0.0  ;;  %v988_v42 = vmul.f32 %v983_v32, %v979_v15  ;;  %v989_v46 = vmul.f32 %v983_v32, %v980_v0 }
  0xd2   : >>> { %v990_v47 = vmul.f32 %v983_v32, %v981_v39  ;;  %v1017_v52 = vmax.f32 %v1009_v40, 0.0  ;;  %v991_v25 = vmul.f32 %v983_v32, %v982_v12  ;;  %v1019_v51 = vmul.f32 %v1018_v33, %v1010_v41 }
  0xd3   : >>> { %v1020_v50 = vmul.f32 %v1018_v33, %v1011_v62  ;;  %v4034_v9 = vadd.f32 %v984_v16, %v3945_v48  ;;  %v1021_v10 = vmul.f32 %v1018_v33, %v1012_v6  ;;  %v1022_v17 = vmul.f32 %v1018_v33, %v1013_v23 }
  0xd4   : >>> { %v4038_v28 = vadd.f32 %v985_v29, %v3952_v60  ;;  %v4041_v37 = vadd.f32 %v986_v61, %v3955_v38  ;;  %v1023_v19 = vmul.f32 %v1018_v33, %v1014_v43  ;;  %v1024_v11 = vmul.f32 %v1018_v33, %v1015_v44 }
  0xd5   : >>> { %v1025_v15 = vmul.f32 %v1018_v33, %v1016_v45  ;;  %v1055_v30 = vstv %s4021_s7  ;;  %v1026_v31 = vmul.f32 %v1018_v33, %v1017_v52  ;;  %v4045_v32 = vadd.f32 %v987_v36, %v3958_v49  ;;  %s4103_s7 = sld [smem:[#allocation4 + %s1053_s29]] }
  0xd6   : >>> { %v4048_v48 = vadd.f32 %v988_v42, %v3962_v7  ;;  %v4051_v4 = vadd.f32 %v989_v46, %v3965_v8  ;;  %v4056_v60 = vadd.f32 %v990_v47, %v3968_v24  ;;  %v4059_v38 = vadd.f32 %v991_v25, %v3971_v26 }
  0xd7   : >>> { %v4062_v49 = vadd.f32 %v1019_v51, %v3974_v13  ;;  %v4065_v7 = vadd.f32 %v1020_v50, %v3977_v5  ;;  %v4068_v8 = vadd.f32 %v1021_v10, %v3980_v63  ;;  %v1056_v0 = vmul.f32 %v1055_v30, %v3727_v27 }
  0xd8   : >>> { %v1057_v39 = vmul.f32 %v1055_v30, %v3729_v55  ;;  %v1058_v24 = vmul.f32 %v1055_v30, %v3731_v56  ;;  %v4074_v12 = vadd.f32 %v1022_v17, %v3983_v18  ;;  %v4077_v26 = vadd.f32 %v1023_v19, %v3986_v14 }
  0xd9   : >>> { %v4080_v13 = vadd.f32 %v1024_v11, %v3989_v21  ;;  %v1064_v5 = vstv %s4027_s0  ;;  %v4084_v40 = vadd.f32 %v1025_v15, %v3998_v57  ;;  %v4087_v63 = vadd.f32 %v1026_v31, %v4001_v22  ;;  %s1147_s0 = sadd.s32 29, %s3720_s14 }
  0xda   : >>> { %v4090_v16 = vstv %s4029_s25  ;;  %v1090_v29 = vstv %s4031_s8  ;;  %v1059_v18 = vmul.f32 %v1055_v30, %v3733_v58  ;;  %v1060_v14 = vmul.f32 %v1055_v30, %v3735_v34  ;;  %s4118_s25 = sld [smem:[#allocation4 + %s1143_s20]]  ;;  %s1145_s8 = sadd.s32 21, %s3720_s14 }
  0xdb   : >>> { %v1061_v41 = vmul.f32 %v1055_v30, %v3737_v59  ;;  %v1062_v21 = vmul.f32 %v1055_v30, %v3739_v20  ;;  %v1063_v62 = vmul.f32 %v1055_v30, %v3741_v35  ;;  %v1065_v57 = vadd.f32 %v1064_v5, %v1056_v0  ;;  %s4133_s29 = sld [smem:[#allocation4 + %s1145_s8]] }
  0xdc   : >>> { %v1066_v61 = vadd.f32 %v1064_v5, %v1057_v39  ;;  %v1067_v22 = vadd.f32 %v1064_v5, %v1058_v24  ;;  %v1091_v6 = vmul.f32 %v1090_v29, %v3727_v27  ;;  %v1092_v23 = vmul.f32 %v1090_v29, %v3729_v55  ;;  %s4206_s20 = sld [smem:[#allocation4 + %s1151_s22]] }
  0xdd   : >>> { %v1093_v33 = vmul.f32 %v1090_v29, %v3731_v56  ;;  %v1094_v36 = vmul.f32 %v1090_v29, %v3733_v58  ;;  %v1095_v43 = vmul.f32 %v1090_v29, %v3735_v34  ;;  %v1096_v44 = vmul.f32 %v1090_v29, %v3737_v59 }
  0xde   : >>> { %v1097_v45 = vmul.f32 %v1090_v29, %v3739_v20  ;;  %v1099_v42 = vstv %s4053_s6  ;;  %v1068_v46 = vadd.f32 %v1064_v5, %v1059_v18  ;;  %v1069_v47 = vadd.f32 %v1064_v5, %v1060_v14  ;;  %s4131_s6 = sld [smem:[#allocation4 + %s1147_s0]] }
  0xdf   : >>> { %v1070_v52 = vadd.f32 %v1064_v5, %v1061_v41  ;;  %v1098_v25 = vmul.f32 %v1090_v29, %v3741_v35  ;;  %v1071_v51 = vadd.f32 %v1064_v5, %v1062_v21  ;;  %v1072_v50 = vadd.f32 %v1064_v5, %v1063_v62 }
  0xe0   : >>> { %v1073_v10 = vmax.f32 %v1065_v57, 0.0  ;;  %v1074_v17 = vmax.f32 %v1066_v61, 0.0  ;;  %v1100_v19 = vadd.f32 %v1099_v42, %v1091_v6  ;;  %v1101_v11 = vadd.f32 %v1099_v42, %v1092_v23 }
  0xe1   : >>> { %v1102_v15 = vadd.f32 %v1099_v42, %v1093_v33  ;;  %v1103_v30 = vadd.f32 %v1099_v42, %v1094_v36  ;;  %v1075_v31 = vmax.f32 %v1067_v22, 0.0  ;;  %v1104_v0 = vadd.f32 %v1099_v42, %v1095_v43 }
  0xe2   : >>> { %v1105_v39 = vadd.f32 %v1099_v42, %v1096_v44  ;;  %v1106_v24 = vadd.f32 %v1099_v42, %v1097_v45  ;;  %v1076_v18 = vmax.f32 %v1068_v46, 0.0  ;;  %v1077_v14 = vmax.f32 %v1069_v47, 0.0 }
  0xe3   : >>> { %v1078_v29 = vmax.f32 %v1070_v52, 0.0  ;;  %v1107_v41 = vadd.f32 %v1099_v42, %v1098_v25  ;;  %v1079_v5 = vmax.f32 %v1071_v51, 0.0  ;;  %v1080_v21 = vmax.f32 %v1072_v50, 0.0 }
  0xe4   : >>> { %v1082_v62 = vmul.f32 %v4090_v16, %v1073_v10  ;;  %v1083_v57 = vmul.f32 %v4090_v16, %v1074_v17  ;;  %v1108_v61 = vmax.f32 %v1100_v19, 0.0  ;;  %v1109_v22 = vmax.f32 %v1101_v11, 0.0 }
  0xe5   : >>> { %v1110_v6 = vmax.f32 %v1102_v15, 0.0  ;;  %v1111_v23 = vmax.f32 %v1103_v30, 0.0  ;;  %v1112_v33 = vmax.f32 %v1104_v0, 0.0  ;;  %v1113_v36 = vmax.f32 %v1105_v39, 0.0 }
  0xe6   : >>> { %v1114_v43 = vmax.f32 %v1106_v24, 0.0  ;;  %v1116_v44 = vstv %s4103_s7  ;;  %v1084_v45 = vmul.f32 %v4090_v16, %v1075_v31  ;;  %v1085_v42 = vmul.f32 %v4090_v16, %v1076_v18  ;;  %s4135_s7 = sld [smem:[#allocation4 + %s1149_s9]]  ;;  %s1245_s9 = sadd.s32 30, %s3720_s14 }
  0xe7   : >>> { %v1086_v46 = vmul.f32 %v4090_v16, %v1077_v14  ;;  %v1115_v47 = vmax.f32 %v1107_v41, 0.0  ;;  %v1087_v52 = vmul.f32 %v4090_v16, %v1078_v29  ;;  %v1088_v25 = vmul.f32 %v4090_v16, %v1079_v5 }
  0xe8   : >>> { %v1089_v51 = vmul.f32 %v4090_v16, %v1080_v21  ;;  %v4129_v50 = vadd.f32 %v1082_v62, %v4034_v9  ;;  %v1117_v10 = vmul.f32 %v1116_v44, %v1108_v61  ;;  %v1118_v17 = vmul.f32 %v1116_v44, %v1109_v22 }
  0xe9   : >>> { %v1119_v19 = vmul.f32 %v1116_v44, %v1110_v6  ;;  %v1120_v11 = vmul.f32 %v1116_v44, %v1111_v23  ;;  %v1121_v15 = vmul.f32 %v1116_v44, %v1112_v33  ;;  %v1122_v30 = vmul.f32 %v1116_v44, %v1113_v36  ;;  %v4197_v33 = vld [vmem:[#allocation3] sm:$0xff] }
  0xea   : >>> { %v1123_v31 = vmul.f32 %v1116_v44, %v1114_v43  ;;  %v1153_v0 = vstv %s4111_s12  ;;  %v1124_v39 = vmul.f32 %v1116_v44, %v1115_v47  ;;  %v4139_v16 = vadd.f32 %v1083_v57, %v4038_v28  ;;  %s1239_s12 = sadd.s32 6, %s3720_s14  ;;  %v4200_v43 = vld [vmem:[#allocation3 + $0x18] sm:$0xff]  ;;  %v4203_v44 = vld [vmem:[#allocation3 + $0x10] sm:$0xff] }
  0xeb   : >>> { %v4142_v9 = vadd.f32 %v1084_v45, %v4041_v37  ;;  %v4145_v24 = vadd.f32 %v1085_v42, %v4045_v32  ;;  %v4148_v18 = vadd.f32 %v1086_v46, %v4048_v48  ;;  %v4151_v14 = vadd.f32 %v1087_v52, %v4051_v4  ;;  %s4212_s0 = sld [smem:[#allocation4 + %s1239_s12]] }
  0xec   : >>> { %v4154_v29 = vadd.f32 %v1088_v25, %v4056_v60  ;;  %v4157_v41 = vadd.f32 %v1089_v51, %v4059_v38  ;;  %v4160_v28 = vadd.f32 %v1117_v10, %v4062_v49  ;;  %v4163_v37 = vadd.f32 %v1118_v17, %v4065_v7 }
  0xed   : >>> { %v4166_v32 = vadd.f32 %v1119_v19, %v4068_v8  ;;  %v1154_v48 = vmul.f32 %v1153_v0, %v3727_v27  ;;  %v1155_v4 = vmul.f32 %v1153_v0, %v3729_v55  ;;  %v1156_v60 = vmul.f32 %v1153_v0, %v3731_v56 }
  0xee   : >>> { %v1157_v38 = vmul.f32 %v1153_v0, %v3733_v58  ;;  %v1162_v5 = vstv %s4118_s25  ;;  %v4174_v49 = vadd.f32 %v1120_v11, %v4074_v12  ;;  %v4177_v7 = vadd.f32 %v1121_v15, %v4077_v26  ;;  %v4214_v15 = vld [vmem:[#allocation3 + $0x38] sm:$0xff]  ;;  %s1241_s25 = sadd.s32 14, %s3720_s14 }
  0xef   : >>> { %v4180_v8 = vadd.f32 %v1122_v30, %v4080_v13  ;;  %v1158_v27 = vmul.f32 %v1153_v0, %v3735_v34  ;;  %v4184_v55 = vadd.f32 %v1123_v31, %v4084_v40  ;;  %v1159_v56 = vmul.f32 %v1153_v0, %v3737_v59  ;;  %s4218_s8 = sld [smem:[#allocation4 + %s1241_s25]] }
  0xf0   : >>> { %v1160_v21 = vmul.f32 %v1153_v0, %v3739_v20  ;;  %v1188_v62 = vstv %s4131_s6  ;;  %v4190_v12 = vadd.f32 %v1124_v39, %v4087_v63  ;;  %v1161_v26 = vmul.f32 %v1153_v0, %v3741_v35  ;;  %s1243_s6 = sadd.s32 22, %s3720_s14 }
  0xf1   : >>> { %v1163_v57 = vadd.f32 %v1162_v5, %v1154_v48  ;;  %v1179_v61 = vstv %s4133_s29  ;;  %v1164_v13 = vadd.f32 %v1162_v5, %v1155_v4  ;;  %v1165_v22 = vadd.f32 %v1162_v5, %v1156_v60  ;;  %s4233_s29 = sld [smem:[#allocation4 + %s1245_s9]]  ;;  %s1339_s9 = sadd.s32 15, %s3720_s14 }
  0xf2   : >>> { %v1166_v6 = vadd.f32 %v1162_v5, %v1157_v38  ;;  %v1197_v23 = vstv %s4135_s7  ;;  %v1167_v40 = vadd.f32 %v1162_v5, %v1158_v27  ;;  %v1189_v36 = vmul.f32 %v4197_v33, %v1188_v62  ;;  %s1247_s7 = sadd.s32 38, %s3720_s14  ;;  %s4238_s22 = sld [smem:[#allocation4 + %s1243_s6]] }
  0xf3   : >>> { %v1190_v63 = vmul.f32 %v4200_v43, %v1188_v62  ;;  %v1191_v35 = vmul.f32 %v4203_v44, %v1188_v62  ;;  %v1168_v45 = vadd.f32 %v1162_v5, %v1159_v56  ;;  %v1169_v42 = vadd.f32 %v1162_v5, %v1160_v21  ;;  %s4257_s12 = sld [smem:[#allocation4 + %s1247_s7]] }
  0xf4   : >>> { %v1192_v46 = vmul.f32 %v1188_v62, %v3733_v58  ;;  %v1193_v47 = vmul.f32 %v1188_v62, %v3735_v34  ;;  %v1170_v52 = vadd.f32 %v1162_v5, %v1161_v26  ;;  %v1171_v25 = vmax.f32 %v1163_v57, 0.0  ;;  %s4310_s6 = sld [smem:[#allocation4 + %s1339_s9]]  ;;  %s1435_s9 = sadd.s32 49, %s3720_s14 }
  0xf5   : >>> { %v1194_v51 = vmul.f32 %v1188_v62, %v3737_v59  ;;  %v1195_v10 = vmul.f32 %v1188_v62, %v3739_v20  ;;  %v1172_v17 = vmax.f32 %v1164_v13, 0.0  ;;  %v1173_v19 = vmax.f32 %v1165_v22, 0.0 }
  0xf6   : >>> { %v1174_v11 = vmax.f32 %v1166_v6, 0.0  ;;  %v1196_v30 = vmul.f32 %v4214_v15, %v1188_v62  ;;  %v1175_v31 = vmax.f32 %v1167_v40, 0.0  ;;  %v1198_v58 = vadd.f32 %v1197_v23, %v1189_v36 }
  0xf7   : >>> { %v1199_v0 = vadd.f32 %v1197_v23, %v1190_v63  ;;  %v1200_v34 = vadd.f32 %v1197_v23, %v1191_v35  ;;  %v1176_v39 = vmax.f32 %v1168_v45, 0.0  ;;  %v1177_v48 = vmax.f32 %v1169_v42, 0.0 }
  0xf8   : >>> { %v1201_v4 = vadd.f32 %v1197_v23, %v1192_v46  ;;  %v1202_v59 = vadd.f32 %v1197_v23, %v1193_v47  ;;  %v1178_v60 = vmax.f32 %v1170_v52, 0.0  ;;  %v1180_v20 = vmul.f32 %v1179_v61, %v1171_v25 }
  0xf9   : >>> { %v1203_v38 = vadd.f32 %v1197_v23, %v1194_v51  ;;  %v1204_v5 = vadd.f32 %v1197_v23, %v1195_v10  ;;  %v1181_v27 = vmul.f32 %v1179_v61, %v1172_v17  ;;  %v1182_v56 = vmul.f32 %v1179_v61, %v1173_v19 }
  0xfa   : >>> { %v1183_v21 = vmul.f32 %v1179_v61, %v1174_v11  ;;  %v1205_v62 = vadd.f32 %v1197_v23, %v1196_v30  ;;  %v1184_v26 = vmul.f32 %v1179_v61, %v1175_v31  ;;  %v1206_v57 = vmax.f32 %v1198_v58, 0.0 }
  0xfb   : >>> { %v1207_v13 = vmax.f32 %v1199_v0, 0.0  ;;  %v1208_v22 = vmax.f32 %v1200_v34, 0.0  ;;  %v1185_v6 = vmul.f32 %v1179_v61, %v1176_v39  ;;  %v1209_v40 = vmax.f32 %v1201_v4, 0.0 }
  0xfc   : >>> { %v1210_v36 = vmax.f32 %v1202_v59, 0.0  ;;  %v1214_v63 = vstv %s4206_s20  ;;  %v1186_v35 = vmul.f32 %v1179_v61, %v1177_v48  ;;  %v1211_v45 = vmax.f32 %v1203_v38, 0.0  ;;  %v4248_v48 = vld [vmem:[#allocation3 + $0x20] sm:$0xff]  ;;  %v4262_v38 = vld [vmem:[#allocation3 + $0x8] sm:$0xff]  ;;  %s1249_s20 = sadd.s32 46, %s3720_s14 }
  0xfd   : >>> { %v1212_v42 = vmax.f32 %v1204_v5, 0.0  ;;  %v1251_v46 = vstv %s4212_s0  ;;  %v1187_v47 = vmul.f32 %v1179_v61, %v1178_v60  ;;  %v1213_v52 = vmax.f32 %v1205_v62, 0.0  ;;  %v4265_v5 = vld [vmem:[#allocation3 + $0x30] sm:$0xff]  ;;  %s1337_s0 = sadd.s32 7, %s3720_s14  ;;  %s4293_s25 = sld [smem:[#allocation4 + %s1249_s20]] }
  0xfe   : >>> { %v4224_v25 = vadd.f32 %v1180_v20, %v4129_v50  ;;  %v4227_v23 = vadd.f32 %v1181_v27, %v4139_v16  ;;  %v1215_v51 = vmul.f32 %v1214_v63, %v1206_v57  ;;  %v1216_v10 = vmul.f32 %v1214_v63, %v1207_v13  ;;  %v4259_v20 = vld [vmem:[#allocation3 + $0x28] sm:$0xff]  ;;  %s1345_s20 = sadd.s32 39, %s3720_s14 }
  0xff   : >>> { %v1217_v17 = vmul.f32 %v1214_v63, %v1208_v22  ;;  %v4231_v19 = vadd.f32 %v1182_v56, %v4142_v9  ;;  %v1218_v11 = vmul.f32 %v1214_v63, %v1209_v40  ;;  %v1219_v30 = vmul.f32 %v1214_v63, %v1210_v36 }
 0x100   : >>> { %v1252_v61 = vmul.f32 %v4197_v33, %v1251_v46  ;;  %v1253_v50 = vmul.f32 %v4200_v43, %v1251_v46  ;;  %v1220_v31 = vmul.f32 %v1214_v63, %v1211_v45  ;;  %v1221_v16 = vmul.f32 %v1214_v63, %v1212_v42 }
 0x101   : >>> { %v1254_v58 = vmul.f32 %v4203_v44, %v1251_v46  ;;  %v1260_v0 = vstv %s4218_s8  ;;  %v1222_v34 = vmul.f32 %v1214_v63, %v1213_v52  ;;  %v4243_v9 = vadd.f32 %v1183_v21, %v4145_v24  ;;  %s4302_s8 = sld [smem:[#allocation4 + %s1337_s0]] }
 0x102   : >>> { %v4246_v39 = vadd.f32 %v1184_v26, %v4148_v18  ;;  %v1255_v4 = vmul.f32 %v4248_v48, %v1251_v46  ;;  %v4252_v59 = vadd.f32 %v1185_v6, %v4151_v14  ;;  %v4255_v60 = vadd.f32 %v1186_v35, %v4154_v29  ;;  %s4345_s0 = sld [smem:[#allocation4 + %s1345_s20]] }
 0x103   : >>> { %v1256_v24 = vmul.f32 %v4259_v20, %v1251_v46  ;;  %v1257_v18 = vmul.f32 %v4262_v38, %v1251_v46  ;;  %v1258_v27 = vmul.f32 %v4265_v5, %v1251_v46  ;;  %v1259_v14 = vmul.f32 %v4214_v15, %v1251_v46 }
 0x104   : >>> { %v1261_v29 = vadd.f32 %v1260_v0, %v1252_v61  ;;  %v1262_v56 = vadd.f32 %v1260_v0, %v1253_v50  ;;  %v4270_v21 = vadd.f32 %v1187_v47, %v4157_v41  ;;  %v4273_v62 = vadd.f32 %v1215_v51, %v4160_v28 }
 0x105   : >>> { %v4276_v26 = vadd.f32 %v1216_v10, %v4163_v37  ;;  %v1263_v57 = vadd.f32 %v1260_v0, %v1254_v58  ;;  %v4280_v13 = vadd.f32 %v1217_v17, %v4166_v32  ;;  %v4283_v22 = vadd.f32 %v1218_v11, %v4174_v49 }
 0x106   : >>> { %v4286_v6 = vadd.f32 %v1219_v30, %v4177_v7  ;;  %v1264_v41 = vadd.f32 %v1260_v0, %v1255_v4  ;;  %v4290_v28 = vadd.f32 %v1220_v31, %v4180_v8  ;;  %v1265_v37 = vadd.f32 %v1260_v0, %v1256_v24 }
 0x107   : >>> { %v1266_v40 = vadd.f32 %v1260_v0, %v1257_v18  ;;  %v1286_v36 = vstv %s4233_s29  ;;  %v1267_v32 = vadd.f32 %v1260_v0, %v1258_v27  ;;  %v1268_v63 = vadd.f32 %v1260_v0, %v1259_v14  ;;  %s1341_s29 = sadd.s32 23, %s3720_s14 }
 0x108   : >>> { %v1269_v49 = vmax.f32 %v1261_v29, 0.0  ;;  %v1270_v35 = vmax.f32 %v1262_v56, 0.0  ;;  %v4296_v45 = vadd.f32 %v1221_v16, %v4184_v55  ;;  %v4299_v7 = vadd.f32 %v1222_v34, %v4190_v12  ;;  %s4322_s7 = sld [smem:[#allocation4 + %s1341_s29]]  ;;  %s5383_s29 = scalar_lea.vmem (%p4804_p12), [#allocation10], %s3437_s10 }
 0x109   : >>> { %v1271_v42 = vmax.f32 %v1263_v57, 0.0  ;;  %v1277_v46 = vstv %s4238_s22  ;;  %v1272_v8 = vmax.f32 %v1264_v41, 0.0  ;;  %v1287_v47 = vmul.f32 %v4197_v33, %v1286_v36  ;;  %s1343_s22 = sadd.s32 31, %s3720_s14 }
 0x10a   : >>> { %v1288_v52 = vmul.f32 %v4200_v43, %v1286_v36  ;;  %v1289_v51 = vmul.f32 %v4203_v44, %v1286_v36  ;;  %v1273_v10 = vmax.f32 %v1265_v37, 0.0  ;;  %v1274_v17 = vmax.f32 %v1266_v40, 0.0 }
 0x10b   : >>> { %v1290_v55 = vmul.f32 %v4248_v48, %v1286_v36  ;;  %v1295_v11 = vstv %s4257_s12  ;;  %v1275_v30 = vmax.f32 %v1267_v32, 0.0  ;;  %v1276_v12 = vmax.f32 %v1268_v63, 0.0  ;;  %s4334_s12 = sld [smem:[#allocation4 + %s1343_s22]] }
 0x10c   : >>> { %v1278_v61 = vmul.f32 %v1277_v46, %v1269_v49  ;;  %v1279_v50 = vmul.f32 %v1277_v46, %v1270_v35  ;;  %v1280_v31 = vmul.f32 %v1277_v46, %v1271_v42  ;;  %v1291_v16 = vmul.f32 %v4259_v20, %v1286_v36 }
 0x10d   : >>> { %v1292_v58 = vmul.f32 %v4262_v38, %v1286_v36  ;;  %v1293_v0 = vmul.f32 %v4265_v5, %v1286_v36  ;;  %v1294_v34 = vmul.f32 %v4214_v15, %v1286_v36  ;;  %v1296_v4 = vadd.f32 %v1295_v11, %v1287_v47 }
 0x10e   : >>> { %v1297_v24 = vadd.f32 %v1295_v11, %v1288_v52  ;;  %v1298_v18 = vadd.f32 %v1295_v11, %v1289_v51  ;;  %v1281_v27 = vmul.f32 %v1277_v46, %v1272_v8  ;;  %v1282_v14 = vmul.f32 %v1277_v46, %v1273_v10 }
 0x10f   : >>> { %v1283_v29 = vmul.f32 %v1277_v46, %v1274_v17  ;;  %v1299_v56 = vadd.f32 %v1295_v11, %v1290_v55  ;;  %v1284_v57 = vmul.f32 %v1277_v46, %v1275_v30  ;;  %v1285_v41 = vmul.f32 %v1277_v46, %v1276_v12 }
 0x110   : >>> { %v1312_v37 = vstv %s4293_s25  ;;  %v4318_v40 = vadd.f32 %v1278_v61, %v4224_v25  ;;  %v1300_v32 = vadd.f32 %v1295_v11, %v1291_v16  ;;  %v1301_v63 = vadd.f32 %v1295_v11, %v1292_v58  ;;  %s1347_s25 = sadd.s32 47, %s3720_s14 }
 0x111   : >>> { %v1302_v36 = vadd.f32 %v1295_v11, %v1293_v0  ;;  %v1349_v49 = vstv %s4302_s8  ;;  %v1303_v35 = vadd.f32 %v1295_v11, %v1294_v34  ;;  %v1304_v42 = vmax.f32 %v1296_v4, 0.0  ;;  %s4374_s8 = sld [smem:[#allocation4 + %s1347_s25]] }
 0x112   : >>> { %v1305_v47 = vmax.f32 %v1297_v24, 0.0  ;;  %v1306_v8 = vmax.f32 %v1298_v18, 0.0  ;;  %v1307_v52 = vmax.f32 %v1299_v56, 0.0  ;;  %v1350_v46 = vmul.f32 %v4197_v33, %v1349_v49 }
 0x113   : >>> { %v1351_v51 = vmul.f32 %v4200_v43, %v1349_v49  ;;  %v1352_v25 = vmul.f32 %v4203_v44, %v1349_v49  ;;  %v1353_v10 = vmul.f32 %v4248_v48, %v1349_v49  ;;  %v1354_v17 = vmul.f32 %v4259_v20, %v1349_v49 }
 0x114   : >>> { %v1355_v55 = vmul.f32 %v4262_v38, %v1349_v49  ;;  %v1358_v11 = vstv %s4310_s6  ;;  %v1308_v30 = vmax.f32 %v1300_v32, 0.0  ;;  %v1309_v12 = vmax.f32 %v1301_v63, 0.0  ;;  %s4442_s6 = sld [smem:[#allocation4 + %s1435_s9]] }
 0x115   : >>> { %v1356_v61 = vmul.f32 %v4265_v5, %v1349_v49  ;;  %v1357_v16 = vmul.f32 %v4214_v15, %v1349_v49  ;;  %v1310_v58 = vmax.f32 %v1302_v36, 0.0  ;;  %v1311_v0 = vmax.f32 %v1303_v35, 0.0 }
 0x116   : >>> { %v1313_v34 = vmul.f32 %v1312_v37, %v1304_v42  ;;  %v1314_v4 = vmul.f32 %v1312_v37, %v1305_v47  ;;  %v1315_v24 = vmul.f32 %v1312_v37, %v1306_v8  ;;  %v1316_v18 = vmul.f32 %v1312_v37, %v1307_v52 }
 0x117   : >>> { %v1359_v56 = vadd.f32 %v1358_v11, %v1350_v46  ;;  %v1360_v53 = vadd.f32 %v1358_v11, %v1351_v51  ;;  %v1361_v54 = vadd.f32 %v1358_v11, %v1352_v25  ;;  %v1362_v3 = vadd.f32 %v1358_v11, %v1353_v10 }
 0x118   : >>> { %v1363_v32 = vadd.f32 %v1358_v11, %v1354_v17  ;;  %v1364_v63 = vadd.f32 %v1358_v11, %v1355_v55  ;;  %v1317_v2 = vmul.f32 %v1312_v37, %v1308_v30  ;;  %v4337_v1 = vmul.f32 %v1312_v37, %v1309_v12 }
 0x119   : >>> { %v1365_v49 = vadd.f32 %v1358_v11, %v1356_v61  ;;  %v1366_v36 = vadd.f32 %v1358_v11, %v1357_v16  ;;  %v4339_v35 = vmul.f32 %v1312_v37, %v1310_v58  ;;  %v4341_v42 = vmul.f32 %v1312_v37, %v1311_v0 }
 0x11a   : >>> { %v1322_v47 = vadd.f32 %v1279_v50, %v4227_v23  ;;  %v1323_v8 = vadd.f32 %v1280_v31, %v4231_v19  ;;  %v1324_v52 = vadd.f32 %v1281_v27, %v4243_v9  ;;  %v1367_v46 = vmax.f32 %v1359_v56, 0.0 }
 0x11b   : >>> { %v1368_v51 = vmax.f32 %v1360_v53, 0.0  ;;  %v1375_v25 = vstv %s4322_s7  ;;  %v1369_v10 = vmax.f32 %v1361_v54, 0.0  ;;  %v1370_v17 = vmax.f32 %v1362_v3, 0.0  ;;  %s2103_s7 = scalar_lea.vmem (%p4804_p12), %s5383_s29, %s2503_s30 [#allocation10] }
 0x11c   : >>> { %v1371_v55 = vmax.f32 %v1363_v32, 0.0  ;;  %v1372_v11 = vmax.f32 %v1364_v63, 0.0  ;;  %v1325_v37 = vadd.f32 %v1282_v14, %v4246_v39  ;;  %v1326_v30 = vadd.f32 %v1283_v29, %v4252_v59  ;;  %v1440_v63 = vld [vmem:[#allocation2 + $0x10] sm:$0xff] }
 0x11d   : >>> { %v1373_v23 = vmax.f32 %v1365_v49, 0.0  ;;  %v1374_v50 = vmax.f32 %v1366_v36, 0.0  ;;  %v1327_v19 = vadd.f32 %v1284_v57, %v4255_v60  ;;  %v1328_v31 = vadd.f32 %v1285_v41, %v4270_v21  ;;  %v1442_v49 = vld [vmem:[#allocation2 + $0x20] sm:$0xff] }
 0x11e   : >>> { %v4354_v9 = vadd.f32 %v1313_v34, %v4273_v62  ;;  %v4357_v53 = vadd.f32 %v1314_v4, %v4276_v26  ;;  %v4360_v3 = vadd.f32 %v1315_v24, %v4280_v13  ;;  %v1376_v54 = vmul.f32 %v1375_v25, %v1367_v46  ;;  %v1437_v24 = vld [vmem:[#allocation2 + $0x30] sm:$0xff] }
 0x11f   : >>> { %v1377_v39 = vmul.f32 %v1375_v25, %v1368_v51  ;;  %v1384_v27 = vstv %s4334_s12  ;;  %v1378_v59 = vmul.f32 %v1375_v25, %v1369_v10  ;;  %v1379_v14 = vmul.f32 %v1375_v25, %v1370_v17 }
 0x120   : >>> { %v1380_v29 = vmul.f32 %v1375_v25, %v1371_v55  ;;  %v1381_v60 = vmul.f32 %v1375_v25, %v1372_v11  ;;  %v4365_v21 = vadd.f32 %v1316_v18, %v4283_v22  ;;  %v4368_v62 = vadd.f32 %v1317_v2, %v4286_v6  ;;  %v1439_v18 = vld [vmem:[#allocation2 + $0x18] sm:$0xff] }
 0x121   : >>> { %v1382_v26 = vmul.f32 %v1375_v25, %v1373_v23  ;;  %v1383_v57 = vmul.f32 %v1375_v25, %v1374_v50  ;;  %v1385_v13 = vmul.f32 %v4197_v33, %v1384_v27  ;;  %v1386_v41 = vmul.f32 %v4200_v43, %v1384_v27  ;;  %v1438_v33 = vld [vmem:[#allocation2] sm:$0xff] }
 0x122   : >>> { %v1387_v12 = vmul.f32 %v4203_v44, %v1384_v27  ;;  %v1393_v61 = vstv %s4345_s0  ;;  %v1388_v16 = vmul.f32 %v4248_v48, %v1384_v27  ;;  %v1389_v58 = vmul.f32 %v4259_v20, %v1384_v27  ;;  %v1441_v48 = vld [vmem:[#allocation2 + $0x8] sm:$0xff] }
 0x123   : >>> { %v1419_v22 = vadd.f32 %v1376_v54, %v4318_v40  ;;  %v1420_v0 = vadd.f32 %v1377_v39, %v1322_v47  ;;  %v1421_v2 = vadd.f32 %v1378_v59, %v1323_v8  ;;  %v1422_v6 = vadd.f32 %v1379_v14, %v1324_v52  ;;  %v1443_v8 = vld [vmem:[#allocation2 + $0x28] sm:$0xff]  ;;  %v1444_v52 = vld [vmem:[#allocation2 + $0x38] sm:$0xff] }
 0x124   : >>> { %v1423_v34 = vadd.f32 %v1380_v29, %v1325_v37  ;;  %v1424_v4 = vadd.f32 %v1381_v60, %v1326_v30  ;;  %v1390_v43 = vmul.f32 %v4262_v38, %v1384_v27  ;;  %v1391_v44 = vmul.f32 %v4265_v5, %v1384_v27 }
 0x125   : >>> { %v1425_v56 = vadd.f32 %v1382_v26, %v1327_v19  ;;  %v1426_v32 = vadd.f32 %v1383_v57, %v1328_v31  ;;  %v1392_v20 = vmul.f32 %v4214_v15, %v1384_v27  ;;  %v4382_v40 = vadd.f32 %v1393_v61, %v1385_v13 }
 0x126   : >>> { %v4384_v36 = vadd.f32 %v1393_v61, %v1386_v41  ;;  %v4386_v47 = vadd.f32 %v1393_v61, %v1387_v12  ;;  %v4388_v46 = vadd.f32 %v1393_v61, %v1388_v16  ;;  %v4390_v38 = vadd.f32 %v1393_v61, %v1389_v58 }
 0x127   : >>> { %v4392_v5 = vadd.f32 %v1437_v24, %v1419_v22  ;;  %v4394_v51 = vadd.f32 %v1438_v33, %v1420_v0  ;;  %v4396_v25 = vadd.f32 %v1439_v18, %v1421_v2  ;;  %v4398_v15 = vadd.f32 %v1440_v63, %v1422_v6 }
 0x128   : >>> { %v4400_v10 = vadd.f32 %v1441_v48, %v1423_v34  ;;  %v4402_v17 = vadd.f32 %v1442_v49, %v1424_v4  ;;  %v4404_v55 = vadd.f32 %v1443_v8, %v1425_v56  ;;  %v4406_v11 = vadd.f32 %v1444_v52, %v1426_v32 }
 0x129   : >>> { %v1462_v37 = vrot.slane %v4392_v5, 4  ;;  %v1468_v30 = vrot.slane %v4394_v51, 4  ;;  %v4410_v23 = vadd.f32 %v1393_v61, %v1390_v43  ;;  %v4412_v50 = vadd.f32 %v1393_v61, %v1391_v44 }
 0x12a   : >>> { %v4414_v19 = vadd.f32 %v1393_v61, %v1392_v20  ;;  %v1402_v31 = vmax.f32 %v4382_v40, 0.0  ;;  %v1403_v54 = vmax.f32 %v4384_v36, 0.0  ;;  %v1404_v39 = vmax.f32 %v4386_v47, 0.0 }
 0x12b   : >>> { %v4421_v59 = vstv %s4374_s8  ;;  %v1463_v14 = vmax.f32 %v4392_v5, %v1462_v37  ;;  %v1469_v29 = vmax.f32 %v4394_v51, %v1468_v30  ;;  %v1474_v60 = vrot.slane %v4396_v25, 4 }
 0x12c   : >>> { %v1480_v26 = vrot.slane %v4398_v15, 4  ;;  %v1486_v57 = vrot.slane %v4400_v10, 4  ;;  %v1492_v13 = vrot.slane %v4402_v17, 4  ;;  %v1498_v41 = vrot.slane %v4404_v55, 4 }
 0x12d   : >>> { %v1504_v12 = vrot.slane %v4406_v11, 4  ;;  %v1464_v61 = vrot.slane %v1463_v14, 2  ;;  %v1470_v16 = vrot.slane %v1469_v29, 2  ;;  %v1475_v58 = vmax.f32 %v4396_v25, %v1474_v60 }
 0x12e   : >>> { %v1481_v22 = vmax.f32 %v4398_v15, %v1480_v26  ;;  %v1487_v0 = vmax.f32 %v4400_v10, %v1486_v57  ;;  %v1493_v2 = vmax.f32 %v4402_v17, %v1492_v13  ;;  %v1499_v6 = vmax.f32 %v4404_v55, %v1498_v41 }
 0x12f   : >>> { %v1505_v34 = vmax.f32 %v4406_v11, %v1504_v12  ;;  %v1465_v4 = vmax.f32 %v1463_v14, %v1464_v61  ;;  %v1471_v24 = vmax.f32 %v1469_v29, %v1470_v16  ;;  %v1476_v33 = vrot.slane %v1475_v58, 2 }
 0x130   : >>> { %v1482_v18 = vrot.slane %v1481_v22, 2  ;;  %v1488_v43 = vrot.slane %v1487_v0, 2  ;;  %v1494_v44 = vrot.slane %v1493_v2, 2  ;;  %v1500_v56 = vrot.slane %v1499_v6, 2 }
 0x131   : >>> { %v1506_v32 = vrot.slane %v1505_v34, 2  ;;  %v1466_v63 = vrot.slane %v1465_v4, 1  ;;  %v1472_v48 = vrot.slane %v1471_v24, 1  ;;  %v1477_v49 = vmax.f32 %v1475_v58, %v1476_v33 }
 0x132   : >>> { %v1483_v20 = vmax.f32 %v1481_v22, %v1482_v18  ;;  %v1489_v8 = vmax.f32 %v1487_v0, %v1488_v43  ;;  %v1495_v52 = vmax.f32 %v1493_v2, %v1494_v44  ;;  %v1501_v37 = vmax.f32 %v1499_v6, %v1500_v56 }
 0x133   : >>> { %v1507_v30 = vmax.f32 %v1505_v34, %v1506_v32  ;;  %v1467_v60 = vmax.f32 %v1465_v4, %v1466_v63  ;;  %v1473_v26 = vmax.f32 %v1471_v24, %v1472_v48  ;;  %v1478_v57 = vrot.slane %v1477_v49, 1 }
 0x134   : >>> { %v1484_v14 = vrot.slane %v1483_v20, 1  ;;  %v1490_v29 = vrot.slane %v1489_v8, 1  ;;  %v1496_v13 = vrot.slane %v1495_v52, 1  ;;  %v1502_v41 = vrot.slane %v1501_v37, 1 }
 0x135   : >>> { %v1508_v12 = vrot.slane %v1507_v30, 1  ;;  %v1479_v61 = vmax.f32 %v1477_v49, %v1478_v57  ;;  %v1510_v27 = vsub.f32 %v4392_v5, %v1467_v60  ;;  %v1511_v58 = vsub.f32 %v4394_v51, %v1473_v26 }
 0x136   : >>> { %v1485_v16 = vmax.f32 %v1483_v20, %v1484_v14  ;;  %v1491_v22 = vmax.f32 %v1489_v8, %v1490_v29  ;;  %v1497_v0 = vmax.f32 %v1495_v52, %v1496_v13  ;;  %v1503_v2 = vmax.f32 %v1501_v37, %v1502_v41 }
 0x137   : >>> { %v1509_v6 = vmax.f32 %v1507_v30, %v1508_v12  ;;  %v1512_v34 = vsub.f32 %v4396_v25, %v1479_v61  ;;  %v1518_v24 = vmul.f32 1.442695, %v1510_v27  ;;  %v1520_v33 = vmul.f32 1.442695, %v1511_v58 }
 0x138   : >>> { %v1513_v4 = vsub.f32 %v4398_v15, %v1485_v16  ;;  %v1514_v18 = vsub.f32 %v4400_v10, %v1491_v22  ;;  %v1515_v43 = vsub.f32 %v4402_v17, %v1497_v0  ;;  %v1516_v5 = vsub.f32 %v4404_v55, %v1503_v2 }
 0x139   : >>> { %v1517_v51 = vsub.f32 %v4406_v11, %v1509_v6  ;;  %v1406_v44 = vmax.f32 %v4390_v38, 0.0  ;;  %2823 = vpow2.f32 %v1518_v24  ;;  %v1522_v56 = vmul.f32 1.442695, %v1512_v34 }
 0x13a   : >>> { %v1524_v32 = vmul.f32 1.442695, %v1513_v4  ;;  %v1407_v25 = vmax.f32 %v4410_v23, 0.0  ;;  %2825 = vpow2.f32 %v1520_v33  ;;  %v1526_v15 = vmul.f32 1.442695, %v1514_v18 }
 0x13b   : >>> { %v1528_v27 = vmul.f32 1.442695, %v1515_v43  ;;  %v1408_v63 = vmax.f32 %v4412_v50, 0.0  ;;  %v1411_v10 = vmul.f32 %v4421_v59, %v1402_v31  ;;  %2827 = vpow2.f32 %v1522_v56 }
 0x13c   : >>> { %v1530_v17 = vmul.f32 1.442695, %v1516_v5  ;;  %v1409_v55 = vmax.f32 %v4414_v19, 0.0  ;;  %v1412_v38 = vmul.f32 %v4421_v59, %v1403_v54  ;;  %2829 = vpow2.f32 %v1524_v32 }
 0x13d   : >>> { %v1532_v11 = vmul.f32 1.442695, %v1517_v51  ;;  %v1334_v23 = vadd.f32 %v4337_v1, %v4290_v28  ;;  %v1335_v50 = vadd.f32 %v4339_v35, %v4296_v45  ;;  %v1413_v40 = vmul.f32 %v4421_v59, %v1404_v39 }
 0x13e   : >>> { %2831 = vpow2.f32 %v1526_v15  ;;  %v1336_v19 = vadd.f32 %v4341_v42, %v4299_v7  ;;  %v5296_v36 = vmax.f32 %v4388_v46, 0.0  ;;  %v1415_v54 = vmul.f32 %v4421_v59, %v1406_v44 }
 0x13f   : >>> { %2833 = vpow2.f32 %v1528_v27  ;;  %v1416_v1 = vmul.f32 %v4421_v59, %v1407_v25  ;;  %v1417_v28 = vmul.f32 %v4421_v59, %v1408_v63  ;;  %v1427_v45 = vadd.f32 %v1411_v10, %v4354_v9 }
 0x140   : >>> { %v1414_v31 = vmul.f32 %v4421_v59, %v5296_v36  ;;  %2835 = vpow2.f32 %v1530_v17  ;;  %v1418_v35 = vmul.f32 %v4421_v59, %v1409_v55  ;;  %v1428_v47 = vadd.f32 %v1412_v38, %v4357_v53 }
 0x141   : >>> { %v1453_v39 = vstv %s4442_s6  ;;  %2837 = vpow2.f32 %v1532_v11  ;;  %v1429_v7 = vadd.f32 %v1413_v40, %v4360_v3  ;;  %v1431_v46 = vadd.f32 %v1415_v54, %v4368_v62 }
 0x142   : >>> { %v1430_v42 = vadd.f32 %v1414_v31, %v4365_v21  ;;  %v1432_v48 = vadd.f32 %v1416_v1, %v1334_v23  ;;  %v1454_v49 = vadd.f32 %v1453_v39, %v1427_v45  ;;  %v1433_v20 = vadd.f32 %v1417_v28, %v1335_v50 }
 0x143   : >>> { %v1434_v8 = vadd.f32 %v1418_v35, %v1336_v19  ;;  %v1455_v52 = vadd.f32 %v1453_v39, %v1428_v47  ;;  %v1456_v37 = vadd.f32 %v1453_v39, %v1429_v7  ;;  %v1458_v59 = vadd.f32 %v1453_v39, %v1431_v46 }
 0x144   : >>> { %v1457_v30 = vadd.f32 %v1453_v39, %v1430_v42  ;;  %v1459_v26 = vadd.f32 %v1453_v39, %v1432_v48  ;;  %v4482_v3 = vadd.f32 %v1453_v39, %v1433_v20 }
 0x145   : >>> { %v4484_v21 = vadd.f32 %v1453_v39, %v1434_v8 }
 0x146   : >>> { %v2824_v9 = vpop.eup %2823 }
 0x147   : >>> { %v2826_v60 = vpop.eup %2825  ;;  %v1534_v53 = vrot.slane %v2824_v9, 4  ;;  %v4480_v57 = vmul.f32 %v2824_v9, %v1454_v49 }
 0x148   : >>> { %v2828_v14 = vpop.eup %2827  ;;  %v1540_v62 = vrot.slane %v2826_v60, 4  ;;  %v4486_v29 = vmul.f32 %v2826_v60, %v1455_v52 }
 0x149   : >>> { %v2830_v13 = vpop.eup %2829  ;;  %v1535_v41 = vadd.f32 %v2824_v9, %v1534_v53  ;;  %v1546_v12 = vrot.slane %v2828_v14, 4  ;;  %v4488_v61 = vmul.f32 %v2828_v14, %v1456_v37  ;;  %v1606_v16 = vrot.slane %v4480_v57, 4 }
 0x14a   : >>> { %v1541_v22 = vadd.f32 %v2826_v60, %v1540_v62  ;;  %v1552_v0 = vrot.slane %v2830_v13, 4  ;;  %v4491_v2 = vmul.f32 %v2830_v13, %v1457_v30  ;;  %v1612_v6 = vrot.slane %v4486_v29, 4 }
 0x14b   : >>> { %v2832_v58 = vpop.eup %2831  ;;  %v1536_v4 = vrot.slane %v1535_v41, 2  ;;  %v1547_v24 = vadd.f32 %v2828_v14, %v1546_v12 }
 0x14c   : >>> { %v2834_v34 = vpop.eup %2833  ;;  %v1558_v33 = vrot.slane %v2832_v58, 4  ;;  %v4494_v18 = vmul.f32 %v2832_v58, %v1458_v59  ;;  %v1542_v5 = vrot.slane %v1541_v22, 2  ;;  %v1553_v51 = vadd.f32 %v2830_v13, %v1552_v0 }
 0x14d   : >>> { %v2836_v43 = vpop.eup %2835  ;;  %v1564_v44 = vrot.slane %v2834_v34, 4  ;;  %v4496_v56 = vmul.f32 %v2834_v34, %v1459_v26  ;;  %v1537_v25 = vadd.f32 %v1536_v4, %v1535_v41  ;;  %v1548_v15 = vrot.slane %v1547_v24, 2 }
 0x14e   : >>> { %v2838_v32 = vpop.eup %2837  ;;  %v1559_v27 = vadd.f32 %v2832_v58, %v1558_v33  ;;  %v1570_v63 = vrot.slane %v2836_v43, 4  ;;  %v1543_v10 = vadd.f32 %v1542_v5, %v1541_v22  ;;  %v1554_v17 = vrot.slane %v1553_v51, 2 }
 0x14f   : >>> { %v1565_v55 = vadd.f32 %v2834_v34, %v1564_v44  ;;  %v1576_v38 = vrot.slane %v2838_v32, 4  ;;  %v1538_v11 = vrot.slane %v1537_v25, 1  ;;  %v1549_v23 = vadd.f32 %v1548_v15, %v1547_v24 }
 0x150   : >>> { %v1560_v50 = vrot.slane %v1559_v27, 2  ;;  %v1571_v40 = vadd.f32 %v2836_v43, %v1570_v63  ;;  %v1544_v19 = vrot.slane %v1543_v10, 1  ;;  %v1555_v36 = vadd.f32 %v1554_v17, %v1553_v51 }
 0x151   : >>> { %v1566_v31 = vrot.slane %v1565_v55, 2  ;;  %v1577_v54 = vadd.f32 %v2838_v32, %v1576_v38  ;;  %v1539_v1 = vadd.f32 %v1538_v11, %v1537_v25  ;;  %v1550_v28 = vrot.slane %v1549_v23, 1 }
 0x152   : >>> { %v1561_v45 = vadd.f32 %v1560_v50, %v1559_v27  ;;  %v1572_v35 = vrot.slane %v1571_v40, 2  ;;  %v1545_v47 = vadd.f32 %v1544_v19, %v1543_v10  ;;  %v1556_v39 = vrot.slane %v1555_v36, 1 }
 0x153   : >>> { %v1567_v7 = vadd.f32 %v1566_v31, %v1565_v55  ;;  %v1578_v42 = vrot.slane %v1577_v54, 2  ;;  %v1551_v46 = vadd.f32 %v1550_v28, %v1549_v23  ;;  %v1582_v20 = vadd.f32 1e-20, %v1539_v1 }
 0x154   : >>> { %v1562_v48 = vrot.slane %v1561_v45, 1  ;;  %v1573_v49 = vadd.f32 %v1572_v35, %v1571_v40  ;;  %v1557_v8 = vadd.f32 %v1556_v39, %v1555_v36  ;;  %v1583_v9 = vadd.f32 1e-20, %v1545_v47 }
 0x155   : >>> { %v1568_v52 = vrot.slane %v1567_v7, 1  ;;  %v1579_v37 = vadd.f32 %v1578_v42, %v1577_v54  ;;  %v1584_v59 = vadd.f32 1e-20, %v1551_v46  ;;  %2839 = vrcp.f32 %v1582_v20  ;;  %v5297_v20 = vld [vmem:[#allocation20_spill] sm:$0xff] }
 0x156   : >>> { %v1563_v30 = vadd.f32 %v1562_v48, %v1561_v45  ;;  %v1574_v60 = vrot.slane %v1573_v49, 1  ;;  %v1585_v14 = vadd.f32 1e-20, %v1557_v8  ;;  %2841 = vrcp.f32 %v1583_v9 }
 0x157   : >>> { %v1569_v26 = vadd.f32 %v1568_v52, %v1567_v7  ;;  %v1580_v53 = vrot.slane %v1579_v37, 1  ;;  %2843 = vrcp.f32 %v1584_v59  ;;  %v4499_v41 = vmul.f32 %v2836_v43, %v4482_v3 }
 0x158   : >>> { %v1575_v62 = vadd.f32 %v1574_v60, %v1573_v49  ;;  %v1586_v13 = vadd.f32 1e-20, %v1563_v30  ;;  %2845 = vrcp.f32 %v1585_v14  ;;  %v4502_v22 = vmul.f32 %v2838_v32, %v4484_v21 }
 0x159   : >>> { %v1581_v12 = vadd.f32 %v1580_v53, %v1579_v37  ;;  %v1587_v58 = vadd.f32 1e-20, %v1569_v26  ;;  %v1607_v34 = vadd.f32 %v1606_v16, %v4480_v57  ;;  %v1613_v4 = vadd.f32 %v1612_v6, %v4486_v29 }
 0x15a   : >>> { %v1588_v0 = vadd.f32 1e-20, %v1575_v62  ;;  %2847 = vrcp.f32 %v1586_v13  ;;  %v1618_v3 = vrot.slane %v4488_v61, 4  ;;  %v1624_v33 = vrot.slane %v4491_v2, 4 }
 0x15b   : >>> { %v1589_v24 = vadd.f32 1e-20, %v1581_v12  ;;  %2849 = vrcp.f32 %v1587_v58  ;;  %v1608_v43 = vrot.slane %v1607_v34, 2  ;;  %v1614_v21 = vrot.slane %v1613_v4, 2 }
 0x15c   : >>> { %2851 = vrcp.f32 %v1588_v0  ;;  %v1630_v5 = vrot.slane %v4494_v18, 4  ;;  %v1619_v51 = vadd.f32 %v1618_v3, %v4488_v61  ;;  %v1625_v16 = vadd.f32 %v1624_v33, %v4491_v2 }
 0x15d   : >>> { %2853 = vrcp.f32 %v1589_v24  ;;  %v1636_v44 = vrot.slane %v4496_v56, 4  ;;  %v1609_v32 = vadd.f32 %v1608_v43, %v1607_v34  ;;  %v1615_v6 = vadd.f32 %v1614_v21, %v1613_v4 }
 0x15e   : >>> { %v1631_v25 = vadd.f32 %v1630_v5, %v4494_v18  ;;  %v1642_v15 = vrot.slane %v4499_v41, 4  ;;  %v1620_v27 = vrot.slane %v1619_v51, 2  ;;  %v1626_v63 = vrot.slane %v1625_v16, 2 }
 0x15f   : >>> { %v1637_v10 = vadd.f32 %v1636_v44, %v4496_v56  ;;  %v1648_v17 = vrot.slane %v4502_v22, 4  ;;  %v1610_v55 = vrot.slane %v1609_v32, 1  ;;  %v1616_v38 = vrot.slane %v1615_v6, 1 }
 0x160   : >>> { %v1632_v11 = vrot.slane %v1631_v25, 2  ;;  %v1643_v23 = vadd.f32 %v1642_v15, %v4499_v41  ;;  %v1621_v50 = vadd.f32 %v1620_v27, %v1619_v51  ;;  %v1627_v40 = vadd.f32 %v1626_v63, %v1625_v16 }
 0x161   : >>> { %v1638_v19 = vrot.slane %v1637_v10, 2  ;;  %v1649_v36 = vadd.f32 %v1648_v17, %v4502_v22  ;;  %v1611_v31 = vadd.f32 %v1610_v55, %v1609_v32  ;;  %v1617_v54 = vadd.f32 %v1616_v38, %v1615_v6 }
 0x162   : >>> { %v1633_v1 = vadd.f32 %v1632_v11, %v1631_v25  ;;  %v1644_v28 = vrot.slane %v1643_v23, 2  ;;  %v4522_v45 = vpop.eup %2839  ;;  %v1622_v35 = vrot.slane %v1621_v50, 1  ;;  %v1628_v47 = vrot.slane %v1627_v40, 1 }
 0x163   : >>> { %v1639_v39 = vadd.f32 %v1638_v19, %v1637_v10  ;;  %v1650_v7 = vrot.slane %v1649_v36, 2  ;;  %v4524_v42 = vpop.eup %2841  ;;  %v4527_v49 = vmul.f32 %v4522_v45, %v1611_v31  ;;  %v1662_v8 = vmul.f32 %v5297_v20, %v4480_v57 }
 0x164   : >>> { %v1634_v46 = vrot.slane %v1633_v1, 1  ;;  %v1645_v48 = vadd.f32 %v1644_v28, %v1643_v23  ;;  %v4531_v52 = vpop.eup %2843  ;;  %v1623_v37 = vadd.f32 %v1622_v35, %v1621_v50  ;;  %v1629_v9 = vadd.f32 %v1628_v47, %v1627_v40 }
 0x165   : >>> { %v1640_v30 = vrot.slane %v1639_v39, 1  ;;  %v1651_v60 = vadd.f32 %v1650_v7, %v1649_v36  ;;  %v4533_v59 = vpop.eup %2845  ;;  %v4536_v14 = vmul.f32 %v4524_v42, %v1617_v54  ;;  %v1663_v62 = vmul.f32 %v5297_v20, %v4486_v29 }
 0x166   : >>> { %v1635_v26 = vadd.f32 %v1634_v46, %v1633_v1  ;;  %v1646_v53 = vrot.slane %v1645_v48, 1  ;;  %v4543_v0 = vmul.f32 %v4531_v52, %v1623_v37  ;;  %v4546_v34 = vmul.f32 %v4533_v59, %v1629_v9 }
 0x167   : >>> { %v4540_v13 = vpop.eup %2847  ;;  %v1641_v12 = vadd.f32 %v1640_v30, %v1639_v39  ;;  %v1652_v58 = vrot.slane %v1651_v60, 1  ;;  %v1664_v33 = vmul.f32 %v5297_v20, %v4488_v61  ;;  %v1665_v43 = vmul.f32 %v5297_v20, %v4491_v2 }
 0x168   : >>> { %v4548_v4 = vpop.eup %2849  ;;  %v1647_v24 = vadd.f32 %v1646_v53, %v1645_v48  ;;  %v4551_v3 = vmul.f32 %v4540_v13, %v1635_v26  ;;  %v1666_v16 = vmul.f32 %v5297_v20, %v4494_v18  ;;  %v1667_v44 = vmul.f32 %v5297_v20, %v4496_v56 }
 0x169   : >>> { %v4557_v21 = vpop.eup %2851  ;;  %v1653_v5 = vadd.f32 %v1652_v58, %v1651_v60  ;;  %v4560_v51 = vmul.f32 %v4548_v4, %v1641_v12  ;;  %v1668_v25 = vmul.f32 %v5297_v20, %v4499_v41  ;;  %v1669_v15 = vmul.f32 %v5297_v20, %v4502_v22 }
 0x16a   : >>> { %v4566_v32 = vpop.eup %2853  ;;  %v4569_v6 = vmul.f32 %v4557_v21, %v1647_v24  ;;  %v1670_v27 = vrot.slane %v1662_v8, 4  ;;  %v1676_v10 = vrot.slane %v1663_v62, 4  ;;  %v1682_v17 = vrot.slane %v1664_v33, 4 }
 0x16b   : >>> { %v4576_v63 = vmul.f32 %v4566_v32, %v1653_v5  ;;  %v1688_v55 = vrot.slane %v1665_v43, 4  ;;  %v1694_v11 = vrot.slane %v1666_v16, 4  ;;  %v1700_v23 = vrot.slane %v1667_v44, 4 }
 0x16c   : >>> { %v1671_v38 = vadd.f32 %v1670_v27, %v1662_v8  ;;  %v1706_v50 = vrot.slane %v1668_v25, 4  ;;  %v1677_v40 = vadd.f32 %v1676_v10, %v1663_v62  ;;  %v1683_v19 = vadd.f32 %v1682_v17, %v1664_v33 }
 0x16d   : >>> { %v1689_v36 = vadd.f32 %v1688_v55, %v1665_v43  ;;  %v1712_v31 = vrot.slane %v1669_v15, 4  ;;  %v1695_v1 = vadd.f32 %v1694_v11, %v1666_v16  ;;  %v1701_v28 = vadd.f32 %v1700_v23, %v1667_v44 }
 0x16e   : >>> { %v1672_v54 = vrot.slane %v1671_v38, 2  ;;  %v1707_v35 = vadd.f32 %v1706_v50, %v1668_v25  ;;  %v1678_v47 = vrot.slane %v1677_v40, 2  ;;  %v1684_v39 = vrot.slane %v1683_v19, 2 }
 0x16f   : >>> { %v1690_v7 = vrot.slane %v1689_v36, 2  ;;  %v1713_v46 = vadd.f32 %v1712_v31, %v1669_v15  ;;  %v1696_v8 = vrot.slane %v1695_v1, 2  ;;  %v1702_v37 = vrot.slane %v1701_v28, 2 }
 0x170   : >>> { %v1673_v48 = vadd.f32 %v1672_v54, %v1671_v38  ;;  %v1708_v9 = vrot.slane %v1707_v35, 2  ;;  %v1679_v30 = vadd.f32 %v1678_v47, %v1677_v40  ;;  %v1685_v60 = vadd.f32 %v1684_v39, %v1683_v19 }
 0x171   : >>> { %v1691_v26 = vadd.f32 %v1690_v7, %v1689_v36  ;;  %v1714_v53 = vrot.slane %v1713_v46, 2  ;;  %v1697_v12 = vadd.f32 %v1696_v8, %v1695_v1  ;;  %v1703_v58 = vadd.f32 %v1702_v37, %v1701_v28 }
 0x172   : >>> { %v1674_v62 = vrot.slane %v1673_v48, 1  ;;  %v1709_v24 = vadd.f32 %v1708_v9, %v1707_v35  ;;  %v1680_v33 = vrot.slane %v1679_v30, 1  ;;  %v1686_v43 = vrot.slane %v1685_v60, 1 }
 0x173   : >>> { %v1692_v5 = vrot.slane %v1691_v26, 1  ;;  %v1715_v16 = vadd.f32 %v1714_v53, %v1713_v46  ;;  %v1698_v25 = vrot.slane %v1697_v12, 1  ;;  %v1704_v15 = vrot.slane %v1703_v58, 1  ;;  %v5298_v46 = vld [vmem:[#allocation19_spill] sm:$0xff] }
 0x174   : >>> { %v1675_v44 = vadd.f32 %v1674_v62, %v1673_v48  ;;  %v1710_v27 = vrot.slane %v1709_v24, 1  ;;  %v1681_v10 = vadd.f32 %v1680_v33, %v1679_v30  ;;  %v1687_v17 = vadd.f32 %v1686_v43, %v1685_v60 }
 0x175   : >>> { %v1693_v55 = vadd.f32 %v1692_v5, %v1691_v26  ;;  %v1716_v38 = vrot.slane %v1715_v16, 1  ;;  %v1699_v11 = vadd.f32 %v1698_v25, %v1697_v12  ;;  %v1705_v23 = vadd.f32 %v1704_v15, %v1703_v58 }
 0x176   : >>> { %v1711_v50 = vadd.f32 %v1710_v27, %v1709_v24  ;;  %v4579_v40 = vmul.f32 %v4522_v45, %v1675_v44  ;;  %v1719_v36 = vmul.f32 %v4524_v42, %v1681_v10  ;;  %v1720_v31 = vmul.f32 %v4531_v52, %v1687_v17 }
 0x177   : >>> { %v1717_v19 = vadd.f32 %v1716_v38, %v1715_v16  ;;  %v1721_v54 = vmul.f32 %v4533_v59, %v1693_v55  ;;  %v1722_v1 = vmul.f32 %v4540_v13, %v1699_v11  ;;  %v1723_v28 = vmul.f32 %v4548_v4, %v1705_v23 }
 0x178   : >>> { %v1724_v35 = vmul.f32 %v4557_v21, %v1711_v50  ;;  %v1735_v47 = vsel %vm1734_vm8, %v4536_v14, %v4527_v49  ;;  %v1774_v48 = vmul.f32 %v5298_v46, %v4480_v57  ;;  %v1775_v8 = vmul.f32 %v5298_v46, %v4486_v29 }
 0x179   : >>> { %v1725_v39 = vmul.f32 %v4566_v32, %v1717_v19  ;;  %v1737_v7 = vsel %vm1736_vm9, %v4543_v0, %v1735_v47  ;;  %v1776_v9 = vmul.f32 %v5298_v46, %v4488_v61  ;;  %v1777_v49 = vmul.f32 %v5298_v46, %v4491_v2 }
 0x17a   : >>> { %v1739_v37 = vsel %vm1738_vm10, %v4546_v34, %v1737_v7  ;;  %v1778_v14 = vmul.f32 %v5298_v46, %v4494_v18  ;;  %v1779_v30 = vmul.f32 %v5298_v46, %v4496_v56  ;;  %v1780_v60 = vmul.f32 %v5298_v46, %v4499_v41 }
 0x17b   : >>> { %v1741_v0 = vsel %vm1740_vm11, %v4551_v3, %v1739_v37  ;;  %v1781_v34 = vmul.f32 %v5298_v46, %v4502_v22  ;;  %v1782_v53 = vrot.slane %v1774_v48, 4  ;;  %v1788_v62 = vrot.slane %v1775_v8, 4 }
 0x17c   : >>> { %v1743_v26 = vsel %vm1742_vm12, %v4560_v51, %v1741_v0  ;;  %v1794_v12 = vrot.slane %v1776_v9, 4  ;;  %v1800_v24 = vrot.slane %v1777_v49, 4  ;;  %v1806_v3 = vrot.slane %v1778_v14, 4 }
 0x17d   : >>> { %v1745_v58 = vsel %vm1744_vm13, %v4569_v6, %v1743_v26  ;;  %v1812_v33 = vrot.slane %v1779_v30, 4  ;;  %v1783_v5 = vadd.f32 %v1782_v53, %v1774_v48  ;;  %v1789_v16 = vadd.f32 %v1788_v62, %v1775_v8 }
 0x17e   : >>> { %v4619_v43 = vsel %vm1746_vm14, %v4576_v63, %v1745_v58  ;;  %v1795_v44 = vadd.f32 %v1794_v12, %v1776_v9  ;;  %v1801_v51 = vadd.f32 %v1800_v24, %v1777_v49  ;;  %v1807_v15 = vadd.f32 %v1806_v3, %v1778_v14 }
 0x17f   : >>> { %v4623_v25 = vmul.f32 %v5297_v20, %v4619_v43  ;;  %v1813_v27 = vadd.f32 %v1812_v33, %v1779_v30  ;;  %v1784_v10 = vrot.slane %v1783_v5, 2  ;;  %v1790_v17 = vrot.slane %v1789_v16, 2 }
 0x180   : >>> { %v1796_v6 = vrot.slane %v1795_v44, 2  ;;  %v1818_v55 = vrot.slane %v1780_v60, 4  ;;  %v1802_v53 = vrot.slane %v1801_v51, 2  ;;  %v1808_v62 = vrot.slane %v1807_v15, 2 }
 0x181   : >>> { %v1751_v38 = vrot.slane %v4623_v25, 1  ;;  %v1752_v11 = vrot.slane %v4623_v25, 2  ;;  %v1753_v63 = vrot.slane %v4623_v25, 3  ;;  %v1754_v23 = vrot.slane %v4623_v25, 4 }
 0x182   : >>> { %v1755_v50 = vrot.slane %v4623_v25, 5  ;;  %v1756_v20 = vrot.slane %v4623_v25, 6  ;;  %v1757_v19 = vrot.slane %v4623_v25, 7  ;;  %v1766_v47 = vsub.f32 %v4579_v40, %v4623_v25 }
 0x183   : >>> { %v4634_v7 = vsub.f32 %v1719_v36, %v1751_v38  ;;  %v4636_v48 = vsub.f32 %v1720_v31, %v1752_v11  ;;  %v4638_v8 = vsub.f32 %v1721_v54, %v1753_v63  ;;  %v4640_v37 = vsub.f32 %v1722_v1, %v1754_v23 }
 0x184   : >>> { %v4642_v9 = vsub.f32 %v1723_v28, %v1755_v50  ;;  %v4644_v49 = vsub.f32 %v1724_v35, %v1756_v20  ;;  %v4646_v14 = vsub.f32 %v1725_v39, %v1757_v19  ;;  %v1785_v0 = vadd.f32 %v1784_v10, %v1783_v5  ;;  %v5299_v19 = vld [vmem:[#allocation18_spill] sm:$0xff] }
 0x185   : >>> { %v1791_v30 = vadd.f32 %v1790_v17, %v1789_v16  ;;  %v1797_v26 = vadd.f32 %v1796_v6, %v1795_v44  ;;  %v1814_v36 = vrot.slane %v1813_v27, 2  ;;  %v1819_v58 = vadd.f32 %v1818_v55, %v1780_v60 }
 0x186   : >>> { %v1786_v12 = vrot.slane %v1785_v0, 1  ;;  %v1824_v31 = vrot.slane %v1781_v34, 4  ;;  %v1803_v3 = vadd.f32 %v1802_v53, %v1801_v51  ;;  %v1809_v1 = vadd.f32 %v1808_v62, %v1807_v15 }
 0x187   : >>> { %v1792_v24 = vrot.slane %v1791_v30, 1  ;;  %v1798_v54 = vrot.slane %v1797_v26, 1  ;;  %v1815_v28 = vadd.f32 %v1814_v36, %v1813_v27  ;;  %v1820_v38 = vrot.slane %v1819_v58, 2 }
 0x188   : >>> { %v1787_v33 = vadd.f32 %v1786_v12, %v1785_v0  ;;  %v1825_v35 = vadd.f32 %v1824_v31, %v1781_v34  ;;  %v1804_v63 = vrot.slane %v1803_v3, 1  ;;  %v1810_v5 = vrot.slane %v1809_v1, 1 }
 0x189   : >>> { %v1793_v11 = vadd.f32 %v1792_v24, %v1791_v30  ;;  %v1799_v39 = vadd.f32 %v1798_v54, %v1797_v26  ;;  %v1816_v16 = vrot.slane %v1815_v28, 1  ;;  %v1821_v44 = vadd.f32 %v1820_v38, %v1819_v58 }
 0x18a   : >>> { %v1826_v10 = vrot.slane %v1825_v35, 2  ;;  %v4649_v17 = vmul.f32 %v4522_v45, %v1787_v33  ;;  %v1805_v60 = vadd.f32 %v1804_v63, %v1803_v3  ;;  %v1811_v6 = vadd.f32 %v1810_v5, %v1809_v1 }
 0x18b   : >>> { %v1831_v55 = vmul.f32 %v4524_v42, %v1793_v11  ;;  %v1832_v51 = vmul.f32 %v4531_v52, %v1799_v39  ;;  %v1817_v15 = vadd.f32 %v1816_v16, %v1815_v28  ;;  %v1822_v27 = vrot.slane %v1821_v44, 1 }
 0x18c   : >>> { %v1827_v23 = vadd.f32 %v1826_v10, %v1825_v35  ;;  %v4655_v34 = vmul.f32 %v5298_v46, %v4619_v43  ;;  %v1833_v50 = vmul.f32 %v4533_v59, %v1805_v60  ;;  %v1834_v20 = vmul.f32 %v4540_v13, %v1811_v6 }
 0x18d   : >>> { %v1863_v0 = vmul.f32 %v5299_v19, %v4480_v57  ;;  %v1864_v30 = vmul.f32 %v5299_v19, %v4486_v29  ;;  %v1823_v26 = vadd.f32 %v1822_v27, %v1821_v44  ;;  %v1835_v62 = vmul.f32 %v4548_v4, %v1817_v15 }
 0x18e   : >>> { %v1828_v53 = vrot.slane %v1827_v23, 1  ;;  %v1840_v12 = vrot.slane %v4655_v34, 1  ;;  %v1841_v36 = vrot.slane %v4655_v34, 2  ;;  %v1842_v46 = vrot.slane %v4655_v34, 3 }
 0x18f   : >>> { %v1843_v58 = vrot.slane %v4655_v34, 4  ;;  %v1844_v31 = vrot.slane %v4655_v34, 5  ;;  %v1836_v57 = vmul.f32 %v4557_v21, %v1823_v26  ;;  %v1845_v54 = vrot.slane %v4655_v34, 6 }
 0x190   : >>> { %v1829_v24 = vadd.f32 %v1828_v53, %v1827_v23  ;;  %v1846_v29 = vrot.slane %v4655_v34, 7  ;;  %v4674_v1 = vsub.f32 %v1831_v55, %v1840_v12  ;;  %v4676_v33 = vsub.f32 %v1832_v51, %v1841_v36 }
 0x191   : >>> { %v4678_v28 = vsub.f32 %v1833_v50, %v1842_v46  ;;  %v4681_v35 = vsub.f32 %v1834_v20, %v1843_v58  ;;  %v4683_v11 = vsub.f32 %v1835_v62, %v1844_v31  ;;  %v4685_v39 = vsub.f32 %v1836_v57, %v1845_v54 }
 0x192   : >>> { %v1837_v38 = vmul.f32 %v4566_v32, %v1829_v24  ;;  %v1865_v63 = vmul.f32 %v5299_v19, %v4488_v61  ;;  %v1866_v5 = vmul.f32 %v5299_v19, %v4491_v2  ;;  %v1867_v16 = vmul.f32 %v5299_v19, %v4494_v18 }
 0x193   : >>> { %v1868_v44 = vmul.f32 %v5299_v19, %v4496_v56  ;;  %v1869_v60 = vmul.f32 %v5299_v19, %v4499_v41  ;;  %v1870_v6 = vmul.f32 %v5299_v19, %v4502_v22  ;;  %v1871_v55 = vrot.slane %v1863_v0, 4 }
 0x194   : >>> { %v4695_v10 = vsub.f32 %v1837_v38, %v1846_v29  ;;  %v1877_v51 = vrot.slane %v1864_v30, 4  ;;  %v1883_v61 = vrot.slane %v1865_v63, 4  ;;  %v1889_v15 = vrot.slane %v1866_v5, 4 }
 0x195   : >>> { %v1895_v27 = vrot.slane %v1867_v16, 4  ;;  %v1872_v2 = vadd.f32 %v1871_v55, %v1863_v0  ;;  %v1901_v23 = vrot.slane %v1868_v44, 4  ;;  %v1907_v50 = vrot.slane %v1869_v60, 4 }
 0x196   : >>> { %v1913_v18 = vrot.slane %v1870_v6, 4  ;;  %v1878_v20 = vadd.f32 %v1877_v51, %v1864_v30  ;;  %v1884_v26 = vadd.f32 %v1883_v61, %v1865_v63  ;;  %v1890_v56 = vadd.f32 %v1889_v15, %v1866_v5 }
 0x197   : >>> { %v1896_v53 = vadd.f32 %v1895_v27, %v1867_v16  ;;  %v1873_v62 = vrot.slane %v1872_v2, 2  ;;  %v1902_v12 = vadd.f32 %v1901_v23, %v1868_v44  ;;  %v1908_v36 = vadd.f32 %v1907_v50, %v1869_v60 }
 0x198   : >>> { %v1914_v41 = vadd.f32 %v1913_v18, %v1870_v6  ;;  %v1879_v46 = vrot.slane %v1878_v20, 2  ;;  %v1885_v58 = vrot.slane %v1884_v26, 2  ;;  %v1891_v22 = vrot.slane %v1890_v56, 2 }
 0x199   : >>> { %v1897_v31 = vrot.slane %v1896_v53, 2  ;;  %v1874_v24 = vadd.f32 %v1873_v62, %v1872_v2  ;;  %v1903_v57 = vrot.slane %v1902_v12, 2  ;;  %v1909_v54 = vrot.slane %v1908_v36, 2 }
 0x19a   : >>> { %v1915_v29 = vrot.slane %v1914_v41, 2  ;;  %v1880_v0 = vadd.f32 %v1879_v46, %v1878_v20  ;;  %v1886_v38 = vadd.f32 %v1885_v58, %v1884_v26  ;;  %v1892_v55 = vadd.f32 %v1891_v22, %v1890_v56 }
 0x19b   : >>> { %v1898_v3 = vadd.f32 %v1897_v31, %v1896_v53  ;;  %v1875_v30 = vrot.slane %v1874_v24, 1  ;;  %v1904_v63 = vadd.f32 %v1903_v57, %v1902_v12  ;;  %v1910_v5 = vadd.f32 %v1909_v54, %v1908_v36 }
 0x19c   : >>> { %v1916_v16 = vadd.f32 %v1915_v29, %v1914_v41  ;;  %v1881_v51 = vrot.slane %v1880_v0, 1  ;;  %v1887_v44 = vrot.slane %v1886_v38, 1  ;;  %v1893_v60 = vrot.slane %v1892_v55, 1 }
 0x19d   : >>> { %v1899_v6 = vrot.slane %v1898_v3, 1  ;;  %v1876_v61 = vadd.f32 %v1875_v30, %v1874_v24  ;;  %v1905_v15 = vrot.slane %v1904_v63, 1  ;;  %v1911_v27 = vrot.slane %v1910_v5, 1 }
 0x19e   : >>> { %v1917_v23 = vrot.slane %v1916_v16, 1  ;;  %v1882_v2 = vadd.f32 %v1881_v51, %v1880_v0  ;;  %v1888_v50 = vadd.f32 %v1887_v44, %v1886_v38  ;;  %v1894_v18 = vadd.f32 %v1893_v60, %v1892_v55  ;;  %v5312_v44 = vld [vmem:[#allocation38_spill] sm:$0xff] }
 0x19f   : >>> { %v1900_v62 = vadd.f32 %v1899_v6, %v1898_v3  ;;  %v1906_v20 = vadd.f32 %v1905_v15, %v1904_v63  ;;  %v1912_v26 = vadd.f32 %v1911_v27, %v1910_v5  ;;  %v1919_v53 = vmul.f32 %v4522_v45, %v1876_v61  ;;  %v5300_v45 = vld [vmem:[#allocation44_spill] sm:$0xff]  ;;  %v5314_v61 = vld [vmem:[#allocation37_spill] sm:$0xff] }
 0x1a0   : >>> { %v1918_v56 = vadd.f32 %v1917_v23, %v1916_v16  ;;  %v1920_v12 = vmul.f32 %v4524_v42, %v1882_v2  ;;  %v1921_v36 = vmul.f32 %v4531_v52, %v1888_v50  ;;  %v1922_v41 = vmul.f32 %v4533_v59, %v1894_v18  ;;  %v5302_v42 = vld [vmem:[#allocation43_spill] sm:$0xff]  ;;  %v5308_v5 = vld [vmem:[#allocation40_spill] sm:$0xff] }
 0x1a1   : >>> { %v1923_v46 = vmul.f32 %v4540_v13, %v1900_v62  ;;  %v1924_v58 = vmul.f32 %v4548_v4, %v1906_v20  ;;  %v1925_v22 = vmul.f32 %v4557_v21, %v1912_v26  ;;  %v1927_v3 = vmul.f32 %v5299_v19, %v4619_v43  ;;  %v5304_v13 = vld [vmem:[#allocation42_spill] sm:$0xff]  ;;  %v5306_v21 = vld [vmem:[#allocation41_spill] sm:$0xff]  ;;  %v5310_v16 = vld [vmem:[#allocation39_spill] sm:$0xff] }
 0x1a2   : >>> { %v1926_v31 = vmul.f32 %v4566_v32, %v1918_v56  ;;  %v4715_v54 = vadd.f32 %v5300_v45, %v1766_v47   ;;  %v4719_v52 = vadd.f32 %v5302_v42, %v4634_v7   ;;  %v4727_v26 = vadd.f32 %v5306_v21, %v4638_v8   ;;  %v5317_v23 = vld [vmem:[#allocation36_spill] sm:$0xff] }
 0x1a3   : >>> { %v1929_v32 = vrot.slane %v1927_v3, 1  ;;  %v1930_v43 = vrot.slane %v1927_v3, 2  ;;  %v1931_v19 = vrot.slane %v1927_v3, 3  ;;  %v1932_v29 = vrot.slane %v1927_v3, 4 }
 0x1a4   : >>> { %v5301_v24 = vmov %v4715_v54  ;;  %v5303_v59 = vmov %v4719_v52  ;;  %v4723_v52 = vadd.f32 %v5304_v13, %v4636_v48   ;;  %v5307_v57 = vmov %v4727_v26  ;;  %v5330_v26 = vld [vmem:[#allocation29_spill] sm:$0xff] }
 0x1a5   : >>> { %v1933_v40 = vrot.slane %v1927_v3, 5  ;;  %v1934_v25 = vrot.slane %v1927_v3, 6  ;;  %v1935_v47 = vrot.slane %v1927_v3, 7  ;;  %v1944_v54 = vsub.f32 %v1919_v53, %v1927_v3  ;;  %v5334_v53 = vld [vmem:[#allocation27_spill] sm:$0xff] }
 0x1a6   : >>> { %v5305_v4 = vmov %v4723_v52  ;;  %v1945_v0 = vsub.f32 %v1920_v12, %v1929_v32  ;;  %v1946_v38 = vsub.f32 %v1921_v36, %v1930_v43  ;;  %v1947_v7 = vsub.f32 %v1922_v41, %v1931_v19  ;;  %v5338_v36 = vld [vmem:[#allocation25_spill] sm:$0xff]  ;;  %v5342_v3 = vld [vmem:[#allocation23_spill] sm:$0xff] }
 0x1a7   : >>> { %v1948_v55 = vsub.f32 %v1923_v46, %v1932_v29  ;;  %v1949_v30 = vsub.f32 %v1924_v58, %v1933_v40  ;;  %v1950_v63 = vsub.f32 %v1925_v22, %v1934_v25  ;;  %v1951_v48 = vsub.f32 %v1926_v31, %v1935_v47 }
 0x1a8   : >>> { %v4731_v51 = vadd.f32 %v5308_v5, %v4640_v37   ;;  %v4735_v50 = vadd.f32 %v5310_v16, %v4642_v9   ;;  %v4739_v25 = vadd.f32 %v5312_v44, %v4644_v49   ;;  %v4743_v49 = vadd.f32 %v5314_v61, %v4646_v14   ;;  %v5318_v37 = vld [vmem:[#allocation35_spill] sm:$0xff]  ;;  %v5320_v9 = vld [vmem:[#allocation34_spill] sm:$0xff] }
 0x1a9   : >>> { %v5316_v27 = vsub.f32 %v4649_v17, %v4655_v34  ;;  %v4753_v47 = vadd.f32 %v5318_v37, %v4674_v1   ;;  %v4757_v46 = vadd.f32 %v5320_v9, %v4676_v33   ;;  %v5326_v17 = vld [vmem:[#allocation31_spill] sm:$0xff]  ;;  %v4777_v41 = vadd.f32 %v5330_v26, %v4695_v10   ;;  %v5332_v33 = vld [vmem:[#allocation28_spill] sm:$0xff]  ;;  %v5344_v10 = vld [vmem:[#allocation22_spill] sm:$0xff] }
 0x1aa   : >>> { %v5309_v8 = vmov %v4731_v51  ;;  %v5311_v60 = vmov %v4735_v50  ;;  %v5313_v6 = vmov %v4739_v25  ;;  %v5315_v15 = vmov %v4743_v49  ;;  %v5322_v51 = vld [vmem:[#allocation33_spill] sm:$0xff]  ;;  %v5324_v49 = vld [vmem:[#allocation32_spill] sm:$0xff]  ;;  %v5328_v50 = vld [vmem:[#allocation30_spill] sm:$0xff] }
 0x1ab   : >>> { %v4749_v2 = vadd.f32 %v5317_v23, %v5316_v27   ;;  %v5319_v18 = vmov %v4753_v47  ;;  %v5321_v62 = vmov %v4757_v46  ;;  %v4761_v45 = vadd.f32 %v5322_v51, %v4678_v28   ;;  %v5340_v46 = vld [vmem:[#allocation24_spill] sm:$0xff] }
 0x1ac   : >>> { %v4765_v44 = vadd.f32 %v5324_v49, %v4681_v35   ;;  %v4769_v43 = vadd.f32 %v5326_v17, %v4683_v11   ;;  %v4773_v42 = vadd.f32 %v5328_v50, %v4685_v39   ;;  %v5331_v56 = vmov %v4777_v41  ;;  %v5336_v35 = vld [vmem:[#allocation26_spill] sm:$0xff]  ;;  %v5346_v41 = vld [vmem:[#allocation21_spill] sm:$0xff] }
 0x1ad   : >>> { %v5323_v20 = vmov %v4761_v45  ;;  %v4780_v40 = vadd.f32 %v5332_v33, %v1944_v54   ;;  %v4783_v39 = vadd.f32 %v5334_v53, %v1945_v0   ;;  %v4786_v38 = vadd.f32 %v5336_v35, %v1946_v38  }
 0x1ae   : >>> { %v5325_v14 = vmov %v4765_v44  ;;  %v5327_v34 = vmov %v4769_v43  ;;  %v5329_v1 = vmov %v4773_v42  ;;  %v4789_v22 = vadd.f32 %v5338_v36, %v1947_v7  }
 0x1af   : >>> { %v5333_v28 = vmov %v4780_v40  ;;  %v5335_v12 = vmov %v4783_v39  ;;  %v5337_v58 = vmov %v4786_v38  ;;  %v4792_v37 = vadd.f32 %v5340_v46, %v1948_v55  }
 0x1b0   : >>> { %v5339_v11 = vmov %v4789_v22  ;;  %v4795_v36 = vadd.f32 %v5342_v3, %v1949_v30   ;;  %v4798_v33 = vadd.f32 %v5344_v10, %v1950_v63   ;;  %v4801_v32 = vadd.f32 %v5346_v41, %v1951_v48  }
 0x1b1   : >>> { %v5341_v31 = vmov %v4792_v37  ;;  %v5353_v22 = vmov %v5339_v11  ;;  %v5354_v38 = vmov %v5337_v58  ;;  %v5355_v39 = vmov %v5335_v12 }
 0x1b2   : >>> { %v5343_v13 = vmov %v4795_v36  ;;  %v5345_v21 = vmov %v4798_v33  ;;  %v5347_v19 = vmov %v4801_v32  ;;  %v5352_v37 = vmov %v5341_v31 }
 0x1b3   : >>> { %v5349_v32 = vmov %v5347_v19  ;;  %v5350_v33 = vmov %v5345_v21  ;;  %v5351_v36 = vmov %v5343_v13  ;;  %v5356_v40 = vmov %v5333_v28  ;;  %631 = sbr.rel (!%p4804_p12) target bundleno = 125 (0x7d), region = 129 }
 0x1b4   : >>> { %v5357_v41 = vmov %v5331_v56  ;;  %v5358_v42 = vmov %v5329_v1  ;;  %v5359_v43 = vmov %v5327_v34  ;;  %v5360_v44 = vmov %v5325_v14 }
 0x1b5   : >>> { %v5361_v45 = vmov %v5323_v20  ;;  %v5362_v46 = vmov %v5321_v62  ;;  %v5363_v47 = vmov %v5319_v18  ;;  %v5364_v48 = vmov %v4749_v2 }
 0x1b6   : >>> { %v5365_v49 = vmov %v5315_v15  ;;  %v5366_v25 = vmov %v5313_v6  ;;  %v5367_v50 = vmov %v5311_v60  ;;  %v5368_v51 = vmov %v5309_v8 }
 0x1b7   : >>> { %v5369_v26 = vmov %v5307_v57  ;;  %v5370_v52 = vmov %v5305_v4  ;;  %v5371_v53 = vmov %v5303_v59  ;;  %v5372_v54 = vmov %v5301_v24 }
 0x1b8   : >> { %v1976_v29 = vmul.f32 %v5301_v24, %v5301_v24  ;;  %v1977_v54 = vmul.f32 %v5303_v59, %v5303_v59  ;;  %v1978_v0 = vmul.f32 %v5305_v4, %v5305_v4  ;;  %v1979_v7 = vmul.f32 %v5307_v57, %v5307_v57  ;;  %s2206_s22 = sand.u32 (%p278_p13), 1, %s3337_s19   ;;  %s5123_s11 = sshll.u32 (%p278_p13), %s3337_s19, 7 }
 0x1b9   : >> { %v1980_v55 = vmul.f32 %v5309_v8, %v5309_v8  ;;  %v1981_v30 = vmul.f32 %v5311_v60, %v5311_v60  ;;  %v1984_v39 = vmul.f32 %v4749_v2, %v4749_v2  ;;  %v1985_v22 = vmul.f32 %v5319_v18, %v5319_v18  ;;  %s5130_s0 = scalar_lea.hbm (%p278_p13), %s5238_s2, %s5123_s11  ;;  %s5136_s19 = scalar_lea.hbm (%p278_p13), %s5239_s3, %s5123_s11 }
 0x1ba   : >> { %v1986_v45 = vmul.f32 %v5321_v62, %v5321_v62  ;;  %v1987_v42 = vmul.f32 %v5323_v20, %v5323_v20  ;;  %v1982_v52 = vmul.f32 %v5313_v6, %v5313_v6  ;;  %v1988_v32 = vmul.f32 %v5325_v14, %v5325_v14  ;;  %s5388_s8 = scalar_lea.vmem (%p278_p13), [#allocation10], %s3437_s10  ;;  %s2224_s6 = sshll.u32 (%p278_p13), %s3462_s26, 4  ;;  %s5171_s6 = int_to_ptr.vmem [resolvable:$true] %s2224_s6 }
 0x1bb   : >> { %v1989_v43 = vmul.f32 %v5327_v34, %v5327_v34  ;;  %v1990_v40 = vmul.f32 %v5329_v1, %v5329_v1  ;;  %v1992_v25 = vadd.f32 %v1984_v39, %v1976_v29  ;;  %v1993_v47 = vadd.f32 %v1985_v22, %v1977_v54  ;;  %s2239_s9 = sshll.u32 (%p278_p13), %s5388_s8, 4  ;;  %s5143_s14 = scalar_lea.sflag (%p278_p13), [#allocation11], %s2206_s22  ;;  %s5140_s9 = int_to_ptr.vmem [resolvable:$true] %s2239_s9 }
 0x1bc   : >> { %v1994_v38 = vadd.f32 %v1986_v45, %v1978_v0  ;;  %v1983_v63 = vmul.f32 %v5315_v15, %v5315_v15  ;;  %v1991_v48 = vmul.f32 %v5331_v56, %v5331_v56  ;;  %v1995_v5 = vadd.f32 %v1987_v42, %v1979_v7  ;;  %s2920_s30 = scalar_lea.vmem (%p278_p13), %s5140_s9, 384  ;;  %p5389_p8 = scmp.ne.s32.totalorder (%p278_p13), %s5257_s27, 0 }
 0x1bd   : >> { %v1996_v16 = vadd.f32 %v1988_v32, %v1980_v55  ;;  %v2000_v44 = vmul.f32 %v5333_v28, %v5333_v28  ;;  %v2001_v61 = vmul.f32 %v5335_v12, %v5335_v12  ;;  %v2002_v27 = vmul.f32 %v5337_v58, %v5337_v58  ;;  %p2921_p7 = scmp.ne.s32.totalorder (%p278_p13), %s5140_s9, %s2920_s30  ;;  %s3285_s29 = smov (%p278_p13), [#allocation10]  }
 0x1be   : >> { %v2003_v23 = vmul.f32 %v5339_v11, %v5339_v11  ;;  %v1997_v37 = vadd.f32 %v1989_v43, %v1981_v30  ;;  %v1998_v9 = vadd.f32 %v1990_v40, %v1982_v52  ;;  %v2004_v51 = vmul.f32 %v5341_v31, %v5341_v31 }
 0x1bf   : >> { %v2005_v49 = vmul.f32 %v5343_v13, %v5343_v13  ;;  %v2006_v17 = vmul.f32 %v5345_v21, %v5345_v21  ;;  %v4930_v50 = vadd.f32 %v2000_v44, %v1992_v25  ;;  %v4932_v26 = vadd.f32 %v2001_v61, %v1993_v47  ;;  %p2922_p9 = pnand (%p278_p13), %p2921_p7, %p5389_p8 }
 0x1c0   : >> { %v4934_v33 = vadd.f32 %v2002_v27, %v1994_v38  ;;  %v1999_v53 = vadd.f32 %v1991_v48, %v1983_v63  ;;  %v2007_v35 = vmul.f32 %v5347_v19, %v5347_v19  ;;  %v4938_v36 = vadd.f32 %v2003_v23, %v1995_v5 }
 0x1c1   : >> { %v4940_v46 = vadd.f32 %v2004_v51, %v1996_v16  ;;  %2863 = vrsqrt.f32 %v4930_v50  ;;  %v4943_v3 = vadd.f32 %v2005_v49, %v1997_v37  ;;  %v4946_v10 = vadd.f32 %v2006_v17, %v1998_v9  ;;  %p2923_p10 = pneg (%p278_p13), %p2922_p9 }
 0x1c2   : >> { %2865 = vrsqrt.f32 %v4932_v26  ;;  %v4949_v41 = vadd.f32 %v2007_v35, %v1999_v53  ;;  %vm2018_vm15 = vcmp.eq.f32.partialorder %v4930_v50, inf  ;;  %v2021_v29 = vand.u32 2147483648, %v4930_v50 }
 0x1c3   : >> { %2867 = vrsqrt.f32 %v4934_v33  ;;  %v2028_v54 = vand.u32 2147483648, %v4932_v26  ;;  %vm2020_vm0 = vcmp.eq.f32.partialorder %v4930_v50, 0.0  ;;  %vm2025_vm1 = vcmp.eq.f32.partialorder %v4932_v26, inf }
 0x1c4   : >> { %2869 = vrsqrt.f32 %v4938_v36  ;;  %v2035_v0 = vand.u32 2147483648, %v4934_v33  ;;  %v2042_v7 = vand.u32 2147483648, %v4938_v36  ;;  %v2049_v55 = vand.u32 2147483648, %v4940_v46 }
 0x1c5   : >> { %2871 = vrsqrt.f32 %v4940_v46  ;;  %vm2027_vm2 = vcmp.eq.f32.partialorder %v4932_v26, 0.0  ;;  %vm2032_vm3 = vcmp.eq.f32.partialorder %v4934_v33, inf  ;;  %v2056_v30 = vand.u32 2147483648, %v4943_v3 }
 0x1c6   : >> { %2873 = vrsqrt.f32 %v4943_v3  ;;  %v2063_v39 = vand.u32 2147483648, %v4946_v10  ;;  %v2070_v22 = vand.u32 2147483648, %v4949_v41  ;;  %v2113_v45 = vrot.slane %v5303_v59, 7 }
 0x1c7   : >> { %2875 = vrsqrt.f32 %v4946_v10  ;;  %v2115_v42 = vrot.slane %v5305_v4, 6  ;;  %v2117_v52 = vrot.slane %v5307_v57, 5  ;;  %v2119_v32 = vrot.slane %v5309_v8, 4 }
 0x1c8   : >> { %2877 = vrsqrt.f32 %v4949_v41  ;;  %v2121_v43 = vrot.slane %v5311_v60, 3  ;;  %v2123_v40 = vrot.slane %v5313_v6, 2  ;;  %v2125_v25 = vrot.slane %v5315_v15, 1 }
 0x1c9   : >> { %v2137_v47 = vrot.slane %v5319_v18, 7  ;;  %v2114_v59 = vsel %vm1734_vm8, %v2113_v45, %v5301_v24  ;;  %v2139_v4 = vrot.slane %v5321_v62, 6  ;;  %v2141_v57 = vrot.slane %v5323_v20, 5  ;;  %v5373_v45 = vld [vmem:[#allocation20_spill] sm:$0xff] }
 0x1ca   : >> { %v2143_v8 = vrot.slane %v5325_v14, 4  ;;  %vm2055_vm7 = vcmp.eq.f32.partialorder %v4943_v3, 0.0  ;;  %v2116_v60 = vsel %vm1736_vm9, %v2115_v42, %v2114_v59  ;;  %v2145_v15 = vrot.slane %v5327_v34, 3 }
 0x1cb   : >> { %v2138_v6 = vsel %vm1734_vm8, %v2137_v47, %v4749_v2  ;;  %v2147_v18 = vrot.slane %v5329_v1, 2  ;;  %vm2062_vm4 = vcmp.eq.f32.partialorder %v4946_v10, 0.0  ;;  %vm2067_vm5 = vcmp.eq.f32.partialorder %v4949_v41, inf }
 0x1cc   : >> { %v2118_v24 = vsel %vm1738_vm10, %v2117_v52, %v2116_v60  ;;  %v2140_v62 = vsel %vm1736_vm9, %v2139_v4, %v2138_v6  ;;  %v2149_v20 = vrot.slane %v5331_v56, 1  ;;  %v2161_v14 = vrot.slane %v5335_v12, 7 }
 0x1cd   : >> { %vm2069_vm6 = vcmp.eq.f32.partialorder %v4949_v41, 0.0  ;;  %v2120_v2 = vsel %vm1740_vm11, %v2119_v32, %v2118_v24  ;;  %v2142_v34 = vsel %vm1738_vm10, %v2141_v57, %v2140_v62  ;;  %v2163_v1 = vrot.slane %v5337_v58, 6 }
 0x1ce   : >> { %v2864_v38 = vpop.eup %2863  ;;  %v2165_v63 = vrot.slane %v5339_v11, 5  ;;  %v2122_v16 = vsel %vm1742_vm12, %v2121_v43, %v2120_v2  ;;  %v2144_v56 = vsel %vm1740_vm11, %v2143_v8, %v2142_v34  ;;  %v2162_v12 = vsel %vm1734_vm8, %v2161_v14, %v5333_v28 }
 0x1cf   : >> { %v2866_v48 = vpop.eup %2865  ;;  %v2017_v5 = vmul.f32 %v2864_v38, %v4930_v50  ;;  %v2124_v27 = vsel %vm1744_vm13, %v2123_v40, %v2122_v16  ;;  %v2146_v23 = vsel %vm1742_vm12, %v2145_v15, %v2144_v56  ;;  %v2164_v58 = vsel %vm1736_vm9, %v2163_v1, %v2162_v12  ;;  %v5382_v38 = vld [vmem:[#allocation19_spill] sm:$0xff] }
 0x1d0   : >> { %v2868_v44 = vpop.eup %2867  ;;  %v2024_v61 = vmul.f32 %v2866_v48, %v4932_v26  ;;  %v2126_v51 = vsel %vm1746_vm14, %v2125_v25, %v2124_v27  ;;  %v2148_v28 = vsel %vm1744_vm13, %v2147_v18, %v2146_v23  ;;  %v2166_v2 = vsel %vm1738_vm10, %v2165_v63, %v2164_v58 }
 0x1d1   : >> { %v2870_v11 = vpop.eup %2869  ;;  %v2019_v37 = vsel %vm2018_vm15, %v4930_v50, %v2017_v5  ;;  %v2031_v9 = vmul.f32 %v2868_v44, %v4934_v33  ;;  %v5030_v1 = vadd.f32 %v5373_v45, %v2126_v51   ;;  %v2150_v43 = vsel %vm1746_vm14, %v2149_v20, %v2148_v28 }
 0x1d2   : >> { %v2872_v49 = vpop.eup %2871  ;;  %v2022_v17 = vsel %vm2020_vm0, %v2021_v29, %v2019_v37  ;;  %v2026_v53 = vsel %vm2025_vm1, %v4932_v26, %v2024_v61  ;;  %v2038_v35 = vmul.f32 %v2870_v11, %v4938_v36  ;;  %vm5375_vm15 = vcmp.eq.f32.partialorder %v4934_v33, 0.0  ;;  %v5384_v61 = vld [vmem:[#allocation18_spill] sm:$0xff] }
 0x1d3   : >> { %v5374_v42 = vmov %v5030_v1  ;;  %v2874_v52 = vpop.eup %2873  ;;  %v2029_v32 = vsel %vm2027_vm2, %v2028_v54, %v2026_v53  ;;  %v2033_v50 = vsel %vm2032_vm3, %v4934_v33, %v2031_v9  ;;  %v2045_v29 = vmul.f32 %v2872_v49, %v4940_v46 }
 0x1d4   : >> { %v2876_v40 = vpop.eup %2875  ;;  %v2036_v25 = vsel %vm5375_vm15, %v2035_v0, %v2033_v50  ;;  %vm5376_vm0 = vcmp.eq.f32.partialorder %v4938_v36, inf  ;;  %v2052_v26 = vmul.f32 %v2874_v52, %v4943_v3  ;;  %v2080_v54 = vrot.slane %v2029_v32, 7  ;;  %2177 = vst [vmem:[%s3462_s26] sm:$0xff] (%p278_p13), %v5374_v42 }
 0x1d5   : >> { %v2040_v47 = vsel %vm5376_vm0, %v4938_v36, %v2038_v35  ;;  %v2878_v59 = vpop.eup %2877  ;;  %vm5377_vm1 = vcmp.eq.f32.partialorder %v4938_v36, 0.0  ;;  %vm5378_vm2 = vcmp.eq.f32.partialorder %v4940_v46, inf  ;;  %v2059_v33 = vmul.f32 %v2876_v40, %v4946_v10 }
 0x1d6   : >> { %v2043_v4 = vsel %vm5377_vm1, %v2042_v7, %v2040_v47  ;;  %v2047_v57 = vsel %vm5378_vm2, %v4940_v46, %v2045_v29  ;;  %v2083_v0 = vrot.slane %v2036_v25, 6  ;;  %vm5379_vm3 = vcmp.eq.f32.partialorder %v4940_v46, 0.0 }
 0x1d7   : >> { %v2050_v8 = vsel %vm5379_vm3, %v2049_v55, %v2047_v57  ;;  %vm5380_vm15 = vcmp.eq.f32.partialorder %v4943_v3, inf  ;;  %v2066_v36 = vmul.f32 %v2878_v59, %v4949_v41  ;;  %v2082_v7 = vsel %vm1734_vm8, %v2080_v54, %v2022_v17 }
 0x1d8   : >> { %v2054_v60 = vsel %vm5380_vm15, %v4943_v3, %v2052_v26  ;;  %vm5381_vm0 = vcmp.eq.f32.partialorder %v4946_v10, inf  ;;  %v2085_v46 = vsel %vm1736_vm9, %v2083_v0, %v2082_v7  ;;  %v2086_v55 = vrot.slane %v2043_v4, 5 }
 0x1d9   : >> { %v2057_v6 = vsel %vm2055_vm7, %v2056_v30, %v2054_v60  ;;  %v2061_v15 = vsel %vm5381_vm0, %v4946_v10, %v2059_v33  ;;  %v2068_v24 = vsel %vm2067_vm5, %v4949_v41, %v2066_v36  ;;  %v2089_v62 = vrot.slane %v2050_v8, 4 }
 0x1da   : >> { %v2064_v18 = vsel %vm2062_vm4, %v2063_v39, %v2061_v15  ;;  %v2092_v3 = vrot.slane %v2057_v6, 3  ;;  %v2071_v30 = vsel %vm2069_vm6, %v2070_v22, %v2068_v24  ;;  %v2088_v20 = vsel %vm1738_vm10, %v2086_v55, %v2085_v46 }
 0x1db   : >> { %v2095_v14 = vrot.slane %v2064_v18, 2  ;;  %v2152_v34 = vadd.f32 %v5382_v38, %v2150_v43   ;;  %v2091_v10 = vsel %vm1740_vm11, %v2089_v62, %v2088_v20  ;;  %v2098_v39 = vrot.slane %v2071_v30, 1 }
 0x1dc   : >> { %v2167_v1 = vrot.slane %v5341_v31, 4  ;;  %v2094_v48 = vsel %vm1742_vm12, %v2092_v3, %v2091_v10  ;;  %v2169_v5 = vrot.slane %v5343_v13, 3  ;;  %v2171_v41 = vrot.slane %v5345_v21, 2  ;;  %v2182_v13 = vld [vmem:[%s3441_s13] sm:$0xff] (%p278_p13)  ;;  %v2506_v21 = vld [vmem:[%s3441_s13 + $0x8] sm:$0xff] (%p278_p13) }
 0x1dd   : >> { %v2173_v22 = vrot.slane %v5347_v19, 1  ;;  %v2097_v16 = vsel %vm1744_vm13, %v2095_v14, %v2094_v48  ;;  %2504 = vst [vmem:[%s3462_s26 + $0x8] sm:$0xff] (%p278_p13), %v2152_v34  ;;  %v2507_v19 = vld [vmem:[%s3441_s13 + $0x10] sm:$0xff] (%p278_p13)  ;;  %v2183_v23 = vsub.f32 (%p278_p13), %v5374_v42, %v2182_v13  ;;  %v2185_v58 = vsub.f32 (%p278_p13), %v2152_v34, %v2506_v21 }
 0x1de   : >> { %v2168_v56 = vsel %vm1740_vm11, %v2167_v1, %v2166_v2  ;;  %v2100_v12 = vsel %vm1746_vm14, %v2098_v39, %v2097_v16  ;;  %v5386_v2 = vmov %v2152_v34  ;;  %v5387_v1 = vmov %v5374_v42 }
 0x1df   : >> { %v2170_v63 = vsel %vm1742_vm12, %v2169_v5, %v2168_v56  ;;  %2104 = vst [vmem:[%s2103_s7] sm:$0xff] %v2100_v12  ;;  %v2188_v37 = vmul.f32 (%p278_p13), %v2183_v23, %v2183_v23  ;;  %v2189_v9 = vmul.f32 (%p278_p13), %v2185_v58, %v2185_v58  ;;  %s2924_s7 = sshll.u32 (%p278_p13), %s3285_s29, 4  ;;  %s2925_s7 = int_to_ptr.vmem [resolvable:$false] %s2924_s7 }
 0x1e0   : >> { %v2172_v31 = vsel %vm1744_vm13, %v2171_v41, %v2170_v63  ;;  %280 = sbr.rel (!%p278_p13) target bundleno = 80 (0x50), region = 140  ;;  %s2926_s12 = scalar_lea.vmem (%p278_p13), %s2925_s7, 768 }
 0x1e1   : >> { %v2174_v44 = vsel %vm1746_vm14, %v2173_v22, %v2172_v31  ;;  %v2190_v28 = vadd.f32 (%p278_p13), %v2189_v9, %v2188_v37  ;;  %p2927_p2 = scmp.lt.s32.totalorder (%p278_p13), %s5140_s9, %s2925_s7  ;;  %p2928_p0 = scmp.lt.s32.totalorder (%p278_p13), %s2926_s12, %s2920_s30 }
 0x1e2   : >> { %v2176_v27 = vadd.f32 %v5384_v61, %v2174_v44  }
 0x1e3   : > { %p2929_p3 = por (%p278_p13), %p2928_p0, %p2927_p2 }
 0x1e4   : >> { %v5385_v3 = vmov %v2176_v27  ;;  %2505 = vst [vmem:[%s3462_s26 + $0x10] sm:$0xff] (%p278_p13), %v2176_v27  ;;  %v2187_v11 = vsub.f32 (%p278_p13), %v2176_v27, %v2507_v19 }
 0x1e5   : > { %p2930_p5 = pnand %p2929_p3, %p2923_p10 }
 0x1e6   : > { %v2191_v51 = vmul.f32 %v2187_v11, %v2187_v11 }
 0x1e7   : > { %2933 = shalt.err (!%p2930_p5)
}
 0x1e8   : > { %s2934_s10 = scalar_lea.hbm %s5136_s19, 384  ;;  %s2938_s25 = scalar_lea.hbm %s5239_s3, 768 }
 0x1e9   : > { %p2935_p1 = scmp.ne.s32.totalorder %s5136_s19, %s2934_s10  ;;  %p2939_p11 = scmp.lt.s32.totalorder %s5136_s19, %s5239_s3 }
 0x1ea   : > { %p2940_p12 = scmp.lt.s32.totalorder %s2938_s25, %s2934_s10 }
 0x1eb   : > { %p2936_p4 = pnand %p2935_p1, %p5389_p8 }
 0x1ec   : > { %p2941_p13 = por %p2940_p12, %p2939_p11 }
 0x1ed   : > { %p2937_p6 = pneg %p2936_p4 }
 0x1ef   : > { %p2942_p7 = pnand %p2941_p13, %p2937_p6 }
 0x1f1   : > { %2945 = shalt.err (!%p2942_p7)
}
 0x1f2   : > { %s3286_s30 = smov 128   ;;  %s3287_s29 = smov 256   ;;  %v2192_v49 = vadd.f32 %v2191_v51, %v2190_v28 }
 0x1f3   : > { %s3288_s7 = smov 8   ;;  %s2202_s12 = scalar_lea.sflag [#allocation6], %s3434_s5 }
 0x1f4   : > { %2523 = dma.vmem_to_hbm [thread:$0]  (%p5389_p8), %s5140_s9, 384, %s5136_s19, %s5143_s14, %s3286_s30, %s3287_s29, %s3288_s7  }
 0x1f5   : > { %s2946_s10 = scalar_lea.vmem %s5171_s6, 384  ;;  %s3289_s22 = smov [#allocation9]  }
 0x1f6   : > { %p2947_p9 = scmp.ne.s32.totalorder %s5171_s6, %s2946_s10  ;;  %s2950_s20 = sshll.u32 %s3289_s22, 4  ;;  %s2951_s20 = int_to_ptr.vmem [resolvable:$false] %s2950_s20 }
 0x1f7   : > { %s2952_s25 = scalar_lea.vmem %s2951_s20, 768  ;;  %p2953_p0 = scmp.lt.s32.totalorder %s5171_s6, %s2951_s20 }
 0x1f8   : > { %p2948_p10 = pnand %p2947_p9, %p5389_p8  ;;  %p2954_p3 = scmp.lt.s32.totalorder %s2952_s25, %s2946_s10 }
 0x1fa   : > { %p2949_p2 = pneg %p2948_p10  ;;  %p2955_p5 = por %p2954_p3, %p2953_p0 }
 0x1fc   : > { %p2956_p1 = pnand %p2955_p5, %p2949_p2 }
 0x1fe   : > { %2959 = shalt.err (!%p2956_p1)
}
 0x1ff   : > { %s2960_s26 = scalar_lea.hbm %s5130_s0, 384  ;;  %s2964_s9 = scalar_lea.hbm %s5238_s2, 768 }
 0x200   : > { %p2961_p4 = scmp.ne.s32.totalorder %s5130_s0, %s2960_s26  ;;  %p2965_p12 = scmp.lt.s32.totalorder %s5130_s0, %s5238_s2 }
 0x201   : > { %p2966_p13 = scmp.lt.s32.totalorder %s2964_s9, %s2960_s26 }
 0x202   : > { %p2962_p6 = pnand %p2961_p4, %p5389_p8 }
 0x203   : > { %p2967_p7 = por %p2966_p13, %p2965_p12 }
 0x204   : > { %p2963_p11 = pneg %p2962_p6 }
 0x206   : > { %p2968_p9 = pnand %p2967_p7, %p2963_p11 }
 0x208   : > { %2971 = shalt.err (!%p2968_p9)
}
 0x209   : > { %2522 = dma.vmem_to_hbm [thread:$0]  (%p5389_p8), %s5171_s6, 384, %s5130_s0, %s2202_s12, %s3286_s30, %s3287_s29, %s3288_s7   ;;  %2879 = vrsqrt.f32 %v2192_v49  ;;  %vm2195_vm8 = vcmp.eq.f32.partialorder %v2192_v49, inf  ;;  %v2198_v53 = vand.u32 2147483648, %v2192_v49  ;;  %vm2197_vm9 = vcmp.eq.f32.partialorder %v2192_v49, 0.0 }
 0x20a   : > { %s2255_s10 = sshll.u32 %s3465_s23, 4  ;;  %s2253_s25 = scalar_lea.hbm %s5240_s4, %s5123_s11  ;;  %s2256_s10 = int_to_ptr.vmem [resolvable:$true] %s2255_s10 }
 0x20b   : > { %s2972_s26 = scalar_lea.vmem %s2256_s10, 128  ;;  %s3290_s0 = smov [#allocation12]  }
 0x20c   : > { %p2973_p10 = scmp.ne.s32.totalorder %s2256_s10, %s2972_s26  ;;  %s2976_s6 = sshll.u32 %s3290_s0, 4  ;;  %s2977_s6 = int_to_ptr.vmem [resolvable:$false] %s2976_s6 }
 0x20d   : > { %s2978_s30 = scalar_lea.vmem %s2977_s6, 256  ;;  %p2979_p3 = scmp.lt.s32.totalorder %s2256_s10, %s2977_s6 }
 0x20e   : > { %p2974_p2 = pnand %p2973_p10, %p5389_p8  ;;  %p2980_p5 = scmp.lt.s32.totalorder %s2978_s30, %s2972_s26 }
 0x210   : > { %p2975_p0 = pneg %p2974_p2  ;;  %p2981_p1 = por %p2980_p5, %p2979_p3 }
 0x212   : > { %p2982_p4 = pnand %p2981_p1, %p2975_p0 }
 0x216   : > { %v2880_v17 = vpop.eup %2879 }
 0x217   : > { %v2194_v35 = vmul.f32 %v2880_v17, %v2192_v49 }
 0x219   : > { %v2196_v45 = vsel %vm2195_vm8, %v2192_v49, %v2194_v35 }
 0x21a   : > { %v2199_v42 = vsel %vm2197_vm9, %v2198_v53, %v2196_v45 }
 0x21b   : > { %2200 = vst [vmem:[%s3465_s23] sm:$0xff] %v2199_v42 }
 0x21c   : > { %2985 = shalt.err (!%p2982_p4)
}
 0x21d   : > { %s2986_s29 = scalar_lea.hbm %s2253_s25, 128  ;;  %s2990_s7 = scalar_lea.hbm %s5240_s4, 256 }
 0x21e   : > { %p2987_p6 = scmp.ne.s32.totalorder %s2253_s25, %s2986_s29  ;;  %p2991_p13 = scmp.lt.s32.totalorder %s2253_s25, %s5240_s4 }
 0x21f   : > { %p2992_p7 = scmp.lt.s32.totalorder %s2990_s7, %s2986_s29 }
 0x220   : > { %p2988_p11 = pnand %p2987_p6, %p5389_p8 }
 0x221   : > { %p2993_p9 = por %p2992_p7, %p2991_p13 }
 0x222   : > { %p2989_p12 = pneg %p2988_p11 }
 0x224   : > { %p2994_p10 = pnand %p2993_p9, %p2989_p12 }
 0x226   : > { %2997 = shalt.err (!%p2994_p10)
}
 0x227   : > { %2524 = dma.vmem_to_hbm [thread:$0]  (%p5389_p8), %s2256_s10, 128, %s2253_s25, %s5143_s14  }
 0x228 PF: > { %s2267_s19 = sand.u32 1, %s3148_s15   ;;  %p5390_p2 = scmp.ne.s32.totalorder %s5258_s28, 0 }
 0x229   : > { %p5391_p0 = scmp.ge.s32.totalorder %s3160_s18, 2  ;;  %s2268_s9 = scalar_lea.sflag [#allocation6], %s2267_s19 }
 0x22b   : > { %p2537_p3 = pnand %p5391_p0, %p5390_p2 }
 0x22d   : > { %p2538_p5 = pneg %p2537_p3 }
 0x22f   : > { %3139 = dma.done.wait (%p2538_p5), %s2268_s9, 384  }
 0x230   : > { %3141 = vsyncadd (%p2538_p5), %s2268_s9, 4294966912  ;;  %s5392_s13 = sadd.s32 4294967294, %s3160_s18  }
 0x231   : > { %s2276_s8 = sand.u32 1, %s5392_s13  }
 0x232   : > { %s2277_s22 = scalar_lea.sflag [#allocation11], %s2276_s8 }
 0x233   : > { %3143 = dma.done.wait (%p2538_p5), %s2277_s22, 512  }
 0x234   : > { %3145 = vsyncadd (%p2538_p5), %s2277_s22, 4294966784  ;;  %p22_p8 = scmp.ge.s32.totalorder %s3341_s21, 4   ;;  %s5393_s15 = smov %s3152_s16 }
 0x235   : > { %s5394_s16 = smov %s3156_s17  ;;  %s5395_s17 = smov %s3353_s24 }
 0x236   : > { %s5396_s18 = smov %s3341_s21  ;;  %24 = sbr.rel (!%p22_p8) target bundleno = 10 (0xa), region = 151 }
 0x23b   :  { %2291 = vsyncpa [#allocation5], 1 }
 0x23c   :  { %2293 = vsyncpa [#allocation5 + $0x1], 1 }
 0x23d   :  { %2294 = vsyncpa [#allocation6], 1 }
 0x23e   :  { %2296 = vsyncpa [#allocation6 + $0x1], 1 }
 0x23f   :  { %2297 = vsyncpa [#allocation11], 1 }
 0x240   :  { %2299 = vsyncpa [#allocation11 + $0x1], 1 }
 0x241   :  { %2300 = vsyncpa [#allocation7], 1 }
 0x242   :  { %2302 = vsyncpa [#allocation7 + $0x1], 1 }

</bundles_post_ra>
